<compile_context>
chip_gen: v5e
topology: v5e:2x2
jax: 0.10.0
libtpu: 0.0.40
codegen_flags: <defaults>
</compile_context>

<pallas_src>
import functools

import jax
import jax.numpy as jnp
from jax.experimental import pallas as pl
from jax.experimental.pallas import tpu as pltpu

NUM_CLASSES = 23


def _round_up(x, m):
    return (x + m - 1) // m * m


# ----------------------------------------------------------------------------
# Pallas kernels
# ----------------------------------------------------------------------------
def _matmul_bias_act_kernel(a_ref, b_ref, bias_ref, o_ref, acc_ref, *, apply_relu):
    """Fused (A @ W + bias) with optional ReLU, accumulated over the K grid axis."""
    @pl.when(pl.program_id(2) == 0)
    def _init():
        acc_ref[...] = jnp.zeros_like(acc_ref)

    acc_ref[...] += jnp.dot(a_ref[...], b_ref[...],
                            preferred_element_type=jnp.float32)

    @pl.when(pl.program_id(2) == pl.num_programs(2) - 1)
    def _fin():
        y = acc_ref[...] + bias_ref[...]
        if apply_relu:
            y = jnp.maximum(y, 0.0)
        o_ref[...] = y.astype(o_ref.dtype)


def _max4_kernel(a_ref, b_ref, c_ref, d_ref, o_ref):
    o_ref[...] = jnp.maximum(jnp.maximum(a_ref[...], b_ref[...]),
                             jnp.maximum(c_ref[...], d_ref[...]))


def _add_kernel(a_ref, b_ref, o_ref):
    o_ref[...] = a_ref[...] + b_ref[...]


# ----------------------------------------------------------------------------
# Tiling heuristics + matmul wrapper
# ----------------------------------------------------------------------------
def _pick_tiles(M, K, N):
    """Full-K single block when it fits VMEM; lane-dense N (no pad when N<=512,
    so N=64/23 stay un-padded); M tile sized for a ~6 MiB bf16 A block and
    clamped down to the real M for the tiny-M classifier head."""
    Kp = _round_up(K, 8)
    if Kp <= 4608:                       # every 3x3 conv in this network
        tk = Kp
    elif Kp % 6272 == 0:                 # fc6: K = 49*512 = 25088 = 4*6272
        tk = 6272
    else:
        tk = 2048
    tn = N if N <= 512 else 512          # 4096 -> 512, else a single N block
    base = (3 * 1024 * 1024) // tk       # elements -> A block <= ~6 MiB bf16
    base = max(256, min(2048, (base // 256) * 256))
    tm = min(base, _round_up(M, 8))
    return tm, tk, tn, Kp


def matmul_bias_act(a, w, b, *, relu):
    """y = [relu](a @ w + b); a:(M,K) bf16, w:(K,N) bf16, b:(N,) f32 -> bf16."""
    M, K = a.shape
    K2, N = w.shape
    assert K == K2
    tm, tk, tn, Kp = _pick_tiles(M, K, N)
    Mp = _round_up(M, tm)
    Kpp = _round_up(Kp, tk)
    Np = _round_up(N, tn)
    if (Mp, Kpp) != (M, K):
        a = jnp.pad(a, ((0, Mp - M), (0, Kpp - K)))
    if (Kpp, Np) != (K, N):
        w = jnp.pad(w, ((0, Kpp - K), (0, Np - N)))
    bias = b.astype(jnp.float32)
    if Np != N:
        bias = jnp.pad(bias, (0, Np - N))
    bias = bias.reshape(1, Np)

    kernel = functools.partial(_matmul_bias_act_kernel, apply_relu=relu)
    out = pl.pallas_call(
        kernel,
        out_shape=jax.ShapeDtypeStruct((Mp, Np), jnp.bfloat16),
        grid_spec=pltpu.PrefetchScalarGridSpec(
            num_scalar_prefetch=0,
            grid=(Mp // tm, Np // tn, Kpp // tk),
            in_specs=[
                pl.BlockSpec((tm, tk), lambda i, j, k: (i, k)),
                pl.BlockSpec((tk, tn), lambda i, j, k: (k, j)),
                pl.BlockSpec((1, tn), lambda i, j, k: (0, j)),
            ],
            out_specs=pl.BlockSpec((tm, tn), lambda i, j, k: (i, j)),
            scratch_shapes=[pltpu.VMEM((tm, tn), jnp.float32)],
        ),
        compiler_params=pltpu.CompilerParams(
            dimension_semantics=("parallel", "parallel", "arbitrary"),
            vmem_limit_bytes=48 * 1024 * 1024),
    )(a, w, bias)
    if (Mp, Np) != (M, N):
        out = out[:M, :N]
    return out


def conv2d(x, w, b, *, padding=0, relu=False):
    """Stride-1 conv, NHWC bf16 activations, HWIO bf16 weights; im2col + fused
    Pallas matmul+bias(+ReLU)."""
    n, h, wd, cin = x.shape
    kh, kw, _, cout = w.shape
    if padding:
        x = jnp.pad(x, ((0, 0), (padding, padding), (padding, padding), (0, 0)))
    hp, wp = h + 2 * padding, wd + 2 * padding
    ho, wo = hp - kh + 1, wp - kw + 1
    if kh == 1 and kw == 1:
        a = x.reshape(n * ho * wo, cin)
    else:
        cols = [x[:, dy:dy + ho, dx:dx + wo, :]
                for dy in range(kh) for dx in range(kw)]
        a = jnp.concatenate(cols, axis=-1).reshape(n * ho * wo, kh * kw * cin)
    y = matmul_bias_act(a, w.reshape(kh * kw * cin, cout), b, relu=relu)
    return y.reshape(n, ho, wo, cout)


def maxpool2x2_ceil(x):
    """MaxPool2d(2, stride=2, ceil_mode=True) on NHWC via a lane-dense Pallas
    max-of-4 kernel; rows are (batch*out_row) and the last dim is wo*C."""
    n, h, w, c = x.shape
    ho, wo = -(-h // 2), -(-w // 2)
    hp, wp = 2 * ho, 2 * wo
    if (hp, wp) != (h, w):
        x = jnp.pad(x, ((0, 0), (0, hp - h), (0, wp - w), (0, 0)),
                    constant_values=-jnp.inf)
    parts = [x[:, 0::2, 0::2, :], x[:, 0::2, 1::2, :],
             x[:, 1::2, 0::2, :], x[:, 1::2, 1::2, :]]
    rows, width = n * ho, wo * c
    parts = [p.reshape(rows, width) for p in parts]
    rb = min(64, _round_up(rows, 8))
    rows_p = _round_up(rows, rb)
    if rows_p != rows:
        parts = [jnp.pad(p, ((0, rows_p - rows), (0, 0))) for p in parts]
    spec = pl.BlockSpec((rb, width), lambda i: (i, 0))
    out = pl.pallas_call(
        _max4_kernel,
        out_shape=jax.ShapeDtypeStruct((rows_p, width), x.dtype),
        grid=(rows_p // rb,),
        in_specs=[spec, spec, spec, spec],
        out_specs=spec,
        compiler_params=pltpu.CompilerParams(dimension_semantics=("parallel",)),
    )(*parts)
    return out[:rows].reshape(n, ho, wo, c)


def add_pallas(x, y):
    """Elementwise add (small score tensors) via a whole-array Pallas kernel."""
    shape = x.shape
    c = shape[-1]
    a = x.reshape(-1, c)
    b = y.reshape(-1, c)
    out = pl.pallas_call(
        _add_kernel,
        out_shape=jax.ShapeDtypeStruct(a.shape, x.dtype),
    )(a, b)
    return out.reshape(shape)


def interpolate_nearest(x, out_h, out_w):
    """F.interpolate(mode='nearest') semantics: src = floor(dst * in/out)."""
    n, h, w, c = x.shape
    hi = (jnp.arange(out_h) * h) // out_h
    wi = (jnp.arange(out_w) * w) // out_w
    return x[:, hi][:, :, wi]


# ----------------------------------------------------------------------------
# Parameters (deterministic synthetic init; shapes match the PyTorch module)
# ----------------------------------------------------------------------------
def init_params(key, num_classes=NUM_CLASSES):
    specs = {
        'c1_1': (3, 3, 3, 64),    'c1_2': (3, 3, 64, 64),
        'c2_1': (3, 3, 64, 128),  'c2_2': (3, 3, 128, 128),
        'c3_1': (3, 3, 128, 256), 'c3_2': (3, 3, 256, 256), 'c3_3': (3, 3, 256, 256),
        'c4_1': (3, 3, 256, 512), 'c4_2': (3, 3, 512, 512), 'c4_3': (3, 3, 512, 512),
        'c5_1': (3, 3, 512, 512), 'c5_2': (3, 3, 512, 512), 'c5_3': (3, 3, 512, 512),
        'fc6':   (7, 7, 512, 4096),
        'fc7':   (1, 1, 4096, 4096),
        'score': (1, 1, 4096, num_classes),
        'pool4': (1, 1, 512, num_classes),
        'pool3': (1, 1, 256, num_classes),
    }
    params = {}
    keys = jax.random.split(key, 2 * len(specs))
    for i, (name, shp) in enumerate(specs.items()):
        kh, kw, cin, cout = shp
        fan_in = kh * kw * cin
        w = (jax.random.normal(keys[2 * i], shp, jnp.float32)
             * jnp.sqrt(2.0 / fan_in))
        params[name + '_w'] = w.astype(jnp.bfloat16)   # bf16 weight stream
        params[name + '_b'] = (jax.random.normal(keys[2 * i + 1], (cout,),
                                                 jnp.float32) * 0.01)
    return params


# ----------------------------------------------------------------------------
# Forward pass (mirrors SegmentationNN.forward)
# ----------------------------------------------------------------------------
def segmentation_nn_forward(x_nchw, p):
    x = jnp.transpose(x_nchw, (0, 2, 3, 1)).astype(jnp.bfloat16)  # -> NHWC bf16

    # conv_1 .. conv_5 (VGG16-style blocks)
    h = conv2d(x, p['c1_1_w'], p['c1_1_b'], padding=100, relu=True)
    h = conv2d(h, p['c1_2_w'], p['c1_2_b'], padding=1, relu=True)
    conv1 = maxpool2x2_ceil(h)

    h = conv2d(conv1, p['c2_1_w'], p['c2_1_b'], padding=1, relu=True)
    h = conv2d(h, p['c2_2_w'], p['c2_2_b'], padding=1, relu=True)
    conv2 = maxpool2x2_ceil(h)

    h = conv2d(conv2, p['c3_1_w'], p['c3_1_b'], padding=1, relu=True)
    h = conv2d(h, p['c3_2_w'], p['c3_2_b'], padding=1, relu=True)
    h = conv2d(h, p['c3_3_w'], p['c3_3_b'], padding=1, relu=True)
    conv3 = maxpool2x2_ceil(h)

    h = conv2d(conv3, p['c4_1_w'], p['c4_1_b'], padding=1, relu=True)
    h = conv2d(h, p['c4_2_w'], p['c4_2_b'], padding=1, relu=True)
    h = conv2d(h, p['c4_3_w'], p['c4_3_b'], padding=1, relu=True)
    conv4 = maxpool2x2_ceil(h)

    h = conv2d(conv4, p['c5_1_w'], p['c5_1_b'], padding=1, relu=True)
    h = conv2d(h, p['c5_2_w'], p['c5_2_b'], padding=1, relu=True)
    h = conv2d(h, p['c5_3_w'], p['c5_3_b'], padding=1, relu=True)
    conv5 = maxpool2x2_ceil(h)

    # classifier head (1x1 spatial -> tm=8 matmuls)
    s = conv2d(conv5, p['fc6_w'], p['fc6_b'], padding=0, relu=True)
    # TODO(synk): nn.Dropout2d is stochastic only in train mode; eval-mode identity used here.
    s = conv2d(s, p['fc7_w'], p['fc7_b'], padding=0, relu=True)
    score = conv2d(s, p['score_w'], p['score_b'], padding=0, relu=False)

    score_pool_4 = conv2d(conv4, p['pool4_w'], p['pool4_b'], padding=0, relu=False)
    score_pool_3 = conv2d(conv3, p['pool3_w'], p['pool3_b'], padding=0, relu=False)

    score = interpolate_nearest(score, score_pool_4.shape[1], score_pool_4.shape[2])
    score = add_pallas(score, score_pool_4)
    score = interpolate_nearest(score, score_pool_3.shape[1], score_pool_3.shape[2])
    score = add_pallas(score, score_pool_3)
    out = interpolate_nearest(score, x.shape[1], x.shape[2])

    return jnp.transpose(out, (0, 3, 1, 2)).astype(jnp.float32)  # back to NCHW f32


# ----------------------------------------------------------------------------
if __name__ == "__main__":
    key = jax.random.PRNGKey(0)
    pkey, xkey = jax.random.split(key)
    params = init_params(pkey, num_classes=NUM_CLASSES)

    # Small input consistent with the module (padding=100 in conv_1 keeps the
    # 7x7 classifier conv valid even for tiny inputs).
    x = jax.random.normal(xkey, (2, 3, 16, 16), dtype=jnp.float32)

    out = segmentation_nn_forward(x, params)
    out = jax.block_until_ready(out)

    assert out.shape == (2, NUM_CLASSES, 16, 16), out.shape
    assert bool(jnp.all(jnp.isfinite(out)))
    print("KERNEL_OK")
</pallas_src>

<mosaic_0001>
module attributes {stable_mosaic.version = 11 : i64} {
  func.func @_matmul_bias_act_kernel(%arg0: i32, %arg1: i32, %arg2: i32, %arg3: memref<2048x32xbf16, #tpu.memory_space<vmem>>, %arg4: memref<32x64xbf16, #tpu.memory_space<vmem>>, %arg5: memref<1x64xf32, #tpu.memory_space<vmem>>, %arg6: memref<2048x64xbf16, #tpu.memory_space<vmem>>, %arg7: memref<2048x64xf32, #tpu.memory_space<vmem>>) attributes {dimension_semantics = [#tpu.dimension_semantics<parallel>, #tpu.dimension_semantics<parallel>, #tpu.dimension_semantics<arbitrary>], iteration_bounds = array<i64: 45, 1, 1>, scalar_prefetch = 0 : i64, scratch_operands = 1 : i64, tpu.core_type = #tpu.core_type<tc>, window_params = [{transform_indices = @transform_0, window_bounds = array<i64: 2048, 32>}, {transform_indices = @transform_1, window_bounds = array<i64: 32, 64>}, {transform_indices = @transform_2, window_bounds = array<i64: 1, 64>}, {transform_indices = @transform_3, window_bounds = array<i64: 2048, 64>}]} {
    %c0_i32 = arith.constant 0 : i32
    %0 = arith.cmpi eq, %arg2, %c0_i32 : i32
    %1 = arith.extui %0 : i1 to i32
    %c0_i32_0 = arith.constant 0 : i32
    %2 = arith.cmpi ne, %1, %c0_i32_0 : i32
    scf.if %2 {
      %cst_10 = arith.constant 0.000000e+00 : f32
      %12 = vector.broadcast %cst_10 : f32 to vector<2048x64xf32>
      %c0_11 = arith.constant 0 : index
      %c0_12 = arith.constant 0 : index
      %13 = vector.load %arg7[%c0_11, %c0_12] : memref<2048x64xf32, #tpu.memory_space<vmem>>, vector<2048x64xf32>
      tpu.vector_store %arg7[%c0_11, %c0_12], %12 {strides = array<i32>} : memref<2048x64xf32, #tpu.memory_space<vmem>>, vector<2048x64xf32>,
    } else {
    }
    %c0 = arith.constant 0 : index
    %c0_1 = arith.constant 0 : index
    %3 = vector.load %arg7[%c0, %c0_1] : memref<2048x64xf32, #tpu.memory_space<vmem>>, vector<2048x64xf32>
    %c0_2 = arith.constant 0 : index
    %c0_3 = arith.constant 0 : index
    %4 = vector.load %arg3[%c0_2, %c0_3] : memref<2048x32xbf16, #tpu.memory_space<vmem>>, vector<2048x32xbf16>
    %c0_4 = arith.constant 0 : index
    %c0_5 = arith.constant 0 : index
    %5 = vector.load %arg4[%c0_4, %c0_5] : memref<32x64xbf16, #tpu.memory_space<vmem>>, vector<32x64xbf16>
    %cst = arith.constant dense<0.000000e+00> : vector<2048x64xf32>
    %6 = tpu.matmul %4, %5, %cst {dimension_numbers = #tpu.dot_dimension_numbers<[1], [0], [0], [1], [0, 0, 1, 1], [], []>} : vector<2048x32xbf16>, vector<32x64xbf16>, vector<2048x64xf32> -> vector<2048x64xf32>
    %7 = arith.addf %3, %6 : vector<2048x64xf32>
    %c0_6 = arith.constant 0 : index
    %c0_7 = arith.constant 0 : index
    %8 = vector.load %arg7[%c0_6, %c0_7] : memref<2048x64xf32, #tpu.memory_space<vmem>>, vector<2048x64xf32>
    tpu.vector_store %arg7[%c0_6, %c0_7], %7 {strides = array<i32>} : memref<2048x64xf32, #tpu.memory_space<vmem>>, vector<2048x64xf32>,
    %c0_i32_8 = arith.constant 0 : i32
    %9 = arith.cmpi eq, %arg2, %c0_i32_8 : i32
    %10 = arith.extui %9 : i1 to i32
    %c0_i32_9 = arith.constant 0 : i32
    %11 = arith.cmpi ne, %10, %c0_i32_9 : i32
    scf.if %11 {
      %c0_10 = arith.constant 0 : index
      %c0_11 = arith.constant 0 : index
      %12 = vector.load %arg7[%c0_10, %c0_11] : memref<2048x64xf32, #tpu.memory_space<vmem>>, vector<2048x64xf32>
      %c0_12 = arith.constant 0 : index
      %c0_13 = arith.constant 0 : index
      %13 = vector.load %arg5[%c0_12, %c0_13] : memref<1x64xf32, #tpu.memory_space<vmem>>, vector<1x64xf32>
      %14 = vector.broadcast %13 : vector<1x64xf32> to vector<2048x64xf32>
      %15 = arith.addf %12, %14 : vector<2048x64xf32>
      %cst_14 = arith.constant 0.000000e+00 : f32
      %16 = vector.broadcast %cst_14 : f32 to vector<2048x64xf32>
      %17 = arith.maximumf %15, %16 : vector<2048x64xf32>
      %18 = arith.truncf %17 : vector<2048x64xf32> to vector<2048x64xbf16>
      %c0_15 = arith.constant 0 : index
      %c0_16 = arith.constant 0 : index
      %19 = vector.load %arg6[%c0_15, %c0_16] : memref<2048x64xbf16, #tpu.memory_space<vmem>>, vector<2048x64xbf16>
      tpu.vector_store %arg6[%c0_15, %c0_16], %18 {strides = array<i32>} : memref<2048x64xbf16, #tpu.memory_space<vmem>>, vector<2048x64xbf16>,
    } else {
    }
    return
  }
  func.func @transform_0(%arg0: i32, %arg1: i32, %arg2: i32) -> (i32, i32) {
    %c0_i32 = arith.constant 0 : i32
    return %arg0, %arg2 : i32, i32
  }
  func.func @transform_1(%arg0: i32, %arg1: i32, %arg2: i32) -> (i32, i32) {
    %c0_i32 = arith.constant 0 : i32
    return %arg2, %arg1 : i32, i32
  }
  func.func @transform_2(%arg0: i32, %arg1: i32, %arg2: i32) -> (i32, i32) {
    %c0_i32 = arith.constant 0 : i32
    %c0_i32_0 = arith.constant 0 : i32
    return %c0_i32, %arg1 : i32, i32
  }
  func.func @transform_3(%arg0: i32, %arg1: i32, %arg2: i32) -> (i32, i32) {
    %c0_i32 = arith.constant 0 : i32
    return %arg0, %arg1 : i32, i32
  }
}

</mosaic_0001>

<bundles_post_ra>
// kernel: tpu_custom_call.1
= control target key start
LH: loop header
LB: loop body
LE: loop exit
PB: predicated region body
PF: predicated region fallthrough
CT: control target
= control target key end

     0   :  { %s5508_s12 = smov 0   ;;  %s5510_s13 = smov 0   ;;  %s8052_s0 = inlined_call_operand.vmem [shape: bf16[92160,32], index: 0, kind: input, shape index: {}]   ;;  %s8053_s1 = inlined_call_operand.vmem [shape: bf16[32,64], index: 1, kind: input, shape index: {}]   ;;  %s8054_s2 = inlined_call_operand.vmem [shape: f32[1,64], index: 2, kind: input, shape index: {}]   ;;  %s8055_s3 = inlined_call_operand.vmem [shape: bf16[92160,64], index: 3, kind: output, shape index: {}]  }
   0x1   :  { %s5512_s14 = smov 0  }
   0x2 LB: > { %s32_s15 = sadd.s32 1, %s5481_s13  ;;  %p4641_p0 = scmp.ge.s32.totalorder %s5485_s14, 1  ;;  %s5485_s14 = sphi %s5512_s14, %s13_s14   ;;  %s5481_s13 = sphi %s5510_s13, %s8057_s13   ;;  %s5477_s12 = sphi %s5508_s12, %s8056_s12  }
   0x3   : > { %p34_p1 = scmp.ge.s32.totalorder %s32_s15, 45  ;;  %p188_p2 = scmp.lt.s32.totalorder %s5485_s14, 46 }
   0x5   : > { %s8059_s15 = smov (%p34_p1, %s32_s15), 0  ;;  %p189_p3 = pnand %p4641_p0, %p188_p2 }
   0x6   : > { %s4642_s18 = sshll.u32 (!%p189_p3), %s5477_s12, 8 }
   0x7   : > { %192 = sbr.rel (%p189_p3) target bundleno = 792 (0x318), region = 32  ;;  %p230_p4 = scmp.lt.s32.totalorder (!%p189_p3), %s4642_s18, 11519 }
   0xc   : > { %v5425_v0 = vld [vmem:[%s8053_s1 + $0x8] sm:$0xff]  ;;  %v5424_v1 = vld [vmem:[%s8053_s1] sm:$0xff]  ;;  %s8061_s18 = smov (!%p230_p4, %s4642_s18), 11519  ;;  %vm1689_vm0 = vcmask 261120   ;;  %vm264_vm1 = vcmask 523264   ;;  %v5487_v26 = vmov 0.0  }
   0xd   : > { %2080 = vmatpush.bf16.msra.mxu0 %v5425_v0  ;;  %5426 = vmatpush.bf16.msra.mxu1 %v5425_v0  ;;  %s4643_s21 = sshll.u32 %s8061_s18, 2  ;;  %265 = vst.msk [vmem:[#allocation2] sm:$0xff] %vm264_vm1, %v5487_v26  ;;  %v5708_v38 = vld [vmem:[%s8054_s2] ss:$0 sm:$0xff]  ;;  %vm4267_vm2 = vcmask 519168  }
   0xe   : > { %5427 = vmatpush.bf16.msra.mxu2 %v5425_v0  ;;  %5428 = vmatpush.bf16.msra.mxu3 %v5425_v0  ;;  %s5540_s24 = scalar_lea.vmem %s8052_s0, %s4643_s21  ;;  %266 = vst.msk [vmem:[#allocation2 + $0x8] sm:$0xff] %vm264_vm1, %v5487_v26  ;;  %s5730_s29 = scalar_lea.vmem %s8055_s3, %s4643_s21 }
   0xf   : > { %v5296_v2 = vld [vmem:[%s5540_s24] sm:$0xff]  ;;  %v5297_v6 = vld [vmem:[%s5540_s24 + $0x8] sm:$0xff]  ;;  %v5298_v10 = vld [vmem:[%s5540_s24 + $0x10] sm:$0xff]  ;;  %267 = vst.msk [vmem:[#allocation2 + $0x10] sm:$0xff] %vm264_vm1, %v5487_v26 }
  0x10   : > { %v5328_v3 = vld [vmem:[%s5540_s24 + $0x100] sm:$0xff]  ;;  %v5329_v7 = vld [vmem:[%s5540_s24 + $0x108] sm:$0xff]  ;;  %v5330_v11 = vld [vmem:[%s5540_s24 + $0x110] sm:$0xff]  ;;  %268 = vst.msk [vmem:[#allocation2 + $0x18] sm:$0xff] %vm264_vm1, %v5487_v26 }
  0x11   : > { %2081 = vmatpush.bf16.msra.mxu0 %v5424_v1  ;;  %5429 = vmatpush.bf16.msra.mxu1 %v5424_v1  ;;  %v5360_v4 = vld [vmem:[%s5540_s24 + $0x200] sm:$0xff]  ;;  %v5361_v8 = vld [vmem:[%s5540_s24 + $0x208] sm:$0xff]  ;;  %v5362_v12 = vld [vmem:[%s5540_s24 + $0x210] sm:$0xff]  ;;  %269 = vst.msk [vmem:[#allocation2 + $0x20] sm:$0xff] %vm264_vm1, %v5487_v26 }
  0x12   : > { %5430 = vmatpush.bf16.msra.mxu2 %v5424_v1  ;;  %5431 = vmatpush.bf16.msra.mxu3 %v5424_v1  ;;  %v5392_v5 = vld [vmem:[%s5540_s24 + $0x300] sm:$0xff]  ;;  %v5393_v9 = vld [vmem:[%s5540_s24 + $0x308] sm:$0xff]  ;;  %v5394_v13 = vld [vmem:[%s5540_s24 + $0x310] sm:$0xff]  ;;  %270 = vst.msk [vmem:[#allocation2 + $0x28] sm:$0xff] %vm264_vm1, %v5487_v26 }
  0x13   : > { %v5299_v14 = vld [vmem:[%s5540_s24 + $0x18] sm:$0xff]  ;;  %v5300_v18 = vld [vmem:[%s5540_s24 + $0x20] sm:$0xff]  ;;  %v5301_v22 = vld [vmem:[%s5540_s24 + $0x28] sm:$0xff]  ;;  %271 = vst.msk [vmem:[#allocation2 + $0x30] sm:$0xff] %vm264_vm1, %v5487_v26 }
  0x14   : > { %5166 = vmatmul.msk.bf16.vlgmr.msra.gmra.mxu0 %vm1689_vm0, %v5296_v2  ;;  %5198 = vmatmul.msk.bf16.vlgmr.msra.gmra.mxu1 %vm1689_vm0, %v5328_v3  ;;  %v5331_v15 = vld [vmem:[%s5540_s24 + $0x118] sm:$0xff]  ;;  %v5332_v19 = vld [vmem:[%s5540_s24 + $0x120] sm:$0xff]  ;;  %v5333_v23 = vld [vmem:[%s5540_s24 + $0x128] sm:$0xff]  ;;  %272 = vst.msk [vmem:[#allocation2 + $0x38] sm:$0xff] %vm264_vm1, %v5487_v26 }
  0x15   : > { %5230 = vmatmul.msk.bf16.vlgmr.msra.gmra.mxu2 %vm1689_vm0, %v5360_v4  ;;  %5262 = vmatmul.msk.bf16.vlgmr.msra.gmra.mxu3 %vm1689_vm0, %v5392_v5  ;;  %v5363_v16 = vld [vmem:[%s5540_s24 + $0x218] sm:$0xff]  ;;  %v5364_v20 = vld [vmem:[%s5540_s24 + $0x220] sm:$0xff]  ;;  %v5365_v24 = vld [vmem:[%s5540_s24 + $0x228] sm:$0xff]  ;;  %273 = vst.msk [vmem:[#allocation2 + $0x40] sm:$0xff] %vm264_vm1, %v5487_v26 }
  0x16   : > { %v5395_v17 = vld [vmem:[%s5540_s24 + $0x318] sm:$0xff]  ;;  %v5396_v21 = vld [vmem:[%s5540_s24 + $0x320] sm:$0xff]  ;;  %v5397_v25 = vld [vmem:[%s5540_s24 + $0x328] sm:$0xff]  ;;  %274 = vst.msk [vmem:[#allocation2 + $0x48] sm:$0xff] %vm264_vm1, %v5487_v26 }
  0x17   : > { %v5302_v27 = vld [vmem:[%s5540_s24 + $0x30] sm:$0xff]  ;;  %275 = vst.msk [vmem:[#allocation2 + $0x50] sm:$0xff] %vm264_vm1, %v5487_v26  ;;  %v5303_v31 = vld [vmem:[%s5540_s24 + $0x38] sm:$0xff]  ;;  %v521_v35 = vld [vmem:[#allocation2] sm:$0xff] }
  0x18   : > { %v5334_v28 = vld [vmem:[%s5540_s24 + $0x130] sm:$0xff]  ;;  %276 = vst.msk [vmem:[#allocation2 + $0x58] sm:$0xff] %vm264_vm1, %v5487_v26  ;;  %v5335_v32 = vld [vmem:[%s5540_s24 + $0x138] sm:$0xff]  ;;  %v5304_v44 = vld [vmem:[%s5540_s24 + $0x40] sm:$0xff] }
  0x19   : > { %v5366_v29 = vld [vmem:[%s5540_s24 + $0x230] sm:$0xff]  ;;  %277 = vst.msk [vmem:[#allocation2 + $0x60] sm:$0xff] %vm264_vm1, %v5487_v26  ;;  %v5367_v33 = vld [vmem:[%s5540_s24 + $0x238] sm:$0xff]  ;;  %v5336_v45 = vld [vmem:[%s5540_s24 + $0x140] sm:$0xff] }
  0x1a   : > { %v5398_v30 = vld [vmem:[%s5540_s24 + $0x330] sm:$0xff]  ;;  %278 = vst.msk [vmem:[#allocation2 + $0x68] sm:$0xff] %vm264_vm1, %v5487_v26  ;;  %v5399_v34 = vld [vmem:[%s5540_s24 + $0x338] sm:$0xff]  ;;  %v5368_v46 = vld [vmem:[%s5540_s24 + $0x240] sm:$0xff] }
  0x1b   : > { %279 = vst.msk [vmem:[#allocation2 + $0x70] sm:$0xff] %vm264_vm1, %v5487_v26  ;;  %v5400_v47 = vld [vmem:[%s5540_s24 + $0x340] sm:$0xff]  ;;  %v5305_v56 = vld [vmem:[%s5540_s24 + $0x48] sm:$0xff] }
  0x1c   : > { %280 = vst.msk [vmem:[#allocation2 + $0x78] sm:$0xff] %vm264_vm1, %v5487_v26  ;;  %v5337_v57 = vld [vmem:[%s5540_s24 + $0x148] sm:$0xff] }
  0x1d   : > { %281 = vst.msk [vmem:[#allocation2 + $0x80] sm:$0xff] %vm264_vm1, %v5487_v26  ;;  %v5369_v58 = vld [vmem:[%s5540_s24 + $0x248] sm:$0xff] }
  0x1e   : > { %282 = vst.msk [vmem:[#allocation2 + $0x88] sm:$0xff] %vm264_vm1, %v5487_v26  ;;  %v5401_v59 = vld [vmem:[%s5540_s24 + $0x348] sm:$0xff] }
  0x1f   : > { %283 = vst.msk [vmem:[#allocation2 + $0x90] sm:$0xff] %vm264_vm1, %v5487_v26  ;;  %v522_v5 = vld [vmem:[#allocation2 + $0x8] sm:$0xff] }
  0x20   : > { %284 = vst.msk [vmem:[#allocation2 + $0x98] sm:$0xff] %vm264_vm1, %v5487_v26 }
  0x21   : > { %285 = vst.msk [vmem:[#allocation2 + $0xa0] sm:$0xff] %vm264_vm1, %v5487_v26 }
  0x22   : > { %286 = vst.msk [vmem:[#allocation2 + $0xa8] sm:$0xff] %vm264_vm1, %v5487_v26 }
  0x23   : > { %287 = vst.msk [vmem:[#allocation2 + $0xb0] sm:$0xff] %vm264_vm1, %v5487_v26 }
  0x24   : > { %5167 = vmatmul.msk.bf16.gmra.mxu0 %vm1689_vm0, %v5297_v6  ;;  %5199 = vmatmul.msk.bf16.gmra.mxu1 %vm1689_vm0, %v5329_v7  ;;  %288 = vst.msk [vmem:[#allocation2 + $0xb8] sm:$0xff] %vm264_vm1, %v5487_v26 }
  0x25   : > { %5231 = vmatmul.msk.bf16.gmra.mxu2 %vm1689_vm0, %v5361_v8  ;;  %5263 = vmatmul.msk.bf16.gmra.mxu3 %vm1689_vm0, %v5393_v9  ;;  %289 = vst.msk [vmem:[#allocation2 + $0xc0] sm:$0xff] %vm264_vm1, %v5487_v26  ;;  %v5306_v9 = vld [vmem:[%s5540_s24 + $0x50] sm:$0xff] }
  0x26   : > { %290 = vst.msk [vmem:[#allocation2 + $0xc8] sm:$0xff] %vm264_vm1, %v5487_v26 }
  0x27   : > { %291 = vst.msk [vmem:[#allocation2 + $0xd0] sm:$0xff] %vm264_vm1, %v5487_v26 }
  0x28   : > { %292 = vst.msk [vmem:[#allocation2 + $0xd8] sm:$0xff] %vm264_vm1, %v5487_v26 }
  0x29   : > { %293 = vst.msk [vmem:[#allocation2 + $0xe0] sm:$0xff] %vm264_vm1, %v5487_v26 }
  0x2a   : > { %294 = vst.msk [vmem:[#allocation2 + $0xe8] sm:$0xff] %vm264_vm1, %v5487_v26 }
  0x2b   : > { %295 = vst.msk [vmem:[#allocation2 + $0xf0] sm:$0xff] %vm264_vm1, %v5487_v26 }
  0x2c   : > { %296 = vst.msk [vmem:[#allocation2 + $0xf8] sm:$0xff] %vm264_vm1, %v5487_v26 }
  0x2d   : > { %297 = vst.msk [vmem:[#allocation2 + $0x100] sm:$0xff] %vm264_vm1, %v5487_v26 }
  0x2e   : > { %298 = vst.msk [vmem:[#allocation2 + $0x108] sm:$0xff] %vm264_vm1, %v5487_v26 }
  0x2f   : > { %299 = vst.msk [vmem:[#allocation2 + $0x110] sm:$0xff] %vm264_vm1, %v5487_v26 }
  0x30   : > { %300 = vst.msk [vmem:[#allocation2 + $0x118] sm:$0xff] %vm264_vm1, %v5487_v26 }
  0x31   : > { %301 = vst.msk [vmem:[#allocation2 + $0x120] sm:$0xff] %vm264_vm1, %v5487_v26 }
  0x32   : > { %302 = vst.msk [vmem:[#allocation2 + $0x128] sm:$0xff] %vm264_vm1, %v5487_v26 }
  0x33   : > { %303 = vst.msk [vmem:[#allocation2 + $0x130] sm:$0xff] %vm264_vm1, %v5487_v26 }
  0x34   : > { %5168 = vmatmul.msk.bf16.gmra.mxu0 %vm1689_vm0, %v5298_v10  ;;  %5200 = vmatmul.msk.bf16.gmra.mxu1 %vm1689_vm0, %v5330_v11  ;;  %304 = vst.msk [vmem:[#allocation2 + $0x138] sm:$0xff] %vm264_vm1, %v5487_v26  ;;  %v5338_v10 = vld [vmem:[%s5540_s24 + $0x150] sm:$0xff] }
  0x35   : > { %5232 = vmatmul.msk.bf16.gmra.mxu2 %vm1689_vm0, %v5362_v12  ;;  %5264 = vmatmul.msk.bf16.gmra.mxu3 %vm1689_vm0, %v5394_v13  ;;  %305 = vst.msk [vmem:[#allocation2 + $0x140] sm:$0xff] %vm264_vm1, %v5487_v26  ;;  %v5370_v11 = vld [vmem:[%s5540_s24 + $0x250] sm:$0xff] }
  0x36   : > { %306 = vst.msk [vmem:[#allocation2 + $0x148] sm:$0xff] %vm264_vm1, %v5487_v26 }
  0x37   : > { %307 = vst.msk [vmem:[#allocation2 + $0x150] sm:$0xff] %vm264_vm1, %v5487_v26 }
  0x38   : > { %308 = vst.msk [vmem:[#allocation2 + $0x158] sm:$0xff] %vm264_vm1, %v5487_v26 }
  0x39   : > { %309 = vst.msk [vmem:[#allocation2 + $0x160] sm:$0xff] %vm264_vm1, %v5487_v26 }
  0x3a   : > { %310 = vst.msk [vmem:[#allocation2 + $0x168] sm:$0xff] %vm264_vm1, %v5487_v26 }
  0x3b   : > { %311 = vst.msk [vmem:[#allocation2 + $0x170] sm:$0xff] %vm264_vm1, %v5487_v26 }
  0x3c   : > { %312 = vst.msk [vmem:[#allocation2 + $0x178] sm:$0xff] %vm264_vm1, %v5487_v26 }
  0x3d   : > { %313 = vst.msk [vmem:[#allocation2 + $0x180] sm:$0xff] %vm264_vm1, %v5487_v26 }
  0x3e   : > { %314 = vst.msk [vmem:[#allocation2 + $0x188] sm:$0xff] %vm264_vm1, %v5487_v26 }
  0x3f   : > { %315 = vst.msk [vmem:[#allocation2 + $0x190] sm:$0xff] %vm264_vm1, %v5487_v26 }
  0x40   : > { %316 = vst.msk [vmem:[#allocation2 + $0x198] sm:$0xff] %vm264_vm1, %v5487_v26 }
  0x41   : > { %317 = vst.msk [vmem:[#allocation2 + $0x1a0] sm:$0xff] %vm264_vm1, %v5487_v26 }
  0x42   : > { %318 = vst.msk [vmem:[#allocation2 + $0x1a8] sm:$0xff] %vm264_vm1, %v5487_v26 }
  0x43   : > { %319 = vst.msk [vmem:[#allocation2 + $0x1b0] sm:$0xff] %vm264_vm1, %v5487_v26 }
  0x44   : > { %5169 = vmatmul.msk.bf16.gmra.mxu0 %vm1689_vm0, %v5299_v14  ;;  %5201 = vmatmul.msk.bf16.gmra.mxu1 %vm1689_vm0, %v5331_v15  ;;  %320 = vst.msk [vmem:[#allocation2 + $0x1b8] sm:$0xff] %vm264_vm1, %v5487_v26  ;;  %v5402_v14 = vld [vmem:[%s5540_s24 + $0x350] sm:$0xff] }
  0x45   : > { %5233 = vmatmul.msk.bf16.gmra.mxu2 %vm1689_vm0, %v5363_v16  ;;  %5265 = vmatmul.msk.bf16.gmra.mxu3 %vm1689_vm0, %v5395_v17  ;;  %321 = vst.msk [vmem:[#allocation2 + $0x1c0] sm:$0xff] %vm264_vm1, %v5487_v26 }
  0x46   : > { %322 = vst.msk [vmem:[#allocation2 + $0x1c8] sm:$0xff] %vm264_vm1, %v5487_v26 }
  0x47   : > { %323 = vst.msk [vmem:[#allocation2 + $0x1d0] sm:$0xff] %vm264_vm1, %v5487_v26 }
  0x48   : > { %324 = vst.msk [vmem:[#allocation2 + $0x1d8] sm:$0xff] %vm264_vm1, %v5487_v26 }
  0x49   : > { %325 = vst.msk [vmem:[#allocation2 + $0x1e0] sm:$0xff] %vm264_vm1, %v5487_v26 }
  0x4a   : > { %326 = vst.msk [vmem:[#allocation2 + $0x1e8] sm:$0xff] %vm264_vm1, %v5487_v26 }
  0x4b   : > { %327 = vst.msk [vmem:[#allocation2 + $0x1f0] sm:$0xff] %vm264_vm1, %v5487_v26 }
  0x4c   : > { %328 = vst.msk [vmem:[#allocation2 + $0x1f8] sm:$0xff] %vm264_vm1, %v5487_v26 }
  0x4d   : > { %329 = vst.msk [vmem:[#allocation2 + $0x200] sm:$0xff] %vm264_vm1, %v5487_v26 }
  0x4e   : > { %330 = vst.msk [vmem:[#allocation2 + $0x208] sm:$0xff] %vm264_vm1, %v5487_v26 }
  0x4f   : > { %331 = vst.msk [vmem:[#allocation2 + $0x210] sm:$0xff] %vm264_vm1, %v5487_v26 }
  0x50   : > { %332 = vst.msk [vmem:[#allocation2 + $0x218] sm:$0xff] %vm264_vm1, %v5487_v26 }
  0x51   : > { %333 = vst.msk [vmem:[#allocation2 + $0x220] sm:$0xff] %vm264_vm1, %v5487_v26 }
  0x52   : > { %334 = vst.msk [vmem:[#allocation2 + $0x228] sm:$0xff] %vm264_vm1, %v5487_v26 }
  0x53   : > { %335 = vst.msk [vmem:[#allocation2 + $0x230] sm:$0xff] %vm264_vm1, %v5487_v26 }
  0x54   : > { %5170 = vmatmul.msk.bf16.gmra.mxu0 %vm1689_vm0, %v5300_v18  ;;  %5202 = vmatmul.msk.bf16.gmra.mxu1 %vm1689_vm0, %v5332_v19  ;;  %336 = vst.msk [vmem:[#allocation2 + $0x238] sm:$0xff] %vm264_vm1, %v5487_v26  ;;  %v585_v2 = vld [vmem:[#allocation2 + $0x200] sm:$0xff] }
  0x55   : > { %5234 = vmatmul.msk.bf16.gmra.mxu2 %vm1689_vm0, %v5364_v20  ;;  %5266 = vmatmul.msk.bf16.gmra.mxu3 %vm1689_vm0, %v5396_v21  ;;  %337 = vst.msk [vmem:[#allocation2 + $0x240] sm:$0xff] %vm264_vm1, %v5487_v26  ;;  %v586_v13 = vld [vmem:[#allocation2 + $0x208] sm:$0xff]  ;;  %v523_v20 = vld [vmem:[#allocation2 + $0x10] sm:$0xff] }
  0x56   : > { %338 = vst.msk [vmem:[#allocation2 + $0x248] sm:$0xff] %vm264_vm1, %v5487_v26 }
  0x57   : > { %339 = vst.msk [vmem:[#allocation2 + $0x250] sm:$0xff] %vm264_vm1, %v5487_v26 }
  0x58   : > { %340 = vst.msk [vmem:[#allocation2 + $0x258] sm:$0xff] %vm264_vm1, %v5487_v26 }
  0x59   : > { %341 = vst.msk [vmem:[#allocation2 + $0x260] sm:$0xff] %vm264_vm1, %v5487_v26 }
  0x5a   : > { %342 = vst.msk [vmem:[#allocation2 + $0x268] sm:$0xff] %vm264_vm1, %v5487_v26 }
  0x5b   : > { %343 = vst.msk [vmem:[#allocation2 + $0x270] sm:$0xff] %vm264_vm1, %v5487_v26 }
  0x5c   : > { %344 = vst.msk [vmem:[#allocation2 + $0x278] sm:$0xff] %vm264_vm1, %v5487_v26 }
  0x5d   : > { %345 = vst.msk [vmem:[#allocation2 + $0x280] sm:$0xff] %vm264_vm1, %v5487_v26 }
  0x5e   : > { %346 = vst.msk [vmem:[#allocation2 + $0x288] sm:$0xff] %vm264_vm1, %v5487_v26 }
  0x5f   : > { %347 = vst.msk [vmem:[#allocation2 + $0x290] sm:$0xff] %vm264_vm1, %v5487_v26 }
  0x60   : > { %348 = vst.msk [vmem:[#allocation2 + $0x298] sm:$0xff] %vm264_vm1, %v5487_v26 }
  0x61   : > { %349 = vst.msk [vmem:[#allocation2 + $0x2a0] sm:$0xff] %vm264_vm1, %v5487_v26 }
  0x62   : > { %350 = vst.msk [vmem:[#allocation2 + $0x2a8] sm:$0xff] %vm264_vm1, %v5487_v26 }
  0x63   : > { %351 = vst.msk [vmem:[#allocation2 + $0x2b0] sm:$0xff] %vm264_vm1, %v5487_v26 }
  0x64   : > { %5171 = vmatmul.msk.bf16.gmra.mxu0 %vm1689_vm0, %v5301_v22  ;;  %5203 = vmatmul.msk.bf16.gmra.mxu1 %vm1689_vm0, %v5333_v23  ;;  %352 = vst.msk [vmem:[#allocation2 + $0x2b8] sm:$0xff] %vm264_vm1, %v5487_v26  ;;  %v587_v22 = vld [vmem:[#allocation2 + $0x210] sm:$0xff] }
  0x65   : > { %5235 = vmatmul.msk.bf16.gmra.mxu2 %vm1689_vm0, %v5365_v24  ;;  %5267 = vmatmul.msk.bf16.gmra.mxu3 %vm1689_vm0, %v5397_v25  ;;  %353 = vst.msk [vmem:[#allocation2 + $0x2c0] sm:$0xff] %vm264_vm1, %v5487_v26 }
  0x66   : > { %354 = vst.msk [vmem:[#allocation2 + $0x2c8] sm:$0xff] %vm264_vm1, %v5487_v26 }
  0x67   : > { %355 = vst.msk [vmem:[#allocation2 + $0x2d0] sm:$0xff] %vm264_vm1, %v5487_v26 }
  0x68   : > { %356 = vst.msk [vmem:[#allocation2 + $0x2d8] sm:$0xff] %vm264_vm1, %v5487_v26 }
  0x69   : > { %357 = vst.msk [vmem:[#allocation2 + $0x2e0] sm:$0xff] %vm264_vm1, %v5487_v26 }
  0x6a   : > { %358 = vst.msk [vmem:[#allocation2 + $0x2e8] sm:$0xff] %vm264_vm1, %v5487_v26 }
  0x6b   : > { %359 = vst.msk [vmem:[#allocation2 + $0x2f0] sm:$0xff] %vm264_vm1, %v5487_v26 }
  0x6c   : > { %360 = vst.msk [vmem:[#allocation2 + $0x2f8] sm:$0xff] %vm264_vm1, %v5487_v26 }
  0x6d   : > { %361 = vst.msk [vmem:[#allocation2 + $0x300] sm:$0xff] %vm264_vm1, %v5487_v26 }
  0x6e   : > { %362 = vst.msk [vmem:[#allocation2 + $0x308] sm:$0xff] %vm264_vm1, %v5487_v26 }
  0x6f   : > { %363 = vst.msk [vmem:[#allocation2 + $0x310] sm:$0xff] %vm264_vm1, %v5487_v26 }
  0x70   : > { %364 = vst.msk [vmem:[#allocation2 + $0x318] sm:$0xff] %vm264_vm1, %v5487_v26 }
  0x71   : > { %365 = vst.msk [vmem:[#allocation2 + $0x320] sm:$0xff] %vm264_vm1, %v5487_v26 }
  0x72   : > { %366 = vst.msk [vmem:[#allocation2 + $0x328] sm:$0xff] %vm264_vm1, %v5487_v26 }
  0x73   : > { %367 = vst.msk [vmem:[#allocation2 + $0x330] sm:$0xff] %vm264_vm1, %v5487_v26 }
  0x74   : > { %5172 = vmatmul.msk.bf16.gmra.mxu0 %vm1689_vm0, %v5302_v27  ;;  %5204 = vmatmul.msk.bf16.gmra.mxu1 %vm1689_vm0, %v5334_v28  ;;  %368 = vst.msk [vmem:[#allocation2 + $0x338] sm:$0xff] %vm264_vm1, %v5487_v26 }
  0x75   : > { %5236 = vmatmul.msk.bf16.gmra.mxu2 %vm1689_vm0, %v5366_v29  ;;  %5268 = vmatmul.msk.bf16.gmra.mxu3 %vm1689_vm0, %v5398_v30  ;;  %369 = vst.msk [vmem:[#allocation2 + $0x340] sm:$0xff] %vm264_vm1, %v5487_v26 }
  0x76   : > { %370 = vst.msk [vmem:[#allocation2 + $0x348] sm:$0xff] %vm264_vm1, %v5487_v26 }
  0x77   : > { %371 = vst.msk [vmem:[#allocation2 + $0x350] sm:$0xff] %vm264_vm1, %v5487_v26 }
  0x78   : > { %372 = vst.msk [vmem:[#allocation2 + $0x358] sm:$0xff] %vm264_vm1, %v5487_v26 }
  0x79   : > { %373 = vst.msk [vmem:[#allocation2 + $0x360] sm:$0xff] %vm264_vm1, %v5487_v26 }
  0x7a   : > { %374 = vst.msk [vmem:[#allocation2 + $0x368] sm:$0xff] %vm264_vm1, %v5487_v26 }
  0x7b   : > { %375 = vst.msk [vmem:[#allocation2 + $0x370] sm:$0xff] %vm264_vm1, %v5487_v26 }
  0x7c   : > { %376 = vst.msk [vmem:[#allocation2 + $0x378] sm:$0xff] %vm264_vm1, %v5487_v26 }
  0x7d   : > { %377 = vst.msk [vmem:[#allocation2 + $0x380] sm:$0xff] %vm264_vm1, %v5487_v26 }
  0x7e   : > { %378 = vst.msk [vmem:[#allocation2 + $0x388] sm:$0xff] %vm264_vm1, %v5487_v26 }
  0x7f   : > { %379 = vst.msk [vmem:[#allocation2 + $0x390] sm:$0xff] %vm264_vm1, %v5487_v26 }
  0x80   : > { %380 = vst.msk [vmem:[#allocation2 + $0x398] sm:$0xff] %vm264_vm1, %v5487_v26 }
  0x81   : > { %381 = vst.msk [vmem:[#allocation2 + $0x3a0] sm:$0xff] %vm264_vm1, %v5487_v26 }
  0x82   : > { %382 = vst.msk [vmem:[#allocation2 + $0x3a8] sm:$0xff] %vm264_vm1, %v5487_v26 }
  0x83   : > { %383 = vst.msk [vmem:[#allocation2 + $0x3b0] sm:$0xff] %vm264_vm1, %v5487_v26 }
  0x84   : > { %5173 = vmatmul.msk.bf16.gmra.mxu0 %vm1689_vm0, %v5303_v31  ;;  %5205 = vmatmul.msk.bf16.gmra.mxu1 %vm1689_vm0, %v5335_v32  ;;  %384 = vst.msk [vmem:[#allocation2 + $0x3b8] sm:$0xff] %vm264_vm1, %v5487_v26  ;;  %v524_v32 = vld [vmem:[#allocation2 + $0x18] sm:$0xff] }
  0x85   : > { %5237 = vmatmul.msk.bf16.gmra.mxu2 %vm1689_vm0, %v5367_v33  ;;  %5269 = vmatmul.msk.bf16.gmra.mxu3 %vm1689_vm0, %v5399_v34  ;;  %385 = vst.msk [vmem:[#allocation2 + $0x3c0] sm:$0xff] %vm264_vm1, %v5487_v26  ;;  %v588_v34 = vld [vmem:[#allocation2 + $0x218] sm:$0xff] }
  0x86   : > { %386 = vst.msk [vmem:[#allocation2 + $0x3c8] sm:$0xff] %vm264_vm1, %v5487_v26 }
  0x87   : > { %387 = vst.msk [vmem:[#allocation2 + $0x3d0] sm:$0xff] %vm264_vm1, %v5487_v26 }
  0x88   : > { %388 = vst.msk [vmem:[#allocation2 + $0x3d8] sm:$0xff] %vm264_vm1, %v5487_v26 }
  0x89   : > { %389 = vst.msk [vmem:[#allocation2 + $0x3e0] sm:$0xff] %vm264_vm1, %v5487_v26 }
  0x8a   : > { %390 = vst.msk [vmem:[#allocation2 + $0x3e8] sm:$0xff] %vm264_vm1, %v5487_v26 }
  0x8b   : > { %391 = vst.msk [vmem:[#allocation2 + $0x3f0] sm:$0xff] %vm264_vm1, %v5487_v26 }
  0x8c   : > { %392 = vst.msk [vmem:[#allocation2 + $0x3f8] sm:$0xff] %vm264_vm1, %v5487_v26 }
  0x8d   : > { %393 = vst.msk [vmem:[#allocation2 + $0x400] sm:$0xff] %vm264_vm1, %v5487_v26 }
  0x8e   : > { %394 = vst.msk [vmem:[#allocation2 + $0x408] sm:$0xff] %vm264_vm1, %v5487_v26 }
  0x8f   : > { %395 = vst.msk [vmem:[#allocation2 + $0x410] sm:$0xff] %vm264_vm1, %v5487_v26 }
  0x90   : > { %396 = vst.msk [vmem:[#allocation2 + $0x418] sm:$0xff] %vm264_vm1, %v5487_v26 }
  0x91   : > { %v2083_v36 = vpop.f32.mrf.mxu0  ;;  %397 = vst.msk [vmem:[#allocation2 + $0x420] sm:$0xff] %vm264_vm1, %v5487_v26  ;;  %v6054_v43 = vpop.f32.mrf.mxu1 }
  0x92   : > { %v2723_v37 = vadd.f32 %v2083_v36, %v521_v35  ;;  %398 = vst.msk [vmem:[#allocation2 + $0x428] sm:$0xff] %vm264_vm1, %v5487_v26  ;;  %v2787_v8 = vadd.f32 %v6054_v43, %v585_v2 }
  0x93   : > { %399 = vst.msk [vmem:[#allocation2 + $0x430] sm:$0xff] %vm264_vm1, %v5487_v26 }
  0x94   : > { %2980 = vst.msk [vmem:[#allocation2] sm:$0xff] %vm264_vm1, %v2723_v37  ;;  %5174 = vmatmul.msk.bf16.gmra.mxu0 %vm1689_vm0, %v5304_v44  ;;  %5206 = vmatmul.msk.bf16.gmra.mxu1 %vm1689_vm0, %v5336_v45  ;;  %v649_v3 = vld [vmem:[#allocation2 + $0x400] sm:$0xff] }
  0x95   : > { %400 = vst.msk [vmem:[#allocation2 + $0x438] sm:$0xff] %vm264_vm1, %v5487_v26  ;;  %5238 = vmatmul.msk.bf16.gmra.mxu2 %vm1689_vm0, %v5368_v46  ;;  %5270 = vmatmul.msk.bf16.gmra.mxu3 %vm1689_vm0, %v5400_v47  ;;  %v650_v16 = vld [vmem:[#allocation2 + $0x408] sm:$0xff] }
  0x96   : > { %401 = vst.msk [vmem:[#allocation2 + $0x440] sm:$0xff] %vm264_vm1, %v5487_v26 }
  0x97   : > { %402 = vst.msk [vmem:[#allocation2 + $0x448] sm:$0xff] %vm264_vm1, %v5487_v26  ;;  %v652_v36 = vld [vmem:[#allocation2 + $0x418] sm:$0xff] }
  0x98   : > { %403 = vst.msk [vmem:[#allocation2 + $0x450] sm:$0xff] %vm264_vm1, %v5487_v26  ;;  %v6076_v48 = vpop.f32.mrf.mxu2  ;;  %v6080_v49 = vpop.f32.mrf.mxu3 }
  0x99   : > { %404 = vst.msk [vmem:[#allocation2 + $0x458] sm:$0xff] %vm264_vm1, %v5487_v26  ;;  %v6088_v50 = vpop.f32.mrf.mxu0  ;;  %v6090_v51 = vpop.f32.mrf.mxu1  ;;  %v2851_v12 = vadd.f32 %v6076_v48, %v649_v3  ;;  %v5371_v3 = vld [vmem:[%s5540_s24 + $0x258] sm:$0xff] }
  0x9a   : > { %405 = vst.msk [vmem:[#allocation2 + $0x460] sm:$0xff] %vm264_vm1, %v5487_v26  ;;  %v2724_v17 = vadd.f32 %v6088_v50, %v522_v5  ;;  %v2788_v19 = vadd.f32 %v6090_v51, %v586_v13 }
  0x9b   : > { %v3239_v39 = vld [vmem:[#allocation2] sm:$0xff]  ;;  %406 = vst.msk [vmem:[#allocation2 + $0x468] sm:$0xff] %vm264_vm1, %v5487_v26 }
  0x9c   : > { %v3499_v40 = vadd.f32 %v5708_v38, %v3239_v39  ;;  %407 = vst.msk [vmem:[#allocation2 + $0x470] sm:$0xff] %vm264_vm1, %v5487_v26 }
  0x9d   : > { %408 = vst.msk [vmem:[#allocation2 + $0x478] sm:$0xff] %vm264_vm1, %v5487_v26 }
  0x9e   : > { %v3755_v41 = vmax.f32 %v3499_v40, 0.0  ;;  %409 = vst.msk [vmem:[#allocation2 + $0x480] sm:$0xff] %vm264_vm1, %v5487_v26 }
  0x9f   : > { %410 = vst.msk [vmem:[#allocation2 + $0x488] sm:$0xff] %vm264_vm1, %v5487_v26 }
  0xa0   : > { %v4011_v42 = vpack.c.bf16 %v3755_v41, %v3755_v41  ;;  %411 = vst.msk [vmem:[#allocation2 + $0x490] sm:$0xff] %vm264_vm1, %v5487_v26  ;;  %v6104_v52 = vpop.f32.mrf.mxu2  ;;  %v6106_v53 = vpop.f32.mrf.mxu3 }
  0xa1   : > { %412 = vst.msk [vmem:[#allocation2 + $0x498] sm:$0xff] %vm264_vm1, %v5487_v26  ;;  %v6112_v54 = vpop.f32.mrf.mxu0  ;;  %v6114_v55 = vpop.f32.mrf.mxu1  ;;  %v2852_v21 = vadd.f32 %v6104_v52, %v650_v16 }
  0xa2   : > { %4268 = vst.msk [vmem:[%s5730_s29] sm:$0xf] %vm4267_vm2, %v4011_v42  ;;  %v2725_v27 = vadd.f32 %v6112_v54, %v523_v20  ;;  %v2789_v31 = vadd.f32 %v6114_v55, %v587_v22 }
  0xa3   : > { %413 = vst.msk [vmem:[#allocation2 + $0x4a0] sm:$0xff] %vm264_vm1, %v5487_v26 }
  0xa4   : > { %414 = vst.msk [vmem:[#allocation2 + $0x4a8] sm:$0xff] %vm264_vm1, %v5487_v26  ;;  %5175 = vmatmul.msk.bf16.gmra.mxu0 %vm1689_vm0, %v5305_v56  ;;  %5207 = vmatmul.msk.bf16.gmra.mxu1 %vm1689_vm0, %v5337_v57 }
  0xa5   : > { %415 = vst.msk [vmem:[#allocation2 + $0x4b0] sm:$0xff] %vm264_vm1, %v5487_v26  ;;  %5239 = vmatmul.msk.bf16.gmra.mxu2 %vm1689_vm0, %v5369_v58  ;;  %5271 = vmatmul.msk.bf16.gmra.mxu3 %vm1689_vm0, %v5401_v59 }
  0xa6   : > { %416 = vst.msk [vmem:[#allocation2 + $0x4b8] sm:$0xff] %vm264_vm1, %v5487_v26 }
  0xa7   : > { %417 = vst.msk [vmem:[#allocation2 + $0x4c0] sm:$0xff] %vm264_vm1, %v5487_v26 }
  0xa8   : > { %418 = vst.msk [vmem:[#allocation2 + $0x4c8] sm:$0xff] %vm264_vm1, %v5487_v26  ;;  %v6136_v60 = vpop.f32.mrf.mxu2  ;;  %v6138_v61 = vpop.f32.mrf.mxu3 }
  0xa9   : > { %419 = vst.msk [vmem:[#allocation2 + $0x4d0] sm:$0xff] %vm264_vm1, %v5487_v26  ;;  %v6144_v62 = vpop.f32.mrf.mxu0  ;;  %v6146_v63 = vpop.f32.mrf.mxu1 }
  0xaa   : > { %420 = vst.msk [vmem:[#allocation2 + $0x4d8] sm:$0xff] %vm264_vm1, %v5487_v26  ;;  %v2726_v39 = vadd.f32 %v6144_v62, %v524_v32  ;;  %v2790_v42 = vadd.f32 %v6146_v63, %v588_v34 }
  0xab   : > { %421 = vst.msk [vmem:[#allocation2 + $0x4e0] sm:$0xff] %vm264_vm1, %v5487_v26 }
  0xac   : > { %422 = vst.msk [vmem:[#allocation2 + $0x4e8] sm:$0xff] %vm264_vm1, %v5487_v26 }
  0xad   : > { %423 = vst.msk [vmem:[#allocation2 + $0x4f0] sm:$0xff] %vm264_vm1, %v5487_v26 }
  0xae   : > { %424 = vst.msk [vmem:[#allocation2 + $0x4f8] sm:$0xff] %vm264_vm1, %v5487_v26 }
  0xaf   : > { %425 = vst.msk [vmem:[#allocation2 + $0x500] sm:$0xff] %vm264_vm1, %v5487_v26 }
  0xb0   : > { %426 = vst.msk [vmem:[#allocation2 + $0x508] sm:$0xff] %vm264_vm1, %v5487_v26  ;;  %v6160_v0 = vpop.f32.mrf.mxu2  ;;  %v6162_v1 = vpop.f32.mrf.mxu3 }
  0xb1   : > { %427 = vst.msk [vmem:[#allocation2 + $0x510] sm:$0xff] %vm264_vm1, %v5487_v26  ;;  %v6172_v6 = vpop.f32.mrf.mxu0  ;;  %v6174_v7 = vpop.f32.mrf.mxu1  ;;  %v2854_v45 = vadd.f32 %v6160_v0, %v652_v36 }
  0xb2   : > { %428 = vst.msk [vmem:[#allocation2 + $0x518] sm:$0xff] %vm264_vm1, %v5487_v26 }
  0xb3   : > { %429 = vst.msk [vmem:[#allocation2 + $0x520] sm:$0xff] %vm264_vm1, %v5487_v26 }
  0xb4   : > { %430 = vst.msk [vmem:[#allocation2 + $0x528] sm:$0xff] %vm264_vm1, %v5487_v26  ;;  %5176 = vmatmul.msk.bf16.gmra.mxu0 %vm1689_vm0, %v5306_v9  ;;  %5208 = vmatmul.msk.bf16.gmra.mxu1 %vm1689_vm0, %v5338_v10 }
  0xb5   : > { %431 = vst.msk [vmem:[#allocation2 + $0x530] sm:$0xff] %vm264_vm1, %v5487_v26  ;;  %5240 = vmatmul.msk.bf16.gmra.mxu2 %vm1689_vm0, %v5370_v11  ;;  %5272 = vmatmul.msk.bf16.gmra.mxu3 %vm1689_vm0, %v5402_v14 }
  0xb6   : > { %432 = vst.msk [vmem:[#allocation2 + $0x538] sm:$0xff] %vm264_vm1, %v5487_v26 }
  0xb7   : > { %433 = vst.msk [vmem:[#allocation2 + $0x540] sm:$0xff] %vm264_vm1, %v5487_v26 }
  0xb8   : > { %434 = vst.msk [vmem:[#allocation2 + $0x548] sm:$0xff] %vm264_vm1, %v5487_v26  ;;  %v6200_v23 = vpop.f32.mrf.mxu2  ;;  %v6202_v24 = vpop.f32.mrf.mxu3 }
  0xb9   : > { %435 = vst.msk [vmem:[#allocation2 + $0x550] sm:$0xff] %vm264_vm1, %v5487_v26  ;;  %v6208_v29 = vpop.f32.mrf.mxu0  ;;  %v6210_v30 = vpop.f32.mrf.mxu1 }
  0xba   : > { %436 = vst.msk [vmem:[#allocation2 + $0x558] sm:$0xff] %vm264_vm1, %v5487_v26 }
  0xbb   : > { %437 = vst.msk [vmem:[#allocation2 + $0x560] sm:$0xff] %vm264_vm1, %v5487_v26 }
  0xbc   : > { %438 = vst.msk [vmem:[#allocation2 + $0x568] sm:$0xff] %vm264_vm1, %v5487_v26 }
  0xbd   : > { %439 = vst.msk [vmem:[#allocation2 + $0x570] sm:$0xff] %vm264_vm1, %v5487_v26 }
  0xbe   : > { %440 = vst.msk [vmem:[#allocation2 + $0x578] sm:$0xff] %vm264_vm1, %v5487_v26 }
  0xbf   : > { %441 = vst.msk [vmem:[#allocation2 + $0x580] sm:$0xff] %vm264_vm1, %v5487_v26 }
  0xc0   : > { %442 = vst.msk [vmem:[#allocation2 + $0x588] sm:$0xff] %vm264_vm1, %v5487_v26  ;;  %v6226_v46 = vpop.f32.mrf.mxu2  ;;  %v6228_v47 = vpop.f32.mrf.mxu3 }
  0xc1   : > { %443 = vst.msk [vmem:[#allocation2 + $0x590] sm:$0xff] %vm264_vm1, %v5487_v26  ;;  %v6234_v54 = vpop.f32.mrf.mxu0  ;;  %v6236_v55 = vpop.f32.mrf.mxu1 }
  0xc2   : > { %444 = vst.msk [vmem:[#allocation2 + $0x598] sm:$0xff] %vm264_vm1, %v5487_v26 }
  0xc3   : > { %445 = vst.msk [vmem:[#allocation2 + $0x5a0] sm:$0xff] %vm264_vm1, %v5487_v26 }
  0xc4   : > { %446 = vst.msk [vmem:[#allocation2 + $0x5a8] sm:$0xff] %vm264_vm1, %v5487_v26 }
  0xc5   : > { %447 = vst.msk [vmem:[#allocation2 + $0x5b0] sm:$0xff] %vm264_vm1, %v5487_v26  ;;  %5241 = vmatmul.msk.bf16.gmra.mxu2 %vm1689_vm0, %v5371_v3 }
  0xc6   : > { %448 = vst.msk [vmem:[#allocation2 + $0x5b8] sm:$0xff] %vm264_vm1, %v5487_v26 }
  0xc7   : > { %449 = vst.msk [vmem:[#allocation2 + $0x5c0] sm:$0xff] %vm264_vm1, %v5487_v26 }
  0xc8   : > { %450 = vst.msk [vmem:[#allocation2 + $0x5c8] sm:$0xff] %vm264_vm1, %v5487_v26 }
  0xc9   : > { %451 = vst.msk [vmem:[#allocation2 + $0x5d0] sm:$0xff] %vm264_vm1, %v5487_v26 }
  0xca   : > { %452 = vst.msk [vmem:[#allocation2 + $0x5d8] sm:$0xff] %vm264_vm1, %v5487_v26 }
  0xcb   : > { %453 = vst.msk [vmem:[#allocation2 + $0x5e0] sm:$0xff] %vm264_vm1, %v5487_v26 }
  0xcc   : > { %454 = vst.msk [vmem:[#allocation2 + $0x5e8] sm:$0xff] %vm264_vm1, %v5487_v26 }
  0xcd   : > { %455 = vst.msk [vmem:[#allocation2 + $0x5f0] sm:$0xff] %vm264_vm1, %v5487_v26 }
  0xce   : > { %456 = vst.msk [vmem:[#allocation2 + $0x5f8] sm:$0xff] %vm264_vm1, %v5487_v26 }
  0xcf   : > { %457 = vst.msk [vmem:[#allocation2 + $0x600] sm:$0xff] %vm264_vm1, %v5487_v26 }
  0xd0   : > { %458 = vst.msk [vmem:[#allocation2 + $0x608] sm:$0xff] %vm264_vm1, %v5487_v26 }
  0xd1   : > { %459 = vst.msk [vmem:[#allocation2 + $0x610] sm:$0xff] %vm264_vm1, %v5487_v26 }
  0xd2   : > { %460 = vst.msk [vmem:[#allocation2 + $0x618] sm:$0xff] %vm264_vm1, %v5487_v26 }
  0xd3   : > { %461 = vst.msk [vmem:[#allocation2 + $0x620] sm:$0xff] %vm264_vm1, %v5487_v26 }
  0xd4   : > { %462 = vst.msk [vmem:[#allocation2 + $0x628] sm:$0xff] %vm264_vm1, %v5487_v26 }
  0xd5   : > { %463 = vst.msk [vmem:[#allocation2 + $0x630] sm:$0xff] %vm264_vm1, %v5487_v26 }
  0xd6   : > { %464 = vst.msk [vmem:[#allocation2 + $0x638] sm:$0xff] %vm264_vm1, %v5487_v26  ;;  %v713_v4 = vld [vmem:[#allocation2 + $0x600] sm:$0xff] }
  0xd7   : > { %465 = vst.msk [vmem:[#allocation2 + $0x640] sm:$0xff] %vm264_vm1, %v5487_v26  ;;  %v2915_v15 = vadd.f32 %v6080_v49, %v713_v4  ;;  %v714_v18 = vld [vmem:[#allocation2 + $0x608] sm:$0xff]  ;;  %v5403_v4 = vld [vmem:[%s5540_s24 + $0x358] sm:$0xff] }
  0xd8   : > { %466 = vst.msk [vmem:[#allocation2 + $0x648] sm:$0xff] %vm264_vm1, %v5487_v26  ;;  %v2916_v25 = vadd.f32 %v6106_v53, %v714_v18  ;;  %v715_v28 = vld [vmem:[#allocation2 + $0x610] sm:$0xff]  ;;  %5273 = vmatmul.msk.bf16.gmra.mxu3 %vm1689_vm0, %v5403_v4  ;;  %v590_v4 = vld [vmem:[#allocation2 + $0x228] sm:$0xff] }
  0xd9   : > { %467 = vst.msk [vmem:[#allocation2 + $0x650] sm:$0xff] %vm264_vm1, %v5487_v26  ;;  %v2917_v35 = vadd.f32 %v6138_v61, %v715_v28  ;;  %v5339_v61 = vld [vmem:[%s5540_s24 + $0x158] sm:$0xff] }
  0xda   : > { %468 = vst.msk [vmem:[#allocation2 + $0x658] sm:$0xff] %vm264_vm1, %v5487_v26  ;;  %5209 = vmatmul.msk.bf16.gmra.mxu1 %vm1689_vm0, %v5339_v61 }
  0xdb   : > { %469 = vst.msk [vmem:[#allocation2 + $0x660] sm:$0xff] %vm264_vm1, %v5487_v26 }
  0xdc   : > { %470 = vst.msk [vmem:[#allocation2 + $0x668] sm:$0xff] %vm264_vm1, %v5487_v26 }
  0xdd   : > { %471 = vst.msk [vmem:[#allocation2 + $0x670] sm:$0xff] %vm264_vm1, %v5487_v26 }
  0xde   : > { %472 = vst.msk [vmem:[#allocation2 + $0x678] sm:$0xff] %vm264_vm1, %v5487_v26 }
  0xdf   : > { %473 = vst.msk [vmem:[#allocation2 + $0x680] sm:$0xff] %vm264_vm1, %v5487_v26 }
  0xe0   : > { %474 = vst.msk [vmem:[#allocation2 + $0x688] sm:$0xff] %vm264_vm1, %v5487_v26 }
  0xe1   : > { %475 = vst.msk [vmem:[#allocation2 + $0x690] sm:$0xff] %vm264_vm1, %v5487_v26 }
  0xe2   : > { %476 = vst.msk [vmem:[#allocation2 + $0x698] sm:$0xff] %vm264_vm1, %v5487_v26 }
  0xe3   : > { %477 = vst.msk [vmem:[#allocation2 + $0x6a0] sm:$0xff] %vm264_vm1, %v5487_v26 }
  0xe4   : > { %478 = vst.msk [vmem:[#allocation2 + $0x6a8] sm:$0xff] %vm264_vm1, %v5487_v26 }
  0xe5   : > { %479 = vst.msk [vmem:[#allocation2 + $0x6b0] sm:$0xff] %vm264_vm1, %v5487_v26 }
  0xe6   : > { %480 = vst.msk [vmem:[#allocation2 + $0x6b8] sm:$0xff] %vm264_vm1, %v5487_v26 }
  0xe7   : > { %481 = vst.msk [vmem:[#allocation2 + $0x6c0] sm:$0xff] %vm264_vm1, %v5487_v26 }
  0xe8   : > { %482 = vst.msk [vmem:[#allocation2 + $0x6c8] sm:$0xff] %vm264_vm1, %v5487_v26 }
  0xe9   : > { %483 = vst.msk [vmem:[#allocation2 + $0x6d0] sm:$0xff] %vm264_vm1, %v5487_v26 }
  0xea   : > { %484 = vst.msk [vmem:[#allocation2 + $0x6d8] sm:$0xff] %vm264_vm1, %v5487_v26 }
  0xeb   : > { %485 = vst.msk [vmem:[#allocation2 + $0x6e0] sm:$0xff] %vm264_vm1, %v5487_v26 }
  0xec   : > { %486 = vst.msk [vmem:[#allocation2 + $0x6e8] sm:$0xff] %vm264_vm1, %v5487_v26 }
  0xed   : > { %487 = vst.msk [vmem:[#allocation2 + $0x6f0] sm:$0xff] %vm264_vm1, %v5487_v26 }
  0xee   : > { %488 = vst.msk [vmem:[#allocation2 + $0x6f8] sm:$0xff] %vm264_vm1, %v5487_v26 }
  0xef   : > { %489 = vst.msk [vmem:[#allocation2 + $0x700] sm:$0xff] %vm264_vm1, %v5487_v26 }
  0xf0   : > { %490 = vst.msk [vmem:[#allocation2 + $0x708] sm:$0xff] %vm264_vm1, %v5487_v26 }
  0xf1   : > { %491 = vst.msk [vmem:[#allocation2 + $0x710] sm:$0xff] %vm264_vm1, %v5487_v26 }
  0xf2   : > { %492 = vst.msk [vmem:[#allocation2 + $0x718] sm:$0xff] %vm264_vm1, %v5487_v26 }
  0xf3   : > { %493 = vst.msk [vmem:[#allocation2 + $0x720] sm:$0xff] %vm264_vm1, %v5487_v26 }
  0xf4   : > { %494 = vst.msk [vmem:[#allocation2 + $0x728] sm:$0xff] %vm264_vm1, %v5487_v26 }
  0xf5   : > { %495 = vst.msk [vmem:[#allocation2 + $0x730] sm:$0xff] %vm264_vm1, %v5487_v26 }
  0xf6   : > { %496 = vst.msk [vmem:[#allocation2 + $0x738] sm:$0xff] %vm264_vm1, %v5487_v26 }
  0xf7   : > { %497 = vst.msk [vmem:[#allocation2 + $0x740] sm:$0xff] %vm264_vm1, %v5487_v26 }
  0xf8   : > { %498 = vst.msk [vmem:[#allocation2 + $0x748] sm:$0xff] %vm264_vm1, %v5487_v26 }
  0xf9   : > { %499 = vst.msk [vmem:[#allocation2 + $0x750] sm:$0xff] %vm264_vm1, %v5487_v26 }
  0xfa   : > { %500 = vst.msk [vmem:[#allocation2 + $0x758] sm:$0xff] %vm264_vm1, %v5487_v26 }
  0xfb   : > { %501 = vst.msk [vmem:[#allocation2 + $0x760] sm:$0xff] %vm264_vm1, %v5487_v26 }
  0xfc   : > { %502 = vst.msk [vmem:[#allocation2 + $0x768] sm:$0xff] %vm264_vm1, %v5487_v26 }
  0xfd   : > { %503 = vst.msk [vmem:[#allocation2 + $0x770] sm:$0xff] %vm264_vm1, %v5487_v26 }
  0xfe   : > { %504 = vst.msk [vmem:[#allocation2 + $0x778] sm:$0xff] %vm264_vm1, %v5487_v26 }
  0xff   : > { %505 = vst.msk [vmem:[#allocation2 + $0x780] sm:$0xff] %vm264_vm1, %v5487_v26 }
 0x100   : > { %506 = vst.msk [vmem:[#allocation2 + $0x788] sm:$0xff] %vm264_vm1, %v5487_v26 }
 0x101   : > { %507 = vst.msk [vmem:[#allocation2 + $0x790] sm:$0xff] %vm264_vm1, %v5487_v26 }
 0x102   : > { %508 = vst.msk [vmem:[#allocation2 + $0x798] sm:$0xff] %vm264_vm1, %v5487_v26 }
 0x103   : > { %509 = vst.msk [vmem:[#allocation2 + $0x7a0] sm:$0xff] %vm264_vm1, %v5487_v26 }
 0x104   : > { %510 = vst.msk [vmem:[#allocation2 + $0x7a8] sm:$0xff] %vm264_vm1, %v5487_v26 }
 0x105   : > { %511 = vst.msk [vmem:[#allocation2 + $0x7b0] sm:$0xff] %vm264_vm1, %v5487_v26 }
 0x106   : > { %512 = vst.msk [vmem:[#allocation2 + $0x7b8] sm:$0xff] %vm264_vm1, %v5487_v26 }
 0x107   : > { %513 = vst.msk [vmem:[#allocation2 + $0x7c0] sm:$0xff] %vm264_vm1, %v5487_v26 }
 0x108   : > { %514 = vst.msk [vmem:[#allocation2 + $0x7c8] sm:$0xff] %vm264_vm1, %v5487_v26 }
 0x109   : > { %515 = vst.msk [vmem:[#allocation2 + $0x7d0] sm:$0xff] %vm264_vm1, %v5487_v26 }
 0x10a   : > { %516 = vst.msk [vmem:[#allocation2 + $0x7d8] sm:$0xff] %vm264_vm1, %v5487_v26 }
 0x10b   : > { %517 = vst.msk [vmem:[#allocation2 + $0x7e0] sm:$0xff] %vm264_vm1, %v5487_v26 }
 0x10c   : > { %518 = vst.msk [vmem:[#allocation2 + $0x7e8] sm:$0xff] %vm264_vm1, %v5487_v26 }
 0x10d   : > { %519 = vst.msk [vmem:[#allocation2 + $0x7f0] sm:$0xff] %vm264_vm1, %v5487_v26 }
 0x10e   : > { %520 = vst.msk [vmem:[#allocation2 + $0x7f8] sm:$0xff] %vm264_vm1, %v5487_v26  ;;  %v651_v26 = vld [vmem:[#allocation2 + $0x410] sm:$0xff] }
 0x10f   : > { %3044 = vst.msk [vmem:[#allocation2 + $0x200] sm:$0xff] %vm264_vm1, %v2787_v8  ;;  %v2853_v33 = vadd.f32 %v6136_v60, %v651_v26  ;;  %v5307_v60 = vld [vmem:[%s5540_s24 + $0x58] sm:$0xff]  ;;  %v6264_v26 = vpop.f32.mrf.mxu3 }
 0x110   : > { %3108 = vst.msk [vmem:[#allocation2 + $0x400] sm:$0xff] %vm264_vm1, %v2851_v12  ;;  %5177 = vmatmul.msk.bf16.gmra.mxu0 %vm1689_vm0, %v5307_v60  ;;  %v653_v60 = vld [vmem:[#allocation2 + $0x420] sm:$0xff] }
 0x111   : > { %3172 = vst.msk [vmem:[#allocation2 + $0x600] sm:$0xff] %vm264_vm1, %v2915_v15  ;;  %v2855_v3 = vadd.f32 %v6200_v23, %v653_v60 }
 0x112   : > { %2981 = vst.msk [vmem:[#allocation2 + $0x8] sm:$0xff] %vm264_vm1, %v2724_v17 }
 0x113   : > { %3045 = vst.msk [vmem:[#allocation2 + $0x208] sm:$0xff] %vm264_vm1, %v2788_v19 }
 0x114   : > { %3109 = vst.msk [vmem:[#allocation2 + $0x408] sm:$0xff] %vm264_vm1, %v2852_v21 }
 0x115   : > { %3173 = vst.msk [vmem:[#allocation2 + $0x608] sm:$0xff] %vm264_vm1, %v2916_v25  ;;  %v6262_v25 = vpop.f32.mrf.mxu2 }
 0x116   : > { %v3303_v37 = vld [vmem:[#allocation2 + $0x200] sm:$0xff]  ;;  %2982 = vst.msk [vmem:[#allocation2 + $0x10] sm:$0xff] %vm264_vm1, %v2725_v27 }
 0x117   : > { %v3563_v40 = vadd.f32 %v5708_v38, %v3303_v37  ;;  %v3367_v41 = vld [vmem:[#allocation2 + $0x400] sm:$0xff]  ;;  %3046 = vst.msk [vmem:[#allocation2 + $0x210] sm:$0xff] %vm264_vm1, %v2789_v31  ;;  %v6272_v37 = vpop.f32.mrf.mxu0 }
 0x118   : > { %v3627_v43 = vadd.f32 %v5708_v38, %v3367_v41  ;;  %v3431_v44 = vld [vmem:[#allocation2 + $0x600] sm:$0xff]  ;;  %3110 = vst.msk [vmem:[#allocation2 + $0x410] sm:$0xff] %vm264_vm1, %v2853_v33 }
 0x119   : > { %v3819_v48 = vmax.f32 %v3563_v40, 0.0  ;;  %v3691_v49 = vadd.f32 %v5708_v38, %v3431_v44  ;;  %v3240_v50 = vld [vmem:[#allocation2 + $0x8] sm:$0xff]  ;;  %3174 = vst.msk [vmem:[#allocation2 + $0x610] sm:$0xff] %vm264_vm1, %v2917_v35 }
 0x11a   : > { %v3883_v51 = vmax.f32 %v3627_v43, 0.0  ;;  %v3500_v52 = vadd.f32 %v5708_v38, %v3240_v50  ;;  %v3304_v53 = vld [vmem:[#allocation2 + $0x208] sm:$0xff]  ;;  %2983 = vst.msk [vmem:[#allocation2 + $0x18] sm:$0xff] %vm264_vm1, %v2726_v39  ;;  %v6274_v39 = vpop.f32.mrf.mxu1 }
 0x11b   : > { %v4075_v56 = vpack.c.bf16 %v3819_v48, %v3819_v48  ;;  %v3947_v57 = vmax.f32 %v3691_v49, 0.0  ;;  %v3564_v58 = vadd.f32 %v5708_v38, %v3304_v53  ;;  %v3368_v59 = vld [vmem:[#allocation2 + $0x408] sm:$0xff]  ;;  %3047 = vst.msk [vmem:[#allocation2 + $0x218] sm:$0xff] %vm264_vm1, %v2790_v42  ;;  %v716_v49 = vld [vmem:[#allocation2 + $0x618] sm:$0xff] }
 0x11c   : > { %v4139_v62 = vpack.c.bf16 %v3883_v51, %v3883_v51  ;;  %v3756_v63 = vmax.f32 %v3500_v52, 0.0  ;;  %v3628_v0 = vadd.f32 %v5708_v38, %v3368_v59  ;;  %v3432_v2 = vld [vmem:[#allocation2 + $0x608] sm:$0xff]  ;;  %3111 = vst.msk [vmem:[#allocation2 + $0x418] sm:$0xff] %vm264_vm1, %v2854_v45  ;;  %v525_v52 = vld [vmem:[#allocation2 + $0x20] sm:$0xff]  ;;  %v2918_v59 = vadd.f32 %v6162_v1, %v716_v49 }
 0x11d   : > { %4332 = vst.msk [vmem:[%s5730_s29 + $0x100] sm:$0xf] %vm4267_vm2, %v4075_v56  ;;  %v4203_v5 = vpack.c.bf16 %v3947_v57, %v3947_v57  ;;  %v3820_v8 = vmax.f32 %v3564_v58, 0.0  ;;  %v3692_v9 = vadd.f32 %v5708_v38, %v3432_v2  ;;  %v3241_v10 = vld [vmem:[#allocation2 + $0x10] sm:$0xff]  ;;  %v589_v57 = vld [vmem:[#allocation2 + $0x220] sm:$0xff]  ;;  %v526_v2 = vld [vmem:[#allocation2 + $0x28] sm:$0xff]  ;;  %v6298_v1 = vpop.f32.mrf.mxu2 }
 0x11e   : > { %4396 = vst.msk [vmem:[%s5730_s29 + $0x200] sm:$0xf] %vm4267_vm2, %v4139_v62  ;;  %v4012_v11 = vpack.c.bf16 %v3756_v63, %v3756_v63  ;;  %v3884_v12 = vmax.f32 %v3628_v0, 0.0  ;;  %v3501_v13 = vadd.f32 %v5708_v38, %v3241_v10  ;;  %v3305_v14 = vld [vmem:[#allocation2 + $0x210] sm:$0xff]  ;;  %v2727_v62 = vadd.f32 %v6172_v6, %v525_v52  ;;  %v717_v63 = vld [vmem:[#allocation2 + $0x620] sm:$0xff] }
 0x11f   : > { %4460 = vst.msk [vmem:[%s5730_s29 + $0x300] sm:$0xf] %vm4267_vm2, %v4203_v5  ;;  %v4076_v15 = vpack.c.bf16 %v3820_v8, %v3820_v8  ;;  %v3948_v16 = vmax.f32 %v3692_v9, 0.0  ;;  %v3565_v17 = vadd.f32 %v5708_v38, %v3305_v14  ;;  %v3369_v18 = vld [vmem:[#allocation2 + $0x410] sm:$0xff]  ;;  %v2791_v0 = vadd.f32 %v6174_v7, %v589_v57  ;;  %v6300_v5 = vpop.f32.mrf.mxu3  ;;  %v654_v8 = vld [vmem:[#allocation2 + $0x428] sm:$0xff]  ;;  %v6306_v23 = vpop.f32.mrf.mxu0  ;;  %v5340_v14 = vld [vmem:[%s5540_s24 + $0x160] sm:$0xff] }
 0x120   : > { %4269 = vst.msk [vmem:[%s5730_s29 + $0x4] sm:$0xf] %vm4267_vm2, %v4012_v11  ;;  %v4140_v19 = vpack.c.bf16 %v3884_v12, %v3884_v12  ;;  %v3757_v20 = vmax.f32 %v3501_v13, 0.0  ;;  %v3629_v21 = vadd.f32 %v5708_v38, %v3369_v18  ;;  %v3433_v22 = vld [vmem:[#allocation2 + $0x610] sm:$0xff]  ;;  %v2919_v6 = vadd.f32 %v6202_v24, %v717_v63  ;;  %v718_v9 = vld [vmem:[#allocation2 + $0x628] sm:$0xff]  ;;  %v5308_v13 = vld [vmem:[%s5540_s24 + $0x60] sm:$0xff]  ;;  %5210 = vmatmul.msk.bf16.gmra.mxu1 %vm1689_vm0, %v5340_v14 }
 0x121   : > { %4333 = vst.msk [vmem:[%s5730_s29 + $0x104] sm:$0xf] %vm4267_vm2, %v4076_v15  ;;  %v4204_v27 = vpack.c.bf16 %v3948_v16, %v3948_v16  ;;  %v3821_v28 = vmax.f32 %v3565_v17, 0.0  ;;  %v3693_v31 = vadd.f32 %v5708_v38, %v3433_v22  ;;  %v3242_v32 = vld [vmem:[#allocation2 + $0x18] sm:$0xff]  ;;  %v2728_v7 = vadd.f32 %v6208_v29, %v526_v2  ;;  %v527_v10 = vld [vmem:[#allocation2 + $0x30] sm:$0xff]  ;;  %v5372_v15 = vld [vmem:[%s5540_s24 + $0x260] sm:$0xff]  ;;  %5178 = vmatmul.msk.bf16.gmra.mxu0 %vm1689_vm0, %v5308_v13 }
 0x122   : > { %4397 = vst.msk [vmem:[%s5730_s29 + $0x204] sm:$0xf] %vm4267_vm2, %v4140_v19  ;;  %v4013_v33 = vpack.c.bf16 %v3757_v20, %v3757_v20  ;;  %v3885_v34 = vmax.f32 %v3629_v21, 0.0  ;;  %v3502_v35 = vadd.f32 %v5708_v38, %v3242_v32  ;;  %v3306_v36 = vld [vmem:[#allocation2 + $0x218] sm:$0xff]  ;;  %v6308_v11 = vpop.f32.mrf.mxu1  ;;  %v2792_v12 = vadd.f32 %v6210_v30, %v590_v4  ;;  %v591_v16 = vld [vmem:[#allocation2 + $0x230] sm:$0xff]  ;;  %v5404_v17 = vld [vmem:[%s5540_s24 + $0x360] sm:$0xff]  ;;  %5242 = vmatmul.msk.bf16.gmra.mxu2 %vm1689_vm0, %v5372_v15 }
 0x123   : > { %4461 = vst.msk [vmem:[%s5730_s29 + $0x304] sm:$0xf] %vm4267_vm2, %v4204_v27  ;;  %v4077_v40 = vpack.c.bf16 %v3821_v28, %v3821_v28  ;;  %v3949_v41 = vmax.f32 %v3693_v31, 0.0  ;;  %v3566_v42 = vadd.f32 %v5708_v38, %v3306_v36  ;;  %v3370_v43 = vld [vmem:[#allocation2 + $0x418] sm:$0xff]  ;;  %v2856_v24 = vadd.f32 %v6226_v46, %v654_v8  ;;  %v655_v18 = vld [vmem:[#allocation2 + $0x430] sm:$0xff]  ;;  %5274 = vmatmul.msk.bf16.gmra.mxu3 %vm1689_vm0, %v5404_v17  ;;  %v5341_v17 = vld [vmem:[%s5540_s24 + $0x168] sm:$0xff] }
 0x124   : > { %4270 = vst.msk [vmem:[%s5730_s29 + $0x8] sm:$0xf] %vm4267_vm2, %v4013_v33  ;;  %v4141_v44 = vpack.c.bf16 %v3885_v34, %v3885_v34  ;;  %v3758_v45 = vmax.f32 %v3502_v35, 0.0  ;;  %v3630_v48 = vadd.f32 %v5708_v38, %v3370_v43  ;;  %v2920_v29 = vadd.f32 %v6228_v47, %v718_v9  ;;  %v719_v19 = vld [vmem:[#allocation2 + $0x630] sm:$0xff]  ;;  %v528_v20 = vld [vmem:[#allocation2 + $0x38] sm:$0xff] }
 0x125   : > { %4334 = vst.msk [vmem:[%s5730_s29 + $0x108] sm:$0xf] %vm4267_vm2, %v4077_v40  ;;  %v4205_v50 = vpack.c.bf16 %v3949_v41, %v3949_v41  ;;  %v3822_v51 = vmax.f32 %v3566_v42, 0.0  ;;  %v2729_v30 = vadd.f32 %v6234_v54, %v527_v10  ;;  %v2793_v46 = vadd.f32 %v6236_v55, %v591_v16  ;;  %v6330_v22 = vpop.f32.mrf.mxu2  ;;  %v5309_v16 = vld [vmem:[%s5540_s24 + $0x68] sm:$0xff] }
 0x126   : > { %4398 = vst.msk [vmem:[%s5730_s29 + $0x208] sm:$0xf] %vm4267_vm2, %v4141_v44  ;;  %v4014_v53 = vpack.c.bf16 %v3758_v45, %v3758_v45  ;;  %v3886_v56 = vmax.f32 %v3630_v48, 0.0  ;;  %v2857_v21 = vadd.f32 %v6262_v25, %v655_v18  ;;  %v2921_v31 = vadd.f32 %v6264_v26, %v719_v19 }
 0x127   : > { %4462 = vst.msk [vmem:[%s5730_s29 + $0x308] sm:$0xf] %vm4267_vm2, %v4205_v50  ;;  %v4078_v58 = vpack.c.bf16 %v3822_v51, %v3822_v51  ;;  %v6332_v27 = vpop.f32.mrf.mxu3  ;;  %v2730_v33 = vadd.f32 %v6272_v37, %v528_v20  ;;  %v6340_v34 = vpop.f32.mrf.mxu0  ;;  %v5405_v20 = vld [vmem:[%s5540_s24 + $0x368] sm:$0xff] }
 0x128   : > { %4271 = vst.msk [vmem:[%s5730_s29 + $0xc] sm:$0xf] %vm4267_vm2, %v4014_v53  ;;  %v4142_v61 = vpack.c.bf16 %v3886_v56, %v3886_v56 }
 0x129   : > { %4335 = vst.msk [vmem:[%s5730_s29 + $0x10c] sm:$0xf] %vm4267_vm2, %v4078_v58 }
 0x12a   : > { %4399 = vst.msk [vmem:[%s5730_s29 + $0x20c] sm:$0xf] %vm4267_vm2, %v4142_v61  ;;  %v6342_v25 = vpop.f32.mrf.mxu1 }
 0x12b   : > { %3175 = vst.msk [vmem:[#allocation2 + $0x618] sm:$0xff] %vm264_vm1, %v2918_v59 }
 0x12c   : > { %2984 = vst.msk [vmem:[#allocation2 + $0x20] sm:$0xff] %vm264_vm1, %v2727_v62 }
 0x12d   : > { %3048 = vst.msk [vmem:[#allocation2 + $0x220] sm:$0xff] %vm264_vm1, %v2791_v0  ;;  %v6358_v62 = vpop.f32.mrf.mxu2 }
 0x12e   : > { %3112 = vst.msk [vmem:[#allocation2 + $0x420] sm:$0xff] %vm264_vm1, %v2855_v3 }
 0x12f   : > { %3176 = vst.msk [vmem:[#allocation2 + $0x620] sm:$0xff] %vm264_vm1, %v2919_v6  ;;  %v6360_v63 = vpop.f32.mrf.mxu3  ;;  %v6368_v10 = vpop.f32.mrf.mxu0 }
 0x130   : > { %2985 = vst.msk [vmem:[#allocation2 + $0x28] sm:$0xff] %vm264_vm1, %v2728_v7  ;;  %5211 = vmatmul.msk.bf16.gmra.mxu1 %vm1689_vm0, %v5341_v17 }
 0x131   : > { %3049 = vst.msk [vmem:[#allocation2 + $0x228] sm:$0xff] %vm264_vm1, %v2792_v12  ;;  %5179 = vmatmul.msk.bf16.gmra.mxu0 %vm1689_vm0, %v5309_v16  ;;  %v5406_v16 = vld [vmem:[%s5540_s24 + $0x370] sm:$0xff] }
 0x132   : > { %v3434_v47 = vld [vmem:[#allocation2 + $0x618] sm:$0xff]  ;;  %3113 = vst.msk [vmem:[#allocation2 + $0x428] sm:$0xff] %vm264_vm1, %v2856_v24  ;;  %v6370_v12 = vpop.f32.mrf.mxu1 }
 0x133   : > { %v3694_v54 = vadd.f32 %v5708_v38, %v3434_v47  ;;  %v3243_v28 = vld [vmem:[#allocation2 + $0x20] sm:$0xff]  ;;  %3177 = vst.msk [vmem:[#allocation2 + $0x628] sm:$0xff] %vm264_vm1, %v2920_v29  ;;  %5275 = vmatmul.msk.bf16.gmra.mxu3 %vm1689_vm0, %v5405_v20 }
 0x134   : > { %v3503_v32 = vadd.f32 %v5708_v38, %v3243_v28  ;;  %v3307_v55 = vld [vmem:[#allocation2 + $0x220] sm:$0xff]  ;;  %2986 = vst.msk [vmem:[#allocation2 + $0x30] sm:$0xff] %vm264_vm1, %v2729_v30 }
 0x135   : > { %v3950_v35 = vmax.f32 %v3694_v54, 0.0  ;;  %v3567_v36 = vadd.f32 %v5708_v38, %v3307_v55  ;;  %v3371_v40 = vld [vmem:[#allocation2 + $0x420] sm:$0xff]  ;;  %3050 = vst.msk [vmem:[#allocation2 + $0x230] sm:$0xff] %vm264_vm1, %v2793_v46  ;;  %v5373_v46 = vld [vmem:[%s5540_s24 + $0x268] sm:$0xff] }
 0x136   : > { %v3759_v41 = vmax.f32 %v3503_v32, 0.0  ;;  %v3631_v26 = vadd.f32 %v5708_v38, %v3371_v40  ;;  %v3435_v42 = vld [vmem:[#allocation2 + $0x620] sm:$0xff]  ;;  %3114 = vst.msk [vmem:[#allocation2 + $0x430] sm:$0xff] %vm264_vm1, %v2857_v21  ;;  %5243 = vmatmul.msk.bf16.gmra.mxu2 %vm1689_vm0, %v5373_v46  ;;  %v656_v40 = vld [vmem:[#allocation2 + $0x438] sm:$0xff] }
 0x137   : > { %v4206_v43 = vpack.c.bf16 %v3950_v35, %v3950_v35  ;;  %v3823_v37 = vmax.f32 %v3567_v36, 0.0  ;;  %v3695_v44 = vadd.f32 %v5708_v38, %v3435_v42  ;;  %v3244_v45 = vld [vmem:[#allocation2 + $0x28] sm:$0xff]  ;;  %3178 = vst.msk [vmem:[#allocation2 + $0x630] sm:$0xff] %vm264_vm1, %v2921_v31  ;;  %v6392_v55 = vld [vmem:[%s8054_s2] ss:$0 sm:$0xff]  ;;  %v592_v35 = vld [vmem:[#allocation2 + $0x238] sm:$0xff] }
 0x138   : > { %v4015_v48 = vpack.c.bf16 %v3759_v41, %v3759_v41  ;;  %v3887_v49 = vmax.f32 %v3631_v26, 0.0  ;;  %v3504_v50 = vadd.f32 %v5708_v38, %v3244_v45  ;;  %v3308_v51 = vld [vmem:[#allocation2 + $0x228] sm:$0xff]  ;;  %2987 = vst.msk [vmem:[#allocation2 + $0x38] sm:$0xff] %vm264_vm1, %v2730_v33  ;;  %v720_v42 = vld [vmem:[#allocation2 + $0x638] sm:$0xff]  ;;  %v2794_v45 = vadd.f32 %v6274_v39, %v592_v35 }
 0x139   : > { %4463 = vst.msk [vmem:[%s5730_s29 + $0x30c] sm:$0xf] %vm4267_vm2, %v4206_v43  ;;  %v4079_v52 = vpack.c.bf16 %v3823_v37, %v3823_v37  ;;  %v3951_v53 = vmax.f32 %v3695_v44, 0.0  ;;  %v3568_v56 = vadd.f32 %v5708_v38, %v3308_v51  ;;  %v3372_v57 = vld [vmem:[#allocation2 + $0x428] sm:$0xff]  ;;  %v2428_v43 = vpop.f32.mrf.mxu2  ;;  %v6401_v37 = vpop.f32.mrf.mxu3  ;;  %v593_v51 = vld [vmem:[#allocation2 + $0x240] sm:$0xff] }
 0x13a   : > { %4272 = vst.msk [vmem:[%s5730_s29 + $0x10] sm:$0xf] %vm4267_vm2, %v4015_v48  ;;  %v4143_v58 = vpack.c.bf16 %v3887_v49, %v3887_v49  ;;  %v3760_v59 = vmax.f32 %v3504_v50, 0.0  ;;  %v3632_v60 = vadd.f32 %v5708_v38, %v3372_v57  ;;  %v3436_v61 = vld [vmem:[#allocation2 + $0x628] sm:$0xff]  ;;  %v529_v48 = vld [vmem:[#allocation2 + $0x40] sm:$0xff]  ;;  %v2858_v50 = vadd.f32 %v6298_v1, %v656_v40 }
 0x13b   : > { %4336 = vst.msk [vmem:[%s5730_s29 + $0x110] sm:$0xf] %vm4267_vm2, %v4079_v52  ;;  %v4207_v0 = vpack.c.bf16 %v3951_v53, %v3951_v53  ;;  %v3824_v2 = vmax.f32 %v3568_v56, 0.0  ;;  %v3696_v3 = vadd.f32 %v5708_v38, %v3436_v61  ;;  %v3245_v4 = vld [vmem:[#allocation2 + $0x30] sm:$0xff]  ;;  %v6409_v52 = vpop.f32.mrf.mxu0  ;;  %v6411_v53 = vpop.f32.mrf.mxu1  ;;  %v2922_v56 = vadd.f32 %v6300_v5, %v720_v42  ;;  %v657_v57 = vld [vmem:[#allocation2 + $0x440] sm:$0xff]  ;;  %v530_v1 = vld [vmem:[#allocation2 + $0x48] sm:$0xff] }
 0x13c   : > { %4400 = vst.msk [vmem:[%s5730_s29 + $0x210] sm:$0xf] %vm4267_vm2, %v4143_v58  ;;  %v4016_v6 = vpack.c.bf16 %v3760_v59, %v3760_v59  ;;  %v3888_v8 = vmax.f32 %v3632_v60, 0.0  ;;  %v3505_v7 = vadd.f32 %v5708_v38, %v3245_v4  ;;  %v3309_v9 = vld [vmem:[#allocation2 + $0x230] sm:$0xff]  ;;  %v2731_v39 = vadd.f32 %v6306_v23, %v529_v48  ;;  %v721_v58 = vld [vmem:[#allocation2 + $0x640] sm:$0xff]  ;;  %v594_v61 = vld [vmem:[#allocation2 + $0x248] sm:$0xff] }
 0x13d   : > { %4464 = vst.msk [vmem:[%s5730_s29 + $0x310] sm:$0xf] %vm4267_vm2, %v4207_v0  ;;  %v4080_v13 = vpack.c.bf16 %v3824_v2, %v3824_v2  ;;  %v3952_v14 = vmax.f32 %v3696_v3, 0.0  ;;  %v3569_v15 = vadd.f32 %v5708_v38, %v3309_v9  ;;  %v3373_v24 = vld [vmem:[#allocation2 + $0x430] sm:$0xff]  ;;  %v2795_v59 = vadd.f32 %v6308_v11, %v593_v51  ;;  %v658_v0 = vld [vmem:[#allocation2 + $0x448] sm:$0xff] }
 0x13e   : > { %4273 = vst.msk [vmem:[%s5730_s29 + $0x14] sm:$0xf] %vm4267_vm2, %v4016_v6  ;;  %v4144_v29 = vpack.c.bf16 %v3888_v8, %v3888_v8  ;;  %v3761_v18 = vmax.f32 %v3505_v7, 0.0  ;;  %v3633_v30 = vadd.f32 %v5708_v38, %v3373_v24  ;;  %v3437_v19 = vld [vmem:[#allocation2 + $0x630] sm:$0xff]  ;;  %v2859_v60 = vadd.f32 %v6330_v22, %v657_v57  ;;  %v722_v2 = vld [vmem:[#allocation2 + $0x648] sm:$0xff] }
 0x13f   : > { %4337 = vst.msk [vmem:[%s5730_s29 + $0x114] sm:$0xf] %vm4267_vm2, %v4080_v13  ;;  %v4208_v47 = vpack.c.bf16 %v3952_v14, %v3952_v14  ;;  %v3825_v21 = vmax.f32 %v3569_v15, 0.0  ;;  %v3697_v54 = vadd.f32 %v5708_v38, %v3437_v19  ;;  %v3246_v28 = vld [vmem:[#allocation2 + $0x38] sm:$0xff]  ;;  %v2923_v5 = vadd.f32 %v6332_v27, %v721_v58  ;;  %v531_v4 = vld [vmem:[#allocation2 + $0x50] sm:$0xff] }
 0x140   : > { %4401 = vst.msk [vmem:[%s5730_s29 + $0x214] sm:$0xf] %vm4267_vm2, %v4144_v29  ;;  %v4017_v31 = vpack.c.bf16 %v3761_v18, %v3761_v18  ;;  %v3889_v32 = vmax.f32 %v3633_v30, 0.0  ;;  %v3506_v33 = vadd.f32 %v6392_v55, %v3246_v28  ;;  %v2732_v23 = vadd.f32 %v6340_v34, %v530_v1  ;;  %v595_v6 = vld [vmem:[#allocation2 + $0x250] sm:$0xff] }
 0x141   : > { %4465 = vst.msk [vmem:[%s5730_s29 + $0x314] sm:$0xf] %vm4267_vm2, %v4208_v47  ;;  %v4081_v38 = vpack.c.bf16 %v3825_v21, %v3825_v21  ;;  %v3953_v36 = vmax.f32 %v3697_v54, 0.0  ;;  %v6427_v11 = vpop.f32.mrf.mxu2  ;;  %v6429_v3 = vpop.f32.mrf.mxu3  ;;  %v2796_v22 = vadd.f32 %v6342_v25, %v594_v61  ;;  %v2860_v27 = vadd.f32 %v6358_v62, %v658_v0  ;;  %v659_v8 = vld [vmem:[#allocation2 + $0x450] sm:$0xff] }
 0x142   : > { %4274 = vst.msk [vmem:[%s5730_s29 + $0x18] sm:$0xf] %vm4267_vm2, %v4017_v31  ;;  %v4145_v41 = vpack.c.bf16 %v3889_v32, %v3889_v32  ;;  %v3762_v26 = vmax.f32 %v3506_v33, 0.0  ;;  %v2924_v9 = vadd.f32 %v6360_v63, %v722_v2  ;;  %v5310_v13 = vld [vmem:[%s5540_s24 + $0x70] sm:$0xff]  ;;  %v2733_v24 = vadd.f32 %v6368_v10, %v531_v4 }
 0x143   : > { %4338 = vst.msk [vmem:[%s5730_s29 + $0x118] sm:$0xf] %vm4267_vm2, %v4081_v38  ;;  %v4209_v44 = vpack.c.bf16 %v3953_v36, %v3953_v36  ;;  %v6435_v34 = vpop.f32.mrf.mxu0  ;;  %v6437_v7 = vpop.f32.mrf.mxu1  ;;  %v5342_v14 = vld [vmem:[%s5540_s24 + $0x170] sm:$0xff]  ;;  %v2797_v29 = vadd.f32 %v6370_v12, %v595_v6  ;;  %5180 = vmatmul.msk.bf16.gmra.mxu0 %vm1689_vm0, %v5310_v13  ;;  %v2861_v30 = vadd.f32 %v2428_v43, %v659_v8 }
 0x144   : > { %4402 = vst.msk [vmem:[%s5730_s29 + $0x218] sm:$0xf] %vm4267_vm2, %v4145_v41  ;;  %v4018_v49 = vpack.c.bf16 %v3762_v26, %v3762_v26  ;;  %v5374_v15 = vld [vmem:[%s5540_s24 + $0x270] sm:$0xff]  ;;  %5212 = vmatmul.msk.bf16.gmra.mxu1 %vm1689_vm0, %v5342_v14  ;;  %5276 = vmatmul.msk.bf16.gmra.mxu3 %vm1689_vm0, %v5406_v16 }
 0x145   : > { %4466 = vst.msk [vmem:[%s5730_s29 + $0x318] sm:$0xf] %vm4267_vm2, %v4209_v44 }
 0x146   : > { %4275 = vst.msk [vmem:[%s5730_s29 + $0x1c] sm:$0xf] %vm4267_vm2, %v4018_v49  ;;  %5244 = vmatmul.msk.bf16.gmra.mxu2 %vm1689_vm0, %v5374_v15 }
 0x147   : > { %3051 = vst.msk [vmem:[#allocation2 + $0x238] sm:$0xff] %vm264_vm1, %v2794_v45 }
 0x148   : > { %3115 = vst.msk [vmem:[#allocation2 + $0x438] sm:$0xff] %vm264_vm1, %v2858_v50 }
 0x149   : > { %3179 = vst.msk [vmem:[#allocation2 + $0x638] sm:$0xff] %vm264_vm1, %v2922_v56  ;;  %v6460_v21 = vpop.f32.mrf.mxu2  ;;  %v6462_v54 = vpop.f32.mrf.mxu3 }
 0x14a   : > { %2988 = vst.msk [vmem:[#allocation2 + $0x40] sm:$0xff] %vm264_vm1, %v2731_v39 }
 0x14b   : > { %3052 = vst.msk [vmem:[#allocation2 + $0x240] sm:$0xff] %vm264_vm1, %v2795_v59  ;;  %v6468_v41 = vpop.f32.mrf.mxu0  ;;  %v6470_v26 = vpop.f32.mrf.mxu1 }
 0x14c   : > { %3116 = vst.msk [vmem:[#allocation2 + $0x440] sm:$0xff] %vm264_vm1, %v2859_v60 }
 0x14d   : > { %3180 = vst.msk [vmem:[#allocation2 + $0x640] sm:$0xff] %vm264_vm1, %v2923_v5 }
 0x14e   : > { %v3310_v25 = vld [vmem:[#allocation2 + $0x238] sm:$0xff]  ;;  %2989 = vst.msk [vmem:[#allocation2 + $0x48] sm:$0xff] %vm264_vm1, %v2732_v23 }
 0x14f   : > { %v3570_v62 = vadd.f32 %v6392_v55, %v3310_v25  ;;  %v3374_v17 = vld [vmem:[#allocation2 + $0x438] sm:$0xff]  ;;  %3053 = vst.msk [vmem:[#allocation2 + $0x248] sm:$0xff] %vm264_vm1, %v2796_v22 }
 0x150   : > { %v3634_v63 = vadd.f32 %v6392_v55, %v3374_v17  ;;  %v3438_v18 = vld [vmem:[#allocation2 + $0x638] sm:$0xff]  ;;  %3117 = vst.msk [vmem:[#allocation2 + $0x448] sm:$0xff] %vm264_vm1, %v2860_v27  ;;  %v723_v17 = vld [vmem:[#allocation2 + $0x650] sm:$0xff] }
 0x151   : > { %v3826_v10 = vmax.f32 %v3570_v62, 0.0  ;;  %v3698_v19 = vadd.f32 %v6392_v55, %v3438_v18  ;;  %v3247_v46 = vld [vmem:[#allocation2 + $0x40] sm:$0xff]  ;;  %3181 = vst.msk [vmem:[#allocation2 + $0x648] sm:$0xff] %vm264_vm1, %v2924_v9  ;;  %v6490_v8 = vpop.f32.mrf.mxu2  ;;  %v6492_v9 = vpop.f32.mrf.mxu3 }
 0x152   : > { %v3890_v12 = vmax.f32 %v3634_v63, 0.0  ;;  %v3507_v20 = vadd.f32 %v6392_v55, %v3247_v46  ;;  %v3311_v47 = vld [vmem:[#allocation2 + $0x240] sm:$0xff]  ;;  %2990 = vst.msk [vmem:[#allocation2 + $0x50] sm:$0xff] %vm264_vm1, %v2733_v24  ;;  %v5343_v46 = vld [vmem:[%s5540_s24 + $0x178] sm:$0xff] }
 0x153   : > { %v4082_v28 = vpack.c.bf16 %v3826_v10, %v3826_v10  ;;  %v3954_v31 = vmax.f32 %v3698_v19, 0.0  ;;  %v3571_v32 = vadd.f32 %v6392_v55, %v3311_v47  ;;  %v3375_v33 = vld [vmem:[#allocation2 + $0x440] sm:$0xff]  ;;  %3054 = vst.msk [vmem:[#allocation2 + $0x250] sm:$0xff] %vm264_vm1, %v2797_v29  ;;  %v6500_v29 = vpop.f32.mrf.mxu0  ;;  %v6502_v63 = vpop.f32.mrf.mxu1  ;;  %v532_v10 = vld [vmem:[#allocation2 + $0x58] sm:$0xff] }
 0x154   : > { %v4146_v35 = vpack.c.bf16 %v3890_v12, %v3890_v12  ;;  %v3763_v38 = vmax.f32 %v3507_v20, 0.0  ;;  %v3635_v36 = vadd.f32 %v6392_v55, %v3375_v33  ;;  %v3439_v40 = vld [vmem:[#allocation2 + $0x640] sm:$0xff]  ;;  %3118 = vst.msk [vmem:[#allocation2 + $0x450] sm:$0xff] %vm264_vm1, %v2861_v30  ;;  %v5311_v19 = vld [vmem:[%s5540_s24 + $0x78] sm:$0xff]  ;;  %v2925_v33 = vadd.f32 %v6401_v37, %v723_v17  ;;  %5213 = vmatmul.msk.bf16.gmra.mxu1 %vm1689_vm0, %v5343_v46 }
 0x155   : > { %4339 = vst.msk [vmem:[%s5730_s29 + $0x11c] sm:$0xf] %vm4267_vm2, %v4082_v28  ;;  %v4210_v42 = vpack.c.bf16 %v3954_v31, %v3954_v31  ;;  %v3827_v43 = vmax.f32 %v3571_v32, 0.0  ;;  %v3699_v44 = vadd.f32 %v6392_v55, %v3439_v40  ;;  %v3248_v45 = vld [vmem:[#allocation2 + $0x48] sm:$0xff]  ;;  %v596_v47 = vld [vmem:[#allocation2 + $0x258] sm:$0xff]  ;;  %5181 = vmatmul.msk.bf16.gmra.mxu0 %vm1689_vm0, %v5311_v19 }
 0x156   : > { %4403 = vst.msk [vmem:[%s5730_s29 + $0x21c] sm:$0xf] %vm4267_vm2, %v4146_v35  ;;  %v4019_v48 = vpack.c.bf16 %v3763_v38, %v3763_v38  ;;  %v3891_v49 = vmax.f32 %v3635_v36, 0.0  ;;  %v3508_v50 = vadd.f32 %v6392_v55, %v3248_v45  ;;  %v3312_v51 = vld [vmem:[#allocation2 + $0x248] sm:$0xff]  ;;  %v5375_v28 = vld [vmem:[%s5540_s24 + $0x278] sm:$0xff]  ;;  %v2734_v36 = vadd.f32 %v6409_v52, %v532_v10 }
 0x157   : > { %4467 = vst.msk [vmem:[%s5730_s29 + $0x31c] sm:$0xf] %vm4267_vm2, %v4210_v42  ;;  %v4083_v56 = vpack.c.bf16 %v3827_v43, %v3827_v43  ;;  %v3955_v57 = vmax.f32 %v3699_v44, 0.0  ;;  %v3572_v39 = vadd.f32 %v6392_v55, %v3312_v51  ;;  %v3376_v58 = vld [vmem:[#allocation2 + $0x448] sm:$0xff]  ;;  %v5407_v31 = vld [vmem:[%s5540_s24 + $0x378] sm:$0xff]  ;;  %5245 = vmatmul.msk.bf16.gmra.mxu2 %vm1689_vm0, %v5375_v28  ;;  %v2798_v42 = vadd.f32 %v6411_v53, %v596_v47  ;;  %v533_v43 = vld [vmem:[#allocation2 + $0x60] sm:$0xff] }
 0x158   : > { %4276 = vst.msk [vmem:[%s5730_s29 + $0x20] sm:$0xf] %vm4267_vm2, %v4019_v48  ;;  %v4147_v59 = vpack.c.bf16 %v3891_v49, %v3891_v49  ;;  %v3764_v1 = vmax.f32 %v3508_v50, 0.0  ;;  %v3636_v60 = vadd.f32 %v6392_v55, %v3376_v58  ;;  %v3440_v61 = vld [vmem:[#allocation2 + $0x648] sm:$0xff]  ;;  %v660_v35 = vld [vmem:[#allocation2 + $0x458] sm:$0xff]  ;;  %5277 = vmatmul.msk.bf16.gmra.mxu3 %vm1689_vm0, %v5407_v31  ;;  %v597_v44 = vld [vmem:[#allocation2 + $0x260] sm:$0xff]  ;;  %v2735_v53 = vadd.f32 %v6435_v34, %v533_v43 }
 0x159   : > { %4340 = vst.msk [vmem:[%s5730_s29 + $0x120] sm:$0xf] %vm4267_vm2, %v4083_v56  ;;  %v4211_v5 = vpack.c.bf16 %v3955_v57, %v3955_v57  ;;  %v3828_v0 = vmax.f32 %v3572_v39, 0.0  ;;  %v3700_v23 = vadd.f32 %v6392_v55, %v3440_v61  ;;  %v3249_v2 = vld [vmem:[#allocation2 + $0x50] sm:$0xff]  ;;  %v724_v40 = vld [vmem:[#allocation2 + $0x658] sm:$0xff]  ;;  %v2862_v37 = vadd.f32 %v6427_v11, %v660_v35  ;;  %v6528_v45 = vpop.f32.mrf.mxu2  ;;  %v6530_v48 = vpop.f32.mrf.mxu3  ;;  %v661_v49 = vld [vmem:[#allocation2 + $0x460] sm:$0xff] }
 0x15a   : > { %4404 = vst.msk [vmem:[%s5730_s29 + $0x220] sm:$0xf] %vm4267_vm2, %v4147_v59  ;;  %v4020_v22 = vpack.c.bf16 %v3764_v1, %v3764_v1  ;;  %v3892_v4 = vmax.f32 %v3636_v60, 0.0  ;;  %v3509_v27 = vadd.f32 %v6392_v55, %v3249_v2  ;;  %v3313_v6 = vld [vmem:[#allocation2 + $0x250] sm:$0xff]  ;;  %v2926_v52 = vadd.f32 %v6429_v3, %v724_v40  ;;  %v725_v50 = vld [vmem:[#allocation2 + $0x660] sm:$0xff]  ;;  %v534_v57 = vld [vmem:[#allocation2 + $0x68] sm:$0xff] }
 0x15b   : > { %4468 = vst.msk [vmem:[%s5730_s29 + $0x320] sm:$0xf] %vm4267_vm2, %v4211_v5  ;;  %v4084_v13 = vpack.c.bf16 %v3828_v0, %v3828_v0  ;;  %v3956_v14 = vmax.f32 %v3700_v23, 0.0  ;;  %v3573_v15 = vadd.f32 %v6392_v55, %v3313_v6  ;;  %v3377_v25 = vld [vmem:[#allocation2 + $0x450] sm:$0xff]  ;;  %v6536_v51 = vpop.f32.mrf.mxu0  ;;  %v6538_v56 = vpop.f32.mrf.mxu1  ;;  %v2799_v11 = vadd.f32 %v6437_v7, %v597_v44  ;;  %v598_v3 = vld [vmem:[#allocation2 + $0x268] sm:$0xff] }
 0x15c   : > { %4277 = vst.msk [vmem:[%s5730_s29 + $0x24] sm:$0xf] %vm4267_vm2, %v4020_v22  ;;  %v4148_v24 = vpack.c.bf16 %v3892_v4, %v3892_v4  ;;  %v3765_v16 = vmax.f32 %v3509_v27, 0.0  ;;  %v3637_v62 = vadd.f32 %v6392_v55, %v3377_v25  ;;  %v2863_v39 = vadd.f32 %v6460_v21, %v661_v49  ;;  %v662_v34 = vld [vmem:[#allocation2 + $0x468] sm:$0xff]  ;;  %v535_v60 = vld [vmem:[#allocation2 + $0x70] sm:$0xff] }
 0x15d   : > { %4341 = vst.msk [vmem:[%s5730_s29 + $0x124] sm:$0xf] %vm4267_vm2, %v4084_v13  ;;  %v4212_v18 = vpack.c.bf16 %v3956_v14, %v3956_v14  ;;  %v3829_v30 = vmax.f32 %v3573_v15, 0.0  ;;  %v2927_v58 = vadd.f32 %v6462_v54, %v725_v50  ;;  %v2736_v59 = vadd.f32 %v6468_v41, %v534_v57  ;;  %v726_v1 = vld [vmem:[#allocation2 + $0x668] sm:$0xff]  ;;  %v5344_v14 = vld [vmem:[%s5540_s24 + $0x180] sm:$0xff] }
 0x15e   : > { %4405 = vst.msk [vmem:[%s5730_s29 + $0x224] sm:$0xf] %vm4267_vm2, %v4148_v24  ;;  %v4021_v12 = vpack.c.bf16 %v3765_v16, %v3765_v16  ;;  %v3893_v20 = vmax.f32 %v3637_v62, 0.0  ;;  %v2800_v7 = vadd.f32 %v6470_v26, %v598_v3  ;;  %v2864_v21 = vadd.f32 %v6490_v8, %v662_v34  ;;  %v5376_v16 = vld [vmem:[%s5540_s24 + $0x280] sm:$0xff] }
 0x15f   : > { %4469 = vst.msk [vmem:[%s5730_s29 + $0x324] sm:$0xf] %vm4267_vm2, %v4212_v18  ;;  %v4085_v32 = vpack.c.bf16 %v3829_v30, %v3829_v30  ;;  %v2928_v23 = vadd.f32 %v6492_v9, %v726_v1  ;;  %v2737_v22 = vadd.f32 %v6500_v29, %v535_v60  ;;  %v5312_v9 = vld [vmem:[%s5540_s24 + $0x80] sm:$0xff] }
 0x160   : > { %4278 = vst.msk [vmem:[%s5730_s29 + $0x28] sm:$0xf] %vm4267_vm2, %v4021_v12  ;;  %v4149_v38 = vpack.c.bf16 %v3893_v20, %v3893_v20  ;;  %v5408_v62 = vld [vmem:[%s5540_s24 + $0x380] sm:$0xff] }
 0x161   : > { %4342 = vst.msk [vmem:[%s5730_s29 + $0x128] sm:$0xf] %vm4267_vm2, %v4085_v32  ;;  %v6552_v5 = vpop.f32.mrf.mxu2  ;;  %v6554_v54 = vpop.f32.mrf.mxu3 }
 0x162   : > { %4406 = vst.msk [vmem:[%s5730_s29 + $0x228] sm:$0xf] %vm4267_vm2, %v4149_v38 }
 0x163   : > { %3182 = vst.msk [vmem:[#allocation2 + $0x650] sm:$0xff] %vm264_vm1, %v2925_v33  ;;  %v6562_v4 = vpop.f32.mrf.mxu0  ;;  %v6564_v27 = vpop.f32.mrf.mxu1 }
 0x164   : > { %2991 = vst.msk [vmem:[#allocation2 + $0x58] sm:$0xff] %vm264_vm1, %v2734_v36  ;;  %5214 = vmatmul.msk.bf16.gmra.mxu1 %vm1689_vm0, %v5344_v14 }
 0x165   : > { %3055 = vst.msk [vmem:[#allocation2 + $0x258] sm:$0xff] %vm264_vm1, %v2798_v42  ;;  %5182 = vmatmul.msk.bf16.gmra.mxu0 %vm1689_vm0, %v5312_v9 }
 0x166   : > { %3119 = vst.msk [vmem:[#allocation2 + $0x458] sm:$0xff] %vm264_vm1, %v2862_v37 }
 0x167   : > { %3183 = vst.msk [vmem:[#allocation2 + $0x658] sm:$0xff] %vm264_vm1, %v2926_v52  ;;  %5246 = vmatmul.msk.bf16.gmra.mxu2 %vm1689_vm0, %v5376_v16 }
 0x168   : > { %2992 = vst.msk [vmem:[#allocation2 + $0x60] sm:$0xff] %vm264_vm1, %v2735_v53  ;;  %5278 = vmatmul.msk.bf16.gmra.mxu3 %vm1689_vm0, %v5408_v62 }
 0x169   : > { %3056 = vst.msk [vmem:[#allocation2 + $0x260] sm:$0xff] %vm264_vm1, %v2799_v11  ;;  %v6588_v36 = vpop.f32.mrf.mxu2  ;;  %v6590_v40 = vpop.f32.mrf.mxu3 }
 0x16a   : > { %v3441_v61 = vld [vmem:[#allocation2 + $0x650] sm:$0xff]  ;;  %3120 = vst.msk [vmem:[#allocation2 + $0x460] sm:$0xff] %vm264_vm1, %v2863_v39 }
 0x16b   : > { %v3701_v0 = vadd.f32 %v6392_v55, %v3441_v61  ;;  %v3250_v41 = vld [vmem:[#allocation2 + $0x58] sm:$0xff]  ;;  %3184 = vst.msk [vmem:[#allocation2 + $0x660] sm:$0xff] %vm264_vm1, %v2927_v58  ;;  %v6598_v11 = vpop.f32.mrf.mxu0  ;;  %v6600_v57 = vpop.f32.mrf.mxu1 }
 0x16c   : > { %v3510_v26 = vadd.f32 %v6392_v55, %v3250_v41  ;;  %v3314_v2 = vld [vmem:[#allocation2 + $0x258] sm:$0xff]  ;;  %2993 = vst.msk [vmem:[#allocation2 + $0x68] sm:$0xff] %vm264_vm1, %v2736_v59 }
 0x16d   : > { %v3957_v6 = vmax.f32 %v3701_v0, 0.0  ;;  %v3574_v8 = vadd.f32 %v6392_v55, %v3314_v2  ;;  %v3378_v13 = vld [vmem:[#allocation2 + $0x458] sm:$0xff]  ;;  %3057 = vst.msk [vmem:[#allocation2 + $0x268] sm:$0xff] %vm264_vm1, %v2800_v7 }
 0x16e   : > { %v3766_v15 = vmax.f32 %v3510_v26, 0.0  ;;  %v3638_v25 = vadd.f32 %v6392_v55, %v3378_v13  ;;  %v3442_v24 = vld [vmem:[#allocation2 + $0x658] sm:$0xff]  ;;  %3121 = vst.msk [vmem:[#allocation2 + $0x468] sm:$0xff] %vm264_vm1, %v2864_v21  ;;  %v663_v13 = vld [vmem:[#allocation2 + $0x470] sm:$0xff] }
 0x16f   : > { %v4213_v17 = vpack.c.bf16 %v3957_v6, %v3957_v6  ;;  %v3830_v29 = vmax.f32 %v3574_v8, 0.0  ;;  %v3702_v18 = vadd.f32 %v6392_v55, %v3442_v24  ;;  %v3251_v30 = vld [vmem:[#allocation2 + $0x60] sm:$0xff]  ;;  %3185 = vst.msk [vmem:[#allocation2 + $0x668] sm:$0xff] %vm264_vm1, %v2928_v23 }
 0x170   : > { %v4022_v10 = vpack.c.bf16 %v3766_v15, %v3766_v15  ;;  %v3894_v19 = vmax.f32 %v3638_v25, 0.0  ;;  %v3511_v46 = vadd.f32 %v6392_v55, %v3251_v30  ;;  %v3315_v12 = vld [vmem:[#allocation2 + $0x260] sm:$0xff]  ;;  %2994 = vst.msk [vmem:[#allocation2 + $0x70] sm:$0xff] %vm264_vm1, %v2737_v22  ;;  %v599_v22 = vld [vmem:[#allocation2 + $0x270] sm:$0xff]  ;;  %v600_v30 = vld [vmem:[#allocation2 + $0x278] sm:$0xff] }
 0x171   : > { %4470 = vst.msk [vmem:[%s5730_s29 + $0x328] sm:$0xf] %vm4267_vm2, %v4213_v17  ;;  %v4086_v20 = vpack.c.bf16 %v3830_v29, %v3830_v29  ;;  %v3958_v47 = vmax.f32 %v3702_v18, 0.0  ;;  %v3575_v28 = vadd.f32 %v6392_v55, %v3315_v12  ;;  %v3379_v31 = vld [vmem:[#allocation2 + $0x460] sm:$0xff]  ;;  %v727_v15 = vld [vmem:[#allocation2 + $0x670] sm:$0xff]  ;;  %v2445_v25 = vpop.f32.mrf.mxu2  ;;  %v6618_v24 = vpop.f32.mrf.mxu3  ;;  %v2801_v62 = vadd.f32 %v6502_v63, %v599_v22  ;;  %v536_v17 = vld [vmem:[#allocation2 + $0x78] sm:$0xff] }
 0x172   : > { %4279 = vst.msk [vmem:[%s5730_s29 + $0x2c] sm:$0xf] %vm4267_vm2, %v4022_v10  ;;  %v4150_v32 = vpack.c.bf16 %v3894_v19, %v3894_v19  ;;  %v3767_v33 = vmax.f32 %v3511_v46, 0.0  ;;  %v3639_v35 = vadd.f32 %v6392_v55, %v3379_v31  ;;  %v3443_v38 = vld [vmem:[#allocation2 + $0x660] sm:$0xff]  ;;  %v2865_v18 = vadd.f32 %v6528_v45, %v663_v13  ;;  %v664_v10 = vld [vmem:[#allocation2 + $0x478] sm:$0xff]  ;;  %v5377_v63 = vld [vmem:[%s5540_s24 + $0x288] sm:$0xff] }
 0x173   : > { %4343 = vst.msk [vmem:[%s5730_s29 + $0x12c] sm:$0xf] %vm4267_vm2, %v4086_v20  ;;  %v4214_v42 = vpack.c.bf16 %v3958_v47, %v3958_v47  ;;  %v3831_v43 = vmax.f32 %v3575_v28, 0.0  ;;  %v3703_v37 = vadd.f32 %v6392_v55, %v3443_v38  ;;  %v3252_v44 = vld [vmem:[#allocation2 + $0x68] sm:$0xff]  ;;  %v6626_v19 = vpop.f32.mrf.mxu0  ;;  %v6628_v46 = vpop.f32.mrf.mxu1  ;;  %v2929_v12 = vadd.f32 %v6530_v48, %v727_v15  ;;  %v728_v31 = vld [vmem:[#allocation2 + $0x678] sm:$0xff]  ;;  %v665_v38 = vld [vmem:[#allocation2 + $0x480] sm:$0xff] }
 0x174   : > { %4407 = vst.msk [vmem:[%s5730_s29 + $0x22c] sm:$0xf] %vm4267_vm2, %v4150_v32  ;;  %v4023_v52 = vpack.c.bf16 %v3767_v33, %v3767_v33  ;;  %v3895_v49 = vmax.f32 %v3639_v35, 0.0  ;;  %v3512_v53 = vadd.f32 %v6392_v55, %v3252_v44  ;;  %v3316_v50 = vld [vmem:[#allocation2 + $0x268] sm:$0xff]  ;;  %v2738_v28 = vadd.f32 %v6536_v51, %v536_v17  ;;  %v537_v33 = vld [vmem:[#allocation2 + $0x80] sm:$0xff]  ;;  %v5314_v17 = vld [vmem:[%s5540_s24 + $0x90] sm:$0xff] }
 0x175   : > { %4471 = vst.msk [vmem:[%s5730_s29 + $0x32c] sm:$0xf] %vm4267_vm2, %v4214_v42  ;;  %v4087_v39 = vpack.c.bf16 %v3831_v43, %v3831_v43  ;;  %v3959_v3 = vmax.f32 %v3703_v37, 0.0  ;;  %v3576_v58 = vadd.f32 %v6392_v55, %v3316_v50  ;;  %v3380_v34 = vld [vmem:[#allocation2 + $0x468] sm:$0xff]  ;;  %v2802_v45 = vadd.f32 %v6538_v56, %v600_v30  ;;  %v601_v35 = vld [vmem:[#allocation2 + $0x280] sm:$0xff] }
 0x176   : > { %4280 = vst.msk [vmem:[%s5730_s29 + $0x30] sm:$0xf] %vm4267_vm2, %v4023_v52  ;;  %v4151_v59 = vpack.c.bf16 %v3895_v49, %v3895_v49  ;;  %v3768_v1 = vmax.f32 %v3512_v53, 0.0  ;;  %v3640_v7 = vadd.f32 %v6392_v55, %v3380_v34  ;;  %v3444_v60 = vld [vmem:[#allocation2 + $0x668] sm:$0xff]  ;;  %v2866_v48 = vadd.f32 %v6552_v5, %v664_v10  ;;  %v729_v42 = vld [vmem:[#allocation2 + $0x680] sm:$0xff] }
 0x177   : > { %4344 = vst.msk [vmem:[%s5730_s29 + $0x130] sm:$0xf] %vm4267_vm2, %v4087_v39  ;;  %v4215_v61 = vpack.c.bf16 %v3959_v3, %v3959_v3  ;;  %v3832_v21 = vmax.f32 %v3576_v58, 0.0  ;;  %v3704_v0 = vadd.f32 %v6392_v55, %v3444_v60  ;;  %v3253_v41 = vld [vmem:[#allocation2 + $0x70] sm:$0xff]  ;;  %v5313_v20 = vld [vmem:[%s5540_s24 + $0x88] sm:$0xff]  ;;  %5247 = vmatmul.msk.bf16.gmra.mxu2 %vm1689_vm0, %v5377_v63  ;;  %v2930_v51 = vadd.f32 %v6554_v54, %v728_v31 }
 0x178   : > { %4408 = vst.msk [vmem:[%s5730_s29 + $0x230] sm:$0xf] %vm4267_vm2, %v4151_v59  ;;  %v4024_v23 = vpack.c.bf16 %v3768_v1, %v3768_v1  ;;  %v3896_v26 = vmax.f32 %v3640_v7, 0.0  ;;  %v3513_v2 = vadd.f32 %v6392_v55, %v3253_v41  ;;  %v5345_v47 = vld [vmem:[%s5540_s24 + $0x188] sm:$0xff]  ;;  %5183 = vmatmul.msk.bf16.gmra.mxu0 %vm1689_vm0, %v5313_v20  ;;  %v2739_v56 = vadd.f32 %v6562_v4, %v537_v33  ;;  %v5378_v20 = vld [vmem:[%s5540_s24 + $0x290] sm:$0xff] }
 0x179   : > { %4472 = vst.msk [vmem:[%s5730_s29 + $0x330] sm:$0xf] %vm4267_vm2, %v4215_v61  ;;  %v4088_v6 = vpack.c.bf16 %v3832_v21, %v3832_v21  ;;  %v3960_v8 = vmax.f32 %v3704_v0, 0.0  ;;  %v5409_v32 = vld [vmem:[%s5540_s24 + $0x388] sm:$0xff]  ;;  %5215 = vmatmul.msk.bf16.gmra.mxu1 %vm1689_vm0, %v5345_v47  ;;  %v6652_v43 = vpop.f32.mrf.mxu2  ;;  %v6654_v37 = vpop.f32.mrf.mxu3  ;;  %v2803_v5 = vadd.f32 %v6564_v27, %v601_v35  ;;  %v2867_v54 = vadd.f32 %v6588_v36, %v665_v38  ;;  %v5410_v47 = vld [vmem:[%s5540_s24 + $0x390] sm:$0xff] }
 0x17a   : > { %4281 = vst.msk [vmem:[%s5730_s29 + $0x34] sm:$0xf] %vm4267_vm2, %v4024_v23  ;;  %v4152_v9 = vpack.c.bf16 %v3896_v26, %v3896_v26  ;;  %v3769_v14 = vmax.f32 %v3513_v2, 0.0  ;;  %5279 = vmatmul.msk.bf16.gmra.mxu3 %vm1689_vm0, %v5409_v32  ;;  %v538_v44 = vld [vmem:[#allocation2 + $0x88] sm:$0xff]  ;;  %v2931_v4 = vadd.f32 %v6590_v40, %v729_v42 }
 0x17b   : > { %4345 = vst.msk [vmem:[%s5730_s29 + $0x134] sm:$0xf] %vm4267_vm2, %v4088_v6  ;;  %v4216_v16 = vpack.c.bf16 %v3960_v8, %v3960_v8  ;;  %v602_v52 = vld [vmem:[#allocation2 + $0x288] sm:$0xff]  ;;  %v6660_v49 = vpop.f32.mrf.mxu0  ;;  %v6662_v53 = vpop.f32.mrf.mxu1  ;;  %v2740_v27 = vadd.f32 %v6598_v11, %v538_v44 }
 0x17c   : > { %4409 = vst.msk [vmem:[%s5730_s29 + $0x234] sm:$0xf] %vm4267_vm2, %v4152_v9  ;;  %v4025_v29 = vpack.c.bf16 %v3769_v14, %v3769_v14  ;;  %v666_v50 = vld [vmem:[#allocation2 + $0x488] sm:$0xff]  ;;  %v2804_v36 = vadd.f32 %v6600_v57, %v602_v52 }
 0x17d   : > { %4473 = vst.msk [vmem:[%s5730_s29 + $0x334] sm:$0xf] %vm4267_vm2, %v4216_v16  ;;  %v2868_v1 = vadd.f32 %v2445_v25, %v666_v50 }
 0x17e   : > { %4282 = vst.msk [vmem:[%s5730_s29 + $0x38] sm:$0xf] %vm4267_vm2, %v4025_v29  ;;  %v5346_v29 = vld [vmem:[%s5540_s24 + $0x190] sm:$0xff] }
 0x17f   : > { %3058 = vst.msk [vmem:[#allocation2 + $0x270] sm:$0xff] %vm264_vm1, %v2801_v62 }
 0x180   : > { %3122 = vst.msk [vmem:[#allocation2 + $0x470] sm:$0xff] %vm264_vm1, %v2865_v18 }
 0x181   : > { %3186 = vst.msk [vmem:[#allocation2 + $0x670] sm:$0xff] %vm264_vm1, %v2929_v12  ;;  %v6677_v57 = vpop.f32.mrf.mxu2  ;;  %v6679_v0 = vpop.f32.mrf.mxu3 }
 0x182   : > { %2995 = vst.msk [vmem:[#allocation2 + $0x78] sm:$0xff] %vm264_vm1, %v2738_v28 }
 0x183   : > { %3059 = vst.msk [vmem:[#allocation2 + $0x278] sm:$0xff] %vm264_vm1, %v2802_v45  ;;  %v6685_v9 = vpop.f32.mrf.mxu0  ;;  %v6687_v14 = vpop.f32.mrf.mxu1 }
 0x184   : > { %3123 = vst.msk [vmem:[#allocation2 + $0x478] sm:$0xff] %vm264_vm1, %v2866_v48 }
 0x185   : > { %3187 = vst.msk [vmem:[#allocation2 + $0x678] sm:$0xff] %vm264_vm1, %v2930_v51 }
 0x186   : > { %v3317_v39 = vld [vmem:[#allocation2 + $0x270] sm:$0xff]  ;;  %2996 = vst.msk [vmem:[#allocation2 + $0x80] sm:$0xff] %vm264_vm1, %v2739_v56 }
 0x187   : > { %v3577_v3 = vadd.f32 %v6392_v55, %v3317_v39  ;;  %v3381_v58 = vld [vmem:[#allocation2 + $0x470] sm:$0xff]  ;;  %3060 = vst.msk [vmem:[#allocation2 + $0x280] sm:$0xff] %vm264_vm1, %v2803_v5  ;;  %5248 = vmatmul.msk.bf16.gmra.mxu2 %vm1689_vm0, %v5378_v20  ;;  %v5315_v20 = vld [vmem:[%s5540_s24 + $0x98] sm:$0xff] }
 0x188   : > { %v3641_v34 = vadd.f32 %v6392_v55, %v3381_v58  ;;  %v3445_v59 = vld [vmem:[#allocation2 + $0x670] sm:$0xff]  ;;  %3124 = vst.msk [vmem:[#allocation2 + $0x480] sm:$0xff] %vm264_vm1, %v2867_v54  ;;  %5184 = vmatmul.msk.bf16.gmra.mxu0 %vm1689_vm0, %v5314_v17 }
 0x189   : > { %v3833_v40 = vmax.f32 %v3577_v3, 0.0  ;;  %v3705_v7 = vadd.f32 %v6392_v55, %v3445_v59  ;;  %v3254_v60 = vld [vmem:[#allocation2 + $0x78] sm:$0xff]  ;;  %3188 = vst.msk [vmem:[#allocation2 + $0x680] sm:$0xff] %vm264_vm1, %v2931_v4  ;;  %5216 = vmatmul.msk.bf16.gmra.mxu1 %vm1689_vm0, %v5346_v29  ;;  %v6715_v4 = vpop.f32.mrf.mxu2  ;;  %v6717_v50 = vpop.f32.mrf.mxu3 }
 0x18a   : > { %v3897_v11 = vmax.f32 %v3641_v34, 0.0  ;;  %v3514_v61 = vadd.f32 %v6392_v55, %v3254_v60  ;;  %v3318_v21 = vld [vmem:[#allocation2 + $0x278] sm:$0xff]  ;;  %2997 = vst.msk [vmem:[#allocation2 + $0x88] sm:$0xff] %vm264_vm1, %v2740_v27  ;;  %5280 = vmatmul.msk.bf16.gmra.mxu3 %vm1689_vm0, %v5410_v47 }
 0x18b   : > { %v4089_v41 = vpack.c.bf16 %v3833_v40, %v3833_v40  ;;  %v3961_v23 = vmax.f32 %v3705_v7, 0.0  ;;  %v3578_v26 = vadd.f32 %v6392_v55, %v3318_v21  ;;  %v3382_v2 = vld [vmem:[#allocation2 + $0x478] sm:$0xff]  ;;  %3061 = vst.msk [vmem:[#allocation2 + $0x288] sm:$0xff] %vm264_vm1, %v2804_v36  ;;  %v6725_v40 = vpop.f32.mrf.mxu0  ;;  %v6727_v7 = vpop.f32.mrf.mxu1 }
 0x18c   : > { %v4153_v22 = vpack.c.bf16 %v3897_v11, %v3897_v11  ;;  %v3770_v6 = vmax.f32 %v3514_v61, 0.0  ;;  %v3642_v8 = vadd.f32 %v6392_v55, %v3382_v2  ;;  %v3446_v13 = vld [vmem:[#allocation2 + $0x678] sm:$0xff]  ;;  %3125 = vst.msk [vmem:[#allocation2 + $0x488] sm:$0xff] %vm264_vm1, %v2868_v1  ;;  %v730_v1 = vld [vmem:[#allocation2 + $0x688] sm:$0xff]  ;;  %v539_v61 = vld [vmem:[#allocation2 + $0x90] sm:$0xff] }
 0x18d   : > { %4346 = vst.msk [vmem:[%s5730_s29 + $0x138] sm:$0xf] %vm4267_vm2, %v4089_v41  ;;  %v4217_v15 = vpack.c.bf16 %v3961_v23, %v3961_v23  ;;  %v3834_v25 = vmax.f32 %v3578_v26, 0.0  ;;  %v3706_v16 = vadd.f32 %v6392_v55, %v3446_v13  ;;  %v3255_v62 = vld [vmem:[#allocation2 + $0x80] sm:$0xff]  ;;  %v603_v23 = vld [vmem:[#allocation2 + $0x290] sm:$0xff]  ;;  %v2932_v2 = vadd.f32 %v6618_v24, %v730_v1  ;;  %v668_v29 = vld [vmem:[#allocation2 + $0x498] sm:$0xff] }
 0x18e   : > { %4410 = vst.msk [vmem:[%s5730_s29 + $0x238] sm:$0xf] %vm4267_vm2, %v4153_v22  ;;  %v4026_v18 = vpack.c.bf16 %v3770_v6, %v3770_v6  ;;  %v3898_v30 = vmax.f32 %v3642_v8, 0.0  ;;  %v3515_v10 = vadd.f32 %v6392_v55, %v3255_v62  ;;  %v3319_v12 = vld [vmem:[#allocation2 + $0x280] sm:$0xff]  ;;  %v667_v22 = vld [vmem:[#allocation2 + $0x490] sm:$0xff]  ;;  %v2741_v8 = vadd.f32 %v6626_v19, %v539_v61  ;;  %v604_v62 = vld [vmem:[#allocation2 + $0x298] sm:$0xff] }
 0x18f   : > { %4474 = vst.msk [vmem:[%s5730_s29 + $0x338] sm:$0xf] %vm4267_vm2, %v4217_v15  ;;  %v4090_v63 = vpack.c.bf16 %v3834_v25, %v3834_v25  ;;  %v3962_v28 = vmax.f32 %v3706_v16, 0.0  ;;  %v3579_v31 = vadd.f32 %v6392_v55, %v3319_v12  ;;  %v3383_v32 = vld [vmem:[#allocation2 + $0x480] sm:$0xff]  ;;  %v731_v13 = vld [vmem:[#allocation2 + $0x690] sm:$0xff]  ;;  %v2805_v15 = vadd.f32 %v6628_v46, %v603_v23  ;;  %v540_v25 = vld [vmem:[#allocation2 + $0x98] sm:$0xff] }
 0x190   : > { %4283 = vst.msk [vmem:[%s5730_s29 + $0x3c] sm:$0xf] %vm4267_vm2, %v4026_v18  ;;  %v4154_v45 = vpack.c.bf16 %v3898_v30, %v3898_v30  ;;  %v3771_v33 = vmax.f32 %v3515_v10, 0.0  ;;  %v3643_v48 = vadd.f32 %v6392_v55, %v3383_v32  ;;  %v3447_v35 = vld [vmem:[#allocation2 + $0x680] sm:$0xff]  ;;  %v2869_v16 = vadd.f32 %v6652_v43, %v667_v22  ;;  %v732_v18 = vld [vmem:[#allocation2 + $0x698] sm:$0xff] }
 0x191   : > { %4347 = vst.msk [vmem:[%s5730_s29 + $0x13c] sm:$0xf] %vm4267_vm2, %v4090_v63  ;;  %v4218_v51 = vpack.c.bf16 %v3962_v28, %v3962_v28  ;;  %v3835_v38 = vmax.f32 %v3579_v31, 0.0  ;;  %v3707_v56 = vadd.f32 %v6392_v55, %v3447_v35  ;;  %v3256_v42 = vld [vmem:[#allocation2 + $0x88] sm:$0xff]  ;;  %v6745_v24 = vpop.f32.mrf.mxu2  ;;  %v6747_v17 = vpop.f32.mrf.mxu3  ;;  %v2933_v19 = vadd.f32 %v6654_v37, %v731_v13  ;;  %v541_v30 = vld [vmem:[#allocation2 + $0xa0] sm:$0xff]  ;;  %v5347_v47 = vld [vmem:[%s5540_s24 + $0x198] sm:$0xff] }
 0x192   : > { %4411 = vst.msk [vmem:[%s5730_s29 + $0x23c] sm:$0xf] %vm4267_vm2, %v4154_v45  ;;  %v4027_v5 = vpack.c.bf16 %v3771_v33, %v3771_v33  ;;  %v3899_v44 = vmax.f32 %v3643_v48, 0.0  ;;  %v3516_v54 = vadd.f32 %v6392_v55, %v3256_v42  ;;  %v3320_v52 = vld [vmem:[#allocation2 + $0x288] sm:$0xff]  ;;  %v2742_v46 = vadd.f32 %v6660_v49, %v540_v25  ;;  %v5379_v63 = vld [vmem:[%s5540_s24 + $0x298] sm:$0xff]  ;;  %v605_v28 = vld [vmem:[#allocation2 + $0x2a0] sm:$0xff] }
 0x193   : > { %4475 = vst.msk [vmem:[%s5730_s29 + $0x33c] sm:$0xf] %vm4267_vm2, %v4218_v51  ;;  %v4091_v39 = vpack.c.bf16 %v3835_v38, %v3835_v38  ;;  %v3963_v27 = vmax.f32 %v3707_v56, 0.0  ;;  %v3580_v3 = vadd.f32 %v6392_v55, %v3320_v52  ;;  %v3384_v58 = vld [vmem:[#allocation2 + $0x488] sm:$0xff]  ;;  %v6753_v43 = vpop.f32.mrf.mxu0  ;;  %v6755_v10 = vpop.f32.mrf.mxu1  ;;  %v2806_v12 = vadd.f32 %v6662_v53, %v604_v62  ;;  %v5411_v31 = vld [vmem:[%s5540_s24 + $0x398] sm:$0xff]  ;;  %v669_v32 = vld [vmem:[#allocation2 + $0x4a0] sm:$0xff] }
 0x194   : > { %4284 = vst.msk [vmem:[%s5730_s29 + $0x40] sm:$0xf] %vm4267_vm2, %v4027_v5  ;;  %v4155_v36 = vpack.c.bf16 %v3899_v44, %v3899_v44  ;;  %v3772_v34 = vmax.f32 %v3516_v54, 0.0  ;;  %v3644_v59 = vadd.f32 %v6392_v55, %v3384_v58  ;;  %v2870_v37 = vadd.f32 %v6677_v57, %v668_v29  ;;  %v733_v45 = vld [vmem:[#allocation2 + $0x6a0] sm:$0xff]  ;;  %v542_v33 = vld [vmem:[#allocation2 + $0xa8] sm:$0xff] }
 0x195   : > { %4348 = vst.msk [vmem:[%s5730_s29 + $0x140] sm:$0xf] %vm4267_vm2, %v4091_v39  ;;  %v4219_v60 = vpack.c.bf16 %v3963_v27, %v3963_v27  ;;  %v3836_v11 = vmax.f32 %v3580_v3, 0.0  ;;  %v2934_v49 = vadd.f32 %v6679_v0, %v732_v18  ;;  %v2743_v53 = vadd.f32 %v6685_v9, %v541_v30 }
 0x196   : > { %4412 = vst.msk [vmem:[%s5730_s29 + $0x240] sm:$0xf] %vm4267_vm2, %v4155_v36  ;;  %v4028_v21 = vpack.c.bf16 %v3772_v34, %v3772_v34  ;;  %v3900_v41 = vmax.f32 %v3644_v59, 0.0  ;;  %v2807_v57 = vadd.f32 %v6687_v14, %v605_v28  ;;  %v2871_v48 = vadd.f32 %v6715_v4, %v669_v32  ;;  %v5316_v28 = vld [vmem:[%s5540_s24 + $0xa0] sm:$0xff] }
 0x197   : > { %4476 = vst.msk [vmem:[%s5730_s29 + $0x340] sm:$0xf] %vm4267_vm2, %v4219_v60  ;;  %v4092_v26 = vpack.c.bf16 %v3836_v11, %v3836_v11  ;;  %5249 = vmatmul.msk.bf16.gmra.mxu2 %vm1689_vm0, %v5379_v63  ;;  %v2935_v56 = vadd.f32 %v6717_v50, %v733_v45  ;;  %v2744_v5 = vadd.f32 %v6725_v40, %v542_v33  ;;  %v5412_v33 = vld [vmem:[%s5540_s24 + $0x3a0] sm:$0xff] }
 0x198   : > { %4285 = vst.msk [vmem:[%s5730_s29 + $0x44] sm:$0xf] %vm4267_vm2, %v4028_v21  ;;  %v4156_v6 = vpack.c.bf16 %v3900_v41, %v3900_v41  ;;  %5185 = vmatmul.msk.bf16.gmra.mxu0 %vm1689_vm0, %v5315_v20  ;;  %v6804_v41 = vld [vmem:[%s8054_s2] ss:$0 sm:$0xff] }
 0x199   : > { %4349 = vst.msk [vmem:[%s5730_s29 + $0x144] sm:$0xf] %vm4267_vm2, %v4092_v26  ;;  %5217 = vmatmul.msk.bf16.gmra.mxu1 %vm1689_vm0, %v5347_v47  ;;  %v6777_v35 = vpop.f32.mrf.mxu2  ;;  %v6779_v51 = vpop.f32.mrf.mxu3 }
 0x19a   : > { %4413 = vst.msk [vmem:[%s5730_s29 + $0x244] sm:$0xf] %vm4267_vm2, %v4156_v6  ;;  %5281 = vmatmul.msk.bf16.gmra.mxu3 %vm1689_vm0, %v5411_v31  ;;  %v5348_v31 = vld [vmem:[%s5540_s24 + $0x1a0] sm:$0xff] }
 0x19b   : > { %3189 = vst.msk [vmem:[#allocation2 + $0x688] sm:$0xff] %vm264_vm1, %v2932_v2  ;;  %v6787_v44 = vpop.f32.mrf.mxu0  ;;  %v6789_v54 = vpop.f32.mrf.mxu1 }
 0x19c   : > { %2998 = vst.msk [vmem:[#allocation2 + $0x90] sm:$0xff] %vm264_vm1, %v2741_v8 }
 0x19d   : > { %3062 = vst.msk [vmem:[#allocation2 + $0x290] sm:$0xff] %vm264_vm1, %v2805_v15 }
 0x19e   : > { %3126 = vst.msk [vmem:[#allocation2 + $0x490] sm:$0xff] %vm264_vm1, %v2869_v16 }
 0x19f   : > { %3190 = vst.msk [vmem:[#allocation2 + $0x690] sm:$0xff] %vm264_vm1, %v2933_v19 }
 0x1a0   : > { %2999 = vst.msk [vmem:[#allocation2 + $0x98] sm:$0xff] %vm264_vm1, %v2742_v46 }
 0x1a1   : > { %3063 = vst.msk [vmem:[#allocation2 + $0x298] sm:$0xff] %vm264_vm1, %v2806_v12  ;;  %v6810_v8 = vpop.f32.mrf.mxu2  ;;  %v6812_v13 = vpop.f32.mrf.mxu3 }
 0x1a2   : > { %v3448_v0 = vld [vmem:[#allocation2 + $0x688] sm:$0xff]  ;;  %3127 = vst.msk [vmem:[#allocation2 + $0x498] sm:$0xff] %vm264_vm1, %v2870_v37 }
 0x1a3   : > { %v3708_v9 = vadd.f32 %v6392_v55, %v3448_v0  ;;  %v3257_v38 = vld [vmem:[#allocation2 + $0x90] sm:$0xff]  ;;  %3191 = vst.msk [vmem:[#allocation2 + $0x698] sm:$0xff] %vm264_vm1, %v2934_v49  ;;  %v6820_v30 = vpop.f32.mrf.mxu0  ;;  %v6822_v12 = vpop.f32.mrf.mxu1 }
 0x1a4   : > { %v3517_v14 = vadd.f32 %v6392_v55, %v3257_v38  ;;  %v3321_v42 = vld [vmem:[#allocation2 + $0x290] sm:$0xff]  ;;  %3000 = vst.msk [vmem:[#allocation2 + $0xa0] sm:$0xff] %vm264_vm1, %v2743_v53 }
 0x1a5   : > { %v3964_v52 = vmax.f32 %v3708_v9, 0.0  ;;  %v3581_v4 = vadd.f32 %v6392_v55, %v3321_v42  ;;  %v3385_v39 = vld [vmem:[#allocation2 + $0x490] sm:$0xff]  ;;  %3064 = vst.msk [vmem:[#allocation2 + $0x2a0] sm:$0xff] %vm264_vm1, %v2807_v57  ;;  %v5380_v57 = vld [vmem:[%s5540_s24 + $0x2a0] sm:$0xff] }
 0x1a6   : > { %v3773_v27 = vmax.f32 %v3517_v14, 0.0  ;;  %v3645_v50 = vadd.f32 %v6392_v55, %v3385_v39  ;;  %v3449_v3 = vld [vmem:[#allocation2 + $0x690] sm:$0xff]  ;;  %3128 = vst.msk [vmem:[#allocation2 + $0x4a0] sm:$0xff] %vm264_vm1, %v2871_v48  ;;  %v670_v39 = vld [vmem:[#allocation2 + $0x4a8] sm:$0xff] }
 0x1a7   : > { %v4220_v58 = vpack.c.bf16 %v3964_v52, %v3964_v52  ;;  %v3837_v36 = vmax.f32 %v3581_v4, 0.0  ;;  %v3709_v34 = vadd.f32 %v6392_v55, %v3449_v3  ;;  %v3258_v59 = vld [vmem:[#allocation2 + $0x98] sm:$0xff]  ;;  %3192 = vst.msk [vmem:[#allocation2 + $0x6a0] sm:$0xff] %vm264_vm1, %v2935_v56  ;;  %5250 = vmatmul.msk.bf16.gmra.mxu2 %vm1689_vm0, %v5380_v57  ;;  %v734_v3 = vld [vmem:[#allocation2 + $0x6a8] sm:$0xff] }
 0x1a8   : > { %v4029_v1 = vpack.c.bf16 %v3773_v27, %v3773_v27  ;;  %v3901_v40 = vmax.f32 %v3645_v50, 0.0  ;;  %v3518_v60 = vadd.f32 %v6392_v55, %v3258_v59  ;;  %v3322_v11 = vld [vmem:[#allocation2 + $0x298] sm:$0xff]  ;;  %3001 = vst.msk [vmem:[#allocation2 + $0xa8] sm:$0xff] %vm264_vm1, %v2744_v5  ;;  %5186 = vmatmul.msk.bf16.gmra.mxu0 %vm1689_vm0, %v5316_v28  ;;  %v606_v5 = vld [vmem:[#allocation2 + $0x2a8] sm:$0xff] }
 0x1a9   : > { %4477 = vst.msk [vmem:[%s5730_s29 + $0x344] sm:$0xf] %vm4267_vm2, %v4220_v58  ;;  %v4093_v61 = vpack.c.bf16 %v3837_v36, %v3837_v36  ;;  %v3965_v21 = vmax.f32 %v3709_v34, 0.0  ;;  %v3582_v23 = vadd.f32 %v6804_v41, %v3322_v11  ;;  %v3386_v26 = vld [vmem:[#allocation2 + $0x498] sm:$0xff]  ;;  %5218 = vmatmul.msk.bf16.gmra.mxu1 %vm1689_vm0, %v5348_v31  ;;  %v2808_v36 = vadd.f32 %v6727_v7, %v606_v5  ;;  %v543_v34 = vld [vmem:[#allocation2 + $0xb0] sm:$0xff]  ;;  %v2463_v59 = vpop.f32.mrf.mxu2  ;;  %v5413_v28 = vld [vmem:[%s5540_s24 + $0x3a8] sm:$0xff] }
 0x1aa   : > { %4286 = vst.msk [vmem:[%s5730_s29 + $0x48] sm:$0xf] %vm4267_vm2, %v4029_v1  ;;  %v4157_v55 = vpack.c.bf16 %v3901_v40, %v3901_v40  ;;  %v3774_v2 = vmax.f32 %v3518_v60, 0.0  ;;  %v3646_v22 = vadd.f32 %v6804_v41, %v3386_v26  ;;  %v3450_v6 = vld [vmem:[#allocation2 + $0x698] sm:$0xff]  ;;  %5282 = vmatmul.msk.bf16.gmra.mxu3 %vm1689_vm0, %v5412_v33  ;;  %v6851_v1 = vpop.f32.mrf.mxu3  ;;  %v2872_v60 = vadd.f32 %v6745_v24, %v670_v39  ;;  %v607_v11 = vld [vmem:[#allocation2 + $0x2b0] sm:$0xff] }
 0x1ab   : > { %4350 = vst.msk [vmem:[%s5730_s29 + $0x148] sm:$0xf] %vm4267_vm2, %v4093_v61  ;;  %v4221_v15 = vpack.c.bf16 %v3965_v21, %v3965_v21  ;;  %v3838_v25 = vmax.f32 %v3582_v23, 0.0  ;;  %v3710_v16 = vadd.f32 %v6804_v41, %v3450_v6  ;;  %v3259_v62 = vld [vmem:[#allocation2 + $0xa0] sm:$0xff]  ;;  %v6856_v61 = vpop.f32.mrf.mxu0  ;;  %v6858_v21 = vpop.f32.mrf.mxu1  ;;  %v2936_v23 = vadd.f32 %v6747_v17, %v734_v3  ;;  %v671_v26 = vld [vmem:[#allocation2 + $0x4b0] sm:$0xff]  ;;  %v544_v24 = vld [vmem:[#allocation2 + $0xb8] sm:$0xff] }
 0x1ac   : > { %4414 = vst.msk [vmem:[%s5730_s29 + $0x248] sm:$0xf] %vm4267_vm2, %v4157_v55  ;;  %v4030_v19 = vpack.c.bf16 %v3774_v2, %v3774_v2  ;;  %v3902_v29 = vmax.f32 %v3646_v22, 0.0  ;;  %v3519_v46 = vadd.f32 %v6804_v41, %v3259_v62  ;;  %v3323_v18 = vld [vmem:[#allocation2 + $0x2a0] sm:$0xff]  ;;  %v2745_v7 = vadd.f32 %v6753_v43, %v543_v34  ;;  %v735_v55 = vld [vmem:[#allocation2 + $0x6b0] sm:$0xff]  ;;  %v608_v6 = vld [vmem:[#allocation2 + $0x2b8] sm:$0xff] }
 0x1ad   : > { %4478 = vst.msk [vmem:[%s5730_s29 + $0x348] sm:$0xf] %vm4267_vm2, %v4221_v15  ;;  %v4094_v20 = vpack.c.bf16 %v3838_v25, %v3838_v25  ;;  %v3966_v47 = vmax.f32 %v3710_v16, 0.0  ;;  %v3583_v63 = vadd.f32 %v6804_v41, %v3323_v18  ;;  %v3387_v37 = vld [vmem:[#allocation2 + $0x4a0] sm:$0xff]  ;;  %v2809_v2 = vadd.f32 %v6755_v10, %v607_v11  ;;  %v672_v15 = vld [vmem:[#allocation2 + $0x4b8] sm:$0xff]  ;;  %v5317_v18 = vld [vmem:[%s5540_s24 + $0xa8] sm:$0xff] }
 0x1ae   : > { %4287 = vst.msk [vmem:[%s5730_s29 + $0x4c] sm:$0xf] %vm4267_vm2, %v4030_v19  ;;  %v4158_v49 = vpack.c.bf16 %v3902_v29, %v3902_v29  ;;  %v3775_v32 = vmax.f32 %v3519_v46, 0.0  ;;  %v3647_v53 = vadd.f32 %v6804_v41, %v3387_v37  ;;  %v3451_v45 = vld [vmem:[#allocation2 + $0x6a0] sm:$0xff]  ;;  %v2873_v22 = vadd.f32 %v6777_v35, %v671_v26  ;;  %v736_v25 = vld [vmem:[#allocation2 + $0x6b8] sm:$0xff] }
 0x1af   : > { %4351 = vst.msk [vmem:[%s5730_s29 + $0x14c] sm:$0xf] %vm4267_vm2, %v4094_v20  ;;  %v4222_v0 = vpack.c.bf16 %v3966_v47, %v3966_v47  ;;  %v3839_v48 = vmax.f32 %v3583_v63, 0.0  ;;  %v3711_v9 = vadd.f32 %v6804_v41, %v3451_v45  ;;  %v3260_v38 = vld [vmem:[#allocation2 + $0xa8] sm:$0xff]  ;;  %v2937_v17 = vadd.f32 %v6779_v51, %v735_v55  ;;  %v545_v16 = vld [vmem:[#allocation2 + $0xc0] sm:$0xff] }
 0x1b0   : > { %4415 = vst.msk [vmem:[%s5730_s29 + $0x24c] sm:$0xf] %vm4267_vm2, %v4158_v49  ;;  %v4031_v56 = vpack.c.bf16 %v3775_v32, %v3775_v32  ;;  %v3903_v14 = vmax.f32 %v3647_v53, 0.0  ;;  %v3520_v42 = vadd.f32 %v6804_v41, %v3260_v38  ;;  %v2746_v43 = vadd.f32 %v6787_v44, %v544_v24  ;;  %v609_v19 = vld [vmem:[#allocation2 + $0x2c0] sm:$0xff]  ;;  %v5349_v20 = vld [vmem:[%s5540_s24 + $0x1a8] sm:$0xff] }
 0x1b1   : > { %4479 = vst.msk [vmem:[%s5730_s29 + $0x34c] sm:$0xf] %vm4267_vm2, %v4222_v0  ;;  %v4095_v52 = vpack.c.bf16 %v3839_v48, %v3839_v48  ;;  %v3967_v4 = vmax.f32 %v3711_v9, 0.0  ;;  %v2810_v10 = vadd.f32 %v6789_v54, %v608_v6  ;;  %v6876_v35 = vpop.f32.mrf.mxu2  ;;  %v2874_v51 = vadd.f32 %v6810_v8, %v672_v15  ;;  %v673_v29 = vld [vmem:[#allocation2 + $0x4c0] sm:$0xff]  ;;  %v5381_v47 = vld [vmem:[%s5540_s24 + $0x2a8] sm:$0xff] }
 0x1b2   : > { %4288 = vst.msk [vmem:[%s5730_s29 + $0x50] sm:$0xf] %vm4267_vm2, %v4031_v56  ;;  %v4159_v27 = vpack.c.bf16 %v3903_v14, %v3903_v14  ;;  %v3776_v50 = vmax.f32 %v3520_v42, 0.0  ;;  %v6878_v62 = vpop.f32.mrf.mxu3  ;;  %v2938_v54 = vadd.f32 %v6812_v13, %v736_v25  ;;  %v2747_v37 = vadd.f32 %v6820_v30, %v545_v16 }
 0x1b3   : > { %4352 = vst.msk [vmem:[%s5730_s29 + $0x150] sm:$0xf] %vm4267_vm2, %v4095_v52  ;;  %v4223_v58 = vpack.c.bf16 %v3967_v4, %v3967_v4  ;;  %v6882_v44 = vpop.f32.mrf.mxu0  ;;  %v6884_v46 = vpop.f32.mrf.mxu1  ;;  %v2811_v49 = vadd.f32 %v6822_v12, %v609_v19  ;;  %v2875_v53 = vadd.f32 %v2463_v59, %v673_v29 }
 0x1b4   : > { %4416 = vst.msk [vmem:[%s5730_s29 + $0x250] sm:$0xf] %vm4267_vm2, %v4159_v27  ;;  %v4032_v40 = vpack.c.bf16 %v3776_v50, %v3776_v50 }
 0x1b5   : > { %4480 = vst.msk [vmem:[%s5730_s29 + $0x350] sm:$0xf] %vm4267_vm2, %v4223_v58 }
 0x1b6   : > { %4289 = vst.msk [vmem:[%s5730_s29 + $0x54] sm:$0xf] %vm4267_vm2, %v4032_v40 }
 0x1b7   : > { %3065 = vst.msk [vmem:[#allocation2 + $0x2a8] sm:$0xff] %vm264_vm1, %v2808_v36  ;;  %5251 = vmatmul.msk.bf16.gmra.mxu2 %vm1689_vm0, %v5381_v47 }
 0x1b8   : > { %3129 = vst.msk [vmem:[#allocation2 + $0x4a8] sm:$0xff] %vm264_vm1, %v2872_v60  ;;  %5187 = vmatmul.msk.bf16.gmra.mxu0 %vm1689_vm0, %v5317_v18 }
 0x1b9   : > { %3193 = vst.msk [vmem:[#allocation2 + $0x6a8] sm:$0xff] %vm264_vm1, %v2936_v23  ;;  %5219 = vmatmul.msk.bf16.gmra.mxu1 %vm1689_vm0, %v5349_v20  ;;  %v6909_v14 = vpop.f32.mrf.mxu2 }
 0x1ba   : > { %3002 = vst.msk [vmem:[#allocation2 + $0xb0] sm:$0xff] %vm264_vm1, %v2745_v7  ;;  %5283 = vmatmul.msk.bf16.gmra.mxu3 %vm1689_vm0, %v5413_v28  ;;  %v6913_v39 = vpop.f32.mrf.mxu3 }
 0x1bb   : > { %3066 = vst.msk [vmem:[#allocation2 + $0x2b0] sm:$0xff] %vm264_vm1, %v2809_v2  ;;  %v6915_v27 = vpop.f32.mrf.mxu0  ;;  %v6920_v34 = vpop.f32.mrf.mxu1 }
 0x1bc   : > { %3130 = vst.msk [vmem:[#allocation2 + $0x4b0] sm:$0xff] %vm264_vm1, %v2873_v22 }
 0x1bd   : > { %3194 = vst.msk [vmem:[#allocation2 + $0x6b0] sm:$0xff] %vm264_vm1, %v2937_v17 }
 0x1be   : > { %v3324_v63 = vld [vmem:[#allocation2 + $0x2a8] sm:$0xff]  ;;  %3003 = vst.msk [vmem:[#allocation2 + $0xb8] sm:$0xff] %vm264_vm1, %v2746_v43 }
 0x1bf   : > { %v3584_v8 = vadd.f32 %v6804_v41, %v3324_v63  ;;  %v3388_v31 = vld [vmem:[#allocation2 + $0x4a8] sm:$0xff]  ;;  %3067 = vst.msk [vmem:[#allocation2 + $0x2b8] sm:$0xff] %vm264_vm1, %v2810_v10 }
 0x1c0   : > { %v3648_v13 = vadd.f32 %v6804_v41, %v3388_v31  ;;  %v3452_v32 = vld [vmem:[#allocation2 + $0x6a8] sm:$0xff]  ;;  %3131 = vst.msk [vmem:[#allocation2 + $0x4b8] sm:$0xff] %vm264_vm1, %v2874_v51 }
 0x1c1   : > { %v3840_v30 = vmax.f32 %v3584_v8, 0.0  ;;  %v3712_v45 = vadd.f32 %v6804_v41, %v3452_v32  ;;  %v3261_v57 = vld [vmem:[#allocation2 + $0xb0] sm:$0xff]  ;;  %3195 = vst.msk [vmem:[#allocation2 + $0x6b8] sm:$0xff] %vm264_vm1, %v2938_v54  ;;  %v6940_v47 = vpop.f32.mrf.mxu2  ;;  %v737_v8 = vld [vmem:[#allocation2 + $0x6c0] sm:$0xff] }
 0x1c2   : > { %v3904_v12 = vmax.f32 %v3648_v13, 0.0  ;;  %v3521_v33 = vadd.f32 %v6804_v41, %v3261_v57  ;;  %v3325_v0 = vld [vmem:[#allocation2 + $0x2b0] sm:$0xff]  ;;  %3004 = vst.msk [vmem:[#allocation2 + $0xc0] sm:$0xff] %vm264_vm1, %v2747_v37  ;;  %v6945_v31 = vpop.f32.mrf.mxu3 }
 0x1c3   : > { %v4096_v48 = vpack.c.bf16 %v3840_v30, %v3840_v30  ;;  %v3968_v9 = vmax.f32 %v3712_v45, 0.0  ;;  %v3585_v38 = vadd.f32 %v6804_v41, %v3325_v0  ;;  %v3389_v56 = vld [vmem:[#allocation2 + $0x4b0] sm:$0xff]  ;;  %3068 = vst.msk [vmem:[#allocation2 + $0x2c0] sm:$0xff] %vm264_vm1, %v2811_v49  ;;  %v6947_v49 = vpop.f32.mrf.mxu0  ;;  %v6951_v30 = vpop.f32.mrf.mxu1  ;;  %v610_v0 = vld [vmem:[#allocation2 + $0x2c8] sm:$0xff] }
 0x1c4   : > { %v4160_v42 = vpack.c.bf16 %v3904_v12, %v3904_v12  ;;  %v3777_v5 = vmax.f32 %v3521_v33, 0.0  ;;  %v3649_v52 = vadd.f32 %v6804_v41, %v3389_v56  ;;  %v3453_v4 = vld [vmem:[#allocation2 + $0x6b0] sm:$0xff]  ;;  %3132 = vst.msk [vmem:[#allocation2 + $0x4c0] sm:$0xff] %vm264_vm1, %v2875_v53  ;;  %v546_v53 = vld [vmem:[#allocation2 + $0xc8] sm:$0xff]  ;;  %v2939_v56 = vadd.f32 %v6851_v1, %v737_v8  ;;  %v5415_v8 = vld [vmem:[%s5540_s24 + $0x3b8] sm:$0xff] }
 0x1c5   : > { %4353 = vst.msk [vmem:[%s5730_s29 + $0x154] sm:$0xf] %vm4267_vm2, %v4096_v48  ;;  %v4224_v50 = vpack.c.bf16 %v3968_v9, %v3968_v9  ;;  %v3841_v3 = vmax.f32 %v3585_v38, 0.0  ;;  %v3713_v58 = vadd.f32 %v6804_v41, %v3453_v4  ;;  %v3262_v36 = vld [vmem:[#allocation2 + $0xb8] sm:$0xff]  ;;  %v5318_v45 = vld [vmem:[%s5540_s24 + $0xb0] sm:$0xff]  ;;  %v738_v4 = vld [vmem:[#allocation2 + $0x6c8] sm:$0xff] }
 0x1c6   : > { %4417 = vst.msk [vmem:[%s5730_s29 + $0x254] sm:$0xf] %vm4267_vm2, %v4160_v42  ;;  %v4033_v59 = vpack.c.bf16 %v3777_v5, %v3777_v5  ;;  %v3905_v40 = vmax.f32 %v3649_v52, 0.0  ;;  %v3522_v60 = vadd.f32 %v6804_v41, %v3262_v36  ;;  %v3326_v11 = vld [vmem:[#allocation2 + $0x2b8] sm:$0xff]  ;;  %v5350_v57 = vld [vmem:[%s5540_s24 + $0x1b0] sm:$0xff]  ;;  %v674_v42 = vld [vmem:[#allocation2 + $0x4c8] sm:$0xff]  ;;  %v2748_v52 = vadd.f32 %v6856_v61, %v546_v53 }
 0x1c7   : > { %4481 = vst.msk [vmem:[%s5730_s29 + $0x354] sm:$0xf] %vm4267_vm2, %v4224_v50  ;;  %v4097_v23 = vpack.c.bf16 %v3841_v3, %v3841_v3  ;;  %v3969_v26 = vmax.f32 %v3713_v58, 0.0  ;;  %v3586_v7 = vadd.f32 %v6804_v41, %v3326_v11  ;;  %v3390_v55 = vld [vmem:[#allocation2 + $0x4b8] sm:$0xff]  ;;  %v5382_v48 = vld [vmem:[%s5540_s24 + $0x2b0] sm:$0xff]  ;;  %v2812_v50 = vadd.f32 %v6858_v21, %v610_v0 }
 0x1c8   : > { %4290 = vst.msk [vmem:[%s5730_s29 + $0x58] sm:$0xf] %vm4267_vm2, %v4033_v59  ;;  %v4161_v2 = vpack.c.bf16 %v3905_v40, %v3905_v40  ;;  %v3778_v24 = vmax.f32 %v3522_v60, 0.0  ;;  %v3650_v22 = vadd.f32 %v6804_v41, %v3390_v55  ;;  %v3454_v6 = vld [vmem:[#allocation2 + $0x6b8] sm:$0xff]  ;;  %v5414_v9 = vld [vmem:[%s5540_s24 + $0x3b0] sm:$0xff]  ;;  %5188 = vmatmul.msk.bf16.gmra.mxu0 %vm1689_vm0, %v5318_v45  ;;  %5252 = vmatmul.msk.bf16.gmra.mxu2 %vm1689_vm0, %v5382_v48 }
 0x1c9   : > { %4354 = vst.msk [vmem:[%s5730_s29 + $0x158] sm:$0xf] %vm4267_vm2, %v4097_v23  ;;  %v4225_v17 = vpack.c.bf16 %v3969_v26, %v3969_v26  ;;  %v3842_v15 = vmax.f32 %v3586_v7, 0.0  ;;  %v3714_v43 = vadd.f32 %v6804_v41, %v3454_v6  ;;  %v3263_v25 = vld [vmem:[#allocation2 + $0xc0] sm:$0xff]  ;;  %5220 = vmatmul.msk.bf16.gmra.mxu1 %vm1689_vm0, %v5350_v57  ;;  %v547_v3 = vld [vmem:[#allocation2 + $0xd0] sm:$0xff]  ;;  %v2876_v1 = vadd.f32 %v6876_v35, %v674_v42  ;;  %v6977_v59 = vpop.f32.mrf.mxu2  ;;  %v548_v23 = vld [vmem:[#allocation2 + $0xd8] sm:$0xff] }
 0x1ca   : > { %4418 = vst.msk [vmem:[%s5730_s29 + $0x258] sm:$0xf] %vm4267_vm2, %v4161_v2  ;;  %v4034_v10 = vpack.c.bf16 %v3778_v24, %v3778_v24  ;;  %v3906_v16 = vmax.f32 %v3650_v22, 0.0  ;;  %v3523_v51 = vadd.f32 %v6804_v41, %v3263_v25  ;;  %v3327_v19 = vld [vmem:[#allocation2 + $0x2c0] sm:$0xff]  ;;  %5284 = vmatmul.msk.bf16.gmra.mxu3 %vm1689_vm0, %v5414_v9  ;;  %v611_v58 = vld [vmem:[#allocation2 + $0x2d0] sm:$0xff]  ;;  %v2940_v36 = vadd.f32 %v6878_v62, %v738_v4  ;;  %v6981_v60 = vpop.f32.mrf.mxu3  ;;  %v612_v7 = vld [vmem:[#allocation2 + $0x2d8] sm:$0xff] }
 0x1cb   : > { %4482 = vst.msk [vmem:[%s5730_s29 + $0x358] sm:$0xf] %vm4267_vm2, %v4225_v17  ;;  %v4098_v29 = vpack.c.bf16 %v3842_v15, %v3842_v15  ;;  %v3970_v54 = vmax.f32 %v3714_v43, 0.0  ;;  %v3587_v18 = vadd.f32 %v6804_v41, %v3327_v19  ;;  %v3391_v20 = vld [vmem:[#allocation2 + $0x4c0] sm:$0xff]  ;;  %v675_v61 = vld [vmem:[#allocation2 + $0x4d0] sm:$0xff]  ;;  %v2749_v40 = vadd.f32 %v6882_v44, %v547_v3  ;;  %v6983_v11 = vpop.f32.mrf.mxu0  ;;  %v6987_v26 = vpop.f32.mrf.mxu1  ;;  %v676_v55 = vld [vmem:[#allocation2 + $0x4d8] sm:$0xff] }
 0x1cc   : > { %4291 = vst.msk [vmem:[%s5730_s29 + $0x5c] sm:$0xf] %vm4267_vm2, %v4034_v10  ;;  %v4162_v63 = vpack.c.bf16 %v3906_v16, %v3906_v16  ;;  %v3779_v37 = vmax.f32 %v3523_v51, 0.0  ;;  %v3651_v28 = vadd.f32 %v6804_v41, %v3391_v20  ;;  %v739_v21 = vld [vmem:[#allocation2 + $0x6d0] sm:$0xff]  ;;  %v2813_v35 = vadd.f32 %v6884_v46, %v611_v58  ;;  %v740_v24 = vld [vmem:[#allocation2 + $0x6d8] sm:$0xff]  ;;  %v549_v22 = vld [vmem:[#allocation2 + $0xe0] sm:$0xff] }
 0x1cd   : > { %4355 = vst.msk [vmem:[%s5730_s29 + $0x15c] sm:$0xf] %vm4267_vm2, %v4098_v29  ;;  %v4226_v13 = vpack.c.bf16 %v3970_v54, %v3970_v54  ;;  %v3843_v32 = vmax.f32 %v3587_v18, 0.0  ;;  %v2877_v62 = vadd.f32 %v6909_v14, %v675_v61  ;;  %v2941_v44 = vadd.f32 %v6913_v39, %v739_v21  ;;  %v5319_v18 = vld [vmem:[%s5540_s24 + $0xb8] sm:$0xff] }
 0x1ce   : > { %4419 = vst.msk [vmem:[%s5730_s29 + $0x25c] sm:$0xf] %vm4267_vm2, %v4162_v63  ;;  %v4035_v12 = vpack.c.bf16 %v3779_v37, %v3779_v37  ;;  %v3907_v33 = vmax.f32 %v3651_v28, 0.0  ;;  %v2750_v2 = vadd.f32 %v6915_v27, %v548_v23  ;;  %v2814_v46 = vadd.f32 %v6920_v34, %v612_v7  ;;  %v5351_v20 = vld [vmem:[%s5540_s24 + $0x1b8] sm:$0xff] }
 0x1cf   : > { %4483 = vst.msk [vmem:[%s5730_s29 + $0x35c] sm:$0xf] %vm4267_vm2, %v4226_v13  ;;  %v4099_v38 = vpack.c.bf16 %v3843_v32, %v3843_v32  ;;  %v2878_v14 = vadd.f32 %v6940_v47, %v676_v55  ;;  %v2942_v27 = vadd.f32 %v6945_v31, %v740_v24  ;;  %v2751_v25 = vadd.f32 %v6947_v49, %v549_v22  ;;  %v5383_v28 = vld [vmem:[%s5540_s24 + $0x2b8] sm:$0xff] }
 0x1d0   : > { %4292 = vst.msk [vmem:[%s5730_s29 + $0x60] sm:$0xf] %vm4267_vm2, %v4035_v12  ;;  %v4163_v5 = vpack.c.bf16 %v3907_v33, %v3907_v33 }
 0x1d1   : > { %4356 = vst.msk [vmem:[%s5730_s29 + $0x160] sm:$0xf] %vm4267_vm2, %v4099_v38  ;;  %v7002_v15 = vpop.f32.mrf.mxu2 }
 0x1d2   : > { %4420 = vst.msk [vmem:[%s5730_s29 + $0x260] sm:$0xf] %vm4267_vm2, %v4163_v5  ;;  %v7007_v10 = vpop.f32.mrf.mxu3 }
 0x1d3   : > { %3196 = vst.msk [vmem:[#allocation2 + $0x6c0] sm:$0xff] %vm264_vm1, %v2939_v56  ;;  %v7009_v16 = vpop.f32.mrf.mxu0  ;;  %v7013_v54 = vpop.f32.mrf.mxu1 }
 0x1d4   : > { %3005 = vst.msk [vmem:[#allocation2 + $0xc8] sm:$0xff] %vm264_vm1, %v2748_v52 }
 0x1d5   : > { %3069 = vst.msk [vmem:[#allocation2 + $0x2c8] sm:$0xff] %vm264_vm1, %v2812_v50 }
 0x1d6   : > { %3133 = vst.msk [vmem:[#allocation2 + $0x4c8] sm:$0xff] %vm264_vm1, %v2876_v1 }
 0x1d7   : > { %3197 = vst.msk [vmem:[#allocation2 + $0x6c8] sm:$0xff] %vm264_vm1, %v2940_v36 }
 0x1d8   : > { %3006 = vst.msk [vmem:[#allocation2 + $0xd0] sm:$0xff] %vm264_vm1, %v2749_v40  ;;  %5189 = vmatmul.msk.bf16.gmra.mxu0 %vm1689_vm0, %v5319_v18  ;;  %5253 = vmatmul.msk.bf16.gmra.mxu2 %vm1689_vm0, %v5383_v28  ;;  %v550_v28 = vld [vmem:[#allocation2 + $0xe8] sm:$0xff] }
 0x1d9   : > { %3070 = vst.msk [vmem:[#allocation2 + $0x2d0] sm:$0xff] %vm264_vm1, %v2813_v35  ;;  %5221 = vmatmul.msk.bf16.gmra.mxu1 %vm1689_vm0, %v5351_v20 }
 0x1da   : > { %v3455_v6 = vld [vmem:[#allocation2 + $0x6c0] sm:$0xff]  ;;  %3134 = vst.msk [vmem:[#allocation2 + $0x4d0] sm:$0xff] %vm264_vm1, %v2877_v62  ;;  %5285 = vmatmul.msk.bf16.gmra.mxu3 %vm1689_vm0, %v5415_v8  ;;  %v7038_v1 = vpop.f32.mrf.mxu2 }
 0x1db   : > { %v3715_v17 = vadd.f32 %v6804_v41, %v3455_v6  ;;  %v3264_v39 = vld [vmem:[#allocation2 + $0xc8] sm:$0xff]  ;;  %3198 = vst.msk [vmem:[#allocation2 + $0x6d0] sm:$0xff] %vm264_vm1, %v2941_v44  ;;  %v7043_v21 = vpop.f32.mrf.mxu3  ;;  %v7045_v35 = vpop.f32.mrf.mxu0 }
 0x1dc   : > { %v3524_v43 = vadd.f32 %v6804_v41, %v3264_v39  ;;  %v3328_v34 = vld [vmem:[#allocation2 + $0x2c8] sm:$0xff]  ;;  %3007 = vst.msk [vmem:[#allocation2 + $0xd8] sm:$0xff] %vm264_vm1, %v2750_v2  ;;  %v7050_v55 = vpop.f32.mrf.mxu1 }
 0x1dd   : > { %v3971_v51 = vmax.f32 %v3715_v17, 0.0  ;;  %v3588_v19 = vadd.f32 %v6804_v41, %v3328_v34  ;;  %v3392_v29 = vld [vmem:[#allocation2 + $0x4c8] sm:$0xff]  ;;  %3071 = vst.msk [vmem:[#allocation2 + $0x2d8] sm:$0xff] %vm264_vm1, %v2814_v46 }
 0x1de   : > { %v3780_v47 = vmax.f32 %v3524_v43, 0.0  ;;  %v3652_v63 = vadd.f32 %v6804_v41, %v3392_v29  ;;  %v3456_v37 = vld [vmem:[#allocation2 + $0x6c8] sm:$0xff]  ;;  %3135 = vst.msk [vmem:[#allocation2 + $0x4d8] sm:$0xff] %vm264_vm1, %v2878_v14  ;;  %v677_v29 = vld [vmem:[#allocation2 + $0x4e0] sm:$0xff] }
 0x1df   : > { %v4227_v31 = vpack.c.bf16 %v3971_v51, %v3971_v51  ;;  %v3844_v49 = vmax.f32 %v3588_v19, 0.0  ;;  %v3716_v13 = vadd.f32 %v6804_v41, %v3456_v37  ;;  %v3265_v32 = vld [vmem:[#allocation2 + $0xd0] sm:$0xff]  ;;  %3199 = vst.msk [vmem:[#allocation2 + $0x6d8] sm:$0xff] %vm264_vm1, %v2942_v27 }
 0x1e0   : > { %v4036_v53 = vpack.c.bf16 %v3780_v47, %v3780_v47  ;;  %v3908_v45 = vmax.f32 %v3652_v63, 0.0  ;;  %v3525_v57 = vadd.f32 %v6804_v41, %v3265_v32  ;;  %v3329_v12 = vld [vmem:[#allocation2 + $0x2d0] sm:$0xff]  ;;  %3008 = vst.msk [vmem:[#allocation2 + $0xe0] sm:$0xff] %vm264_vm1, %v2751_v25  ;;  %v613_v25 = vld [vmem:[#allocation2 + $0x2e0] sm:$0xff]  ;;  %v678_v32 = vld [vmem:[#allocation2 + $0x4e8] sm:$0xff] }
 0x1e1   : > { %4484 = vst.msk [vmem:[%s5730_s29 + $0x360] sm:$0xf] %vm4267_vm2, %v4227_v31  ;;  %v4100_v33 = vpack.c.bf16 %v3844_v49, %v3844_v49  ;;  %v3972_v0 = vmax.f32 %v3716_v13, 0.0  ;;  %v3589_v48 = vadd.f32 %v6804_v41, %v3329_v12  ;;  %v3393_v9 = vld [vmem:[#allocation2 + $0x4d0] sm:$0xff]  ;;  %v741_v47 = vld [vmem:[#allocation2 + $0x6e0] sm:$0xff]  ;;  %v2815_v37 = vadd.f32 %v6951_v30, %v613_v25  ;;  %v614_v13 = vld [vmem:[#allocation2 + $0x2e8] sm:$0xff] }
 0x1e2   : > { %4293 = vst.msk [vmem:[%s5730_s29 + $0x64] sm:$0xf] %vm4267_vm2, %v4036_v53  ;;  %v4164_v38 = vpack.c.bf16 %v3908_v45, %v3908_v45  ;;  %v3781_v56 = vmax.f32 %v3525_v57, 0.0  ;;  %v3653_v42 = vadd.f32 %v6804_v41, %v3393_v9  ;;  %v3457_v5 = vld [vmem:[#allocation2 + $0x6d0] sm:$0xff]  ;;  %v2480_v8 = vpop.f32.mrf.mxu2  ;;  %v2879_v49 = vadd.f32 %v6977_v59, %v677_v29  ;;  %v5320_v12 = vld [vmem:[%s5540_s24 + $0xc0] sm:$0xff]  ;;  %v742_v59 = vld [vmem:[#allocation2 + $0x6e8] sm:$0xff] }
 0x1e3   : > { %4357 = vst.msk [vmem:[%s5730_s29 + $0x164] sm:$0xf] %vm4267_vm2, %v4100_v33  ;;  %v4228_v52 = vpack.c.bf16 %v3972_v0, %v3972_v0  ;;  %v3845_v4 = vmax.f32 %v3589_v48, 0.0  ;;  %v3717_v50 = vadd.f32 %v6804_v41, %v3457_v5  ;;  %v3266_v3 = vld [vmem:[#allocation2 + $0xd8] sm:$0xff]  ;;  %v7071_v53 = vpop.f32.mrf.mxu3  ;;  %v7073_v45 = vpop.f32.mrf.mxu0  ;;  %v2943_v57 = vadd.f32 %v6981_v60, %v741_v47  ;;  %v5352_v33 = vld [vmem:[%s5540_s24 + $0x1c0] sm:$0xff]  ;;  %v679_v5 = vld [vmem:[#allocation2 + $0x4f0] sm:$0xff] }
 0x1e4   : > { %4421 = vst.msk [vmem:[%s5730_s29 + $0x264] sm:$0xf] %vm4267_vm2, %v4164_v38  ;;  %v4037_v58 = vpack.c.bf16 %v3781_v56, %v3781_v56  ;;  %v3909_v36 = vmax.f32 %v3653_v42, 0.0  ;;  %v3526_v61 = vadd.f32 %v6804_v41, %v3266_v3  ;;  %v3330_v40 = vld [vmem:[#allocation2 + $0x2d8] sm:$0xff]  ;;  %v7078_v30 = vpop.f32.mrf.mxu1  ;;  %v5384_v0 = vld [vmem:[%s5540_s24 + $0x2c0] sm:$0xff]  ;;  %v2752_v48 = vadd.f32 %v6983_v11, %v550_v28  ;;  %v551_v56 = vld [vmem:[#allocation2 + $0xf0] sm:$0xff] }
 0x1e5   : > { %4485 = vst.msk [vmem:[%s5730_s29 + $0x364] sm:$0xf] %vm4267_vm2, %v4228_v52  ;;  %v4101_v23 = vpack.c.bf16 %v3845_v4, %v3845_v4  ;;  %v3973_v62 = vmax.f32 %v3717_v50, 0.0  ;;  %v3590_v7 = vadd.f32 %v6804_v41, %v3330_v40  ;;  %v3394_v44 = vld [vmem:[#allocation2 + $0x4d8] sm:$0xff]  ;;  %v5416_v9 = vld [vmem:[%s5540_s24 + $0x3c0] sm:$0xff]  ;;  %v2816_v38 = vadd.f32 %v6987_v26, %v614_v13  ;;  %v615_v42 = vld [vmem:[#allocation2 + $0x2f0] sm:$0xff] }
 0x1e6   : > { %4294 = vst.msk [vmem:[%s5730_s29 + $0x68] sm:$0xf] %vm4267_vm2, %v4037_v58  ;;  %v4165_v2 = vpack.c.bf16 %v3909_v36, %v3909_v36  ;;  %v3782_v24 = vmax.f32 %v3526_v61, 0.0  ;;  %v3654_v46 = vadd.f32 %v6804_v41, %v3394_v44  ;;  %v3458_v22 = vld [vmem:[#allocation2 + $0x6d8] sm:$0xff]  ;;  %v2880_v60 = vadd.f32 %v7002_v15, %v678_v32  ;;  %v743_v52 = vld [vmem:[#allocation2 + $0x6f0] sm:$0xff] }
 0x1e7   : > { %4358 = vst.msk [vmem:[%s5730_s29 + $0x168] sm:$0xf] %vm4267_vm2, %v4101_v23  ;;  %v4229_v6 = vpack.c.bf16 %v3973_v62, %v3973_v62  ;;  %v3846_v14 = vmax.f32 %v3590_v7, 0.0  ;;  %v3718_v17 = vadd.f32 %v6804_v41, %v3458_v22  ;;  %v3267_v39 = vld [vmem:[#allocation2 + $0xe0] sm:$0xff]  ;;  %v2944_v11 = vadd.f32 %v7007_v10, %v742_v59  ;;  %v552_v15 = vld [vmem:[#allocation2 + $0xf8] sm:$0xff] }
 0x1e8   : > { %4422 = vst.msk [vmem:[%s5730_s29 + $0x268] sm:$0xf] %vm4267_vm2, %v4165_v2  ;;  %v4038_v27 = vpack.c.bf16 %v3782_v24, %v3782_v24  ;;  %v3910_v43 = vmax.f32 %v3654_v46, 0.0  ;;  %v3527_v34 = vadd.f32 %v6804_v41, %v3267_v39  ;;  %5190 = vmatmul.msk.bf16.gmra.mxu0 %vm1689_vm0, %v5320_v12  ;;  %5254 = vmatmul.msk.bf16.gmra.mxu2 %vm1689_vm0, %v5384_v0  ;;  %v616_v10 = vld [vmem:[#allocation2 + $0x2f8] sm:$0xff]  ;;  %v5385_v12 = vld [vmem:[%s5540_s24 + $0x2c8] sm:$0xff] }
 0x1e9   : > { %4486 = vst.msk [vmem:[%s5730_s29 + $0x368] sm:$0xf] %vm4267_vm2, %v4229_v6  ;;  %v4102_v51 = vpack.c.bf16 %v3846_v14, %v3846_v14  ;;  %v3974_v19 = vmax.f32 %v3718_v17, 0.0  ;;  %5222 = vmatmul.msk.bf16.gmra.mxu1 %vm1689_vm0, %v5352_v33  ;;  %v2753_v26 = vadd.f32 %v7009_v16, %v551_v56  ;;  %v2817_v4 = vadd.f32 %v7013_v54, %v615_v42  ;;  %v680_v61 = vld [vmem:[#allocation2 + $0x4f8] sm:$0xff]  ;;  %v5417_v33 = vld [vmem:[%s5540_s24 + $0x3c8] sm:$0xff] }
 0x1ea   : > { %4295 = vst.msk [vmem:[%s5730_s29 + $0x6c] sm:$0xf] %vm4267_vm2, %v4038_v27  ;;  %v4166_v18 = vpack.c.bf16 %v3910_v43, %v3910_v43  ;;  %v3783_v20 = vmax.f32 %v3527_v34, 0.0  ;;  %5286 = vmatmul.msk.bf16.gmra.mxu3 %vm1689_vm0, %v5416_v9  ;;  %v7101_v50 = vpop.f32.mrf.mxu2  ;;  %v2881_v3 = vadd.f32 %v7038_v1, %v679_v5  ;;  %v2945_v16 = vadd.f32 %v7043_v21, %v743_v52 }
 0x1eb   : > { %4359 = vst.msk [vmem:[%s5730_s29 + $0x16c] sm:$0xf] %vm4267_vm2, %v4102_v51  ;;  %v4230_v63 = vpack.c.bf16 %v3974_v19, %v3974_v19  ;;  %v7105_v58 = vpop.f32.mrf.mxu3  ;;  %v7107_v36 = vpop.f32.mrf.mxu0  ;;  %v2754_v23 = vadd.f32 %v7045_v35, %v552_v15  ;;  %v2818_v7 = vadd.f32 %v7050_v55, %v616_v10  ;;  %v2882_v21 = vadd.f32 %v2480_v8, %v680_v61  ;;  %v5321_v8 = vld [vmem:[%s5540_s24 + $0xc8] sm:$0xff] }
 0x1ec   : > { %4423 = vst.msk [vmem:[%s5730_s29 + $0x26c] sm:$0xf] %vm4267_vm2, %v4166_v18  ;;  %v4039_v31 = vpack.c.bf16 %v3783_v20, %v3783_v20  ;;  %v7111_v40 = vpop.f32.mrf.mxu1 }
 0x1ed   : > { %4487 = vst.msk [vmem:[%s5730_s29 + $0x36c] sm:$0xf] %vm4267_vm2, %v4230_v63 }
 0x1ee   : > { %4296 = vst.msk [vmem:[%s5730_s29 + $0x70] sm:$0xf] %vm4267_vm2, %v4039_v31  ;;  %v5353_v31 = vld [vmem:[%s5540_s24 + $0x1c8] sm:$0xff] }
 0x1ef   : > { %3072 = vst.msk [vmem:[#allocation2 + $0x2e0] sm:$0xff] %vm264_vm1, %v2815_v37 }
 0x1f0   : > { %3136 = vst.msk [vmem:[#allocation2 + $0x4e0] sm:$0xff] %vm264_vm1, %v2879_v49 }
 0x1f1   : > { %3200 = vst.msk [vmem:[#allocation2 + $0x6e0] sm:$0xff] %vm264_vm1, %v2943_v57 }
 0x1f2   : > { %3009 = vst.msk [vmem:[#allocation2 + $0xe8] sm:$0xff] %vm264_vm1, %v2752_v48  ;;  %v7126_v43 = vpop.f32.mrf.mxu2 }
 0x1f3   : > { %3073 = vst.msk [vmem:[#allocation2 + $0x2e8] sm:$0xff] %vm264_vm1, %v2816_v38  ;;  %v7130_v29 = vpop.f32.mrf.mxu3 }
 0x1f4   : > { %3137 = vst.msk [vmem:[#allocation2 + $0x4e8] sm:$0xff] %vm264_vm1, %v2880_v60 }
 0x1f5   : > { %3201 = vst.msk [vmem:[#allocation2 + $0x6e8] sm:$0xff] %vm264_vm1, %v2944_v11  ;;  %v7132_v18 = vpop.f32.mrf.mxu0 }
 0x1f6   : > { %v3331_v54 = vld [vmem:[#allocation2 + $0x2e0] sm:$0xff]  ;;  %3010 = vst.msk [vmem:[#allocation2 + $0xf0] sm:$0xff] %vm264_vm1, %v2753_v26  ;;  %v7137_v28 = vpop.f32.mrf.mxu1 }
 0x1f7   : > { %v3591_v62 = vadd.f32 %v6804_v41, %v3331_v54  ;;  %v3395_v1 = vld [vmem:[#allocation2 + $0x4e0] sm:$0xff]  ;;  %3074 = vst.msk [vmem:[#allocation2 + $0x2f0] sm:$0xff] %vm264_vm1, %v2817_v4 }
 0x1f8   : > { %v3655_v44 = vadd.f32 %v6804_v41, %v3395_v1  ;;  %v3459_v2 = vld [vmem:[#allocation2 + $0x6e0] sm:$0xff]  ;;  %3138 = vst.msk [vmem:[#allocation2 + $0x4f0] sm:$0xff] %vm264_vm1, %v2881_v3  ;;  %5191 = vmatmul.msk.bf16.gmra.mxu0 %vm1689_vm0, %v5321_v8  ;;  %5255 = vmatmul.msk.bf16.gmra.mxu2 %vm1689_vm0, %v5385_v12  ;;  %v746_v8 = vld [vmem:[#allocation2 + $0x708] sm:$0xff]  ;;  %v5386_v12 = vld [vmem:[%s5540_s24 + $0x2d0] sm:$0xff] }
 0x1f9   : > { %v3847_v24 = vmax.f32 %v3591_v62, 0.0  ;;  %v3719_v46 = vadd.f32 %v6804_v41, %v3459_v2  ;;  %v3268_v22 = vld [vmem:[#allocation2 + $0xe8] sm:$0xff]  ;;  %3202 = vst.msk [vmem:[#allocation2 + $0x6f0] sm:$0xff] %vm264_vm1, %v2945_v16  ;;  %5223 = vmatmul.msk.bf16.gmra.mxu1 %vm1689_vm0, %v5353_v31  ;;  %v744_v2 = vld [vmem:[#allocation2 + $0x6f8] sm:$0xff]  ;;  %v555_v31 = vld [vmem:[#allocation2 + $0x110] sm:$0xff] }
 0x1fa   : > { %v3911_v35 = vmax.f32 %v3655_v44, 0.0  ;;  %v3528_v6 = vadd.f32 %v6804_v41, %v3268_v22  ;;  %v3332_v14 = vld [vmem:[#allocation2 + $0x2e8] sm:$0xff]  ;;  %3011 = vst.msk [vmem:[#allocation2 + $0xf8] sm:$0xff] %vm264_vm1, %v2754_v23  ;;  %5287 = vmatmul.msk.bf16.gmra.mxu3 %vm1689_vm0, %v5417_v33  ;;  %v7165_v62 = vpop.f32.mrf.mxu2 }
 0x1fb   : > { %v4103_v55 = vpack.c.bf16 %v3847_v24, %v3847_v24  ;;  %v3975_v17 = vmax.f32 %v3719_v46, 0.0  ;;  %v3592_v39 = vadd.f32 %v6804_v41, %v3332_v14  ;;  %v3396_v27 = vld [vmem:[#allocation2 + $0x4e8] sm:$0xff]  ;;  %3075 = vst.msk [vmem:[#allocation2 + $0x2f8] sm:$0xff] %vm264_vm1, %v2818_v7 }
 0x1fc   : > { %v4167_v34 = vpack.c.bf16 %v3911_v35, %v3911_v35  ;;  %v3784_v25 = vmax.f32 %v3528_v6, 0.0  ;;  %v3656_v51 = vadd.f32 %v6804_v41, %v3396_v27  ;;  %v3460_v19 = vld [vmem:[#allocation2 + $0x6e8] sm:$0xff]  ;;  %3139 = vst.msk [vmem:[#allocation2 + $0x4f8] sm:$0xff] %vm264_vm1, %v2882_v21  ;;  %v553_v35 = vld [vmem:[#allocation2 + $0x100] sm:$0xff] }
 0x1fd   : > { %4360 = vst.msk [vmem:[%s5730_s29 + $0x170] sm:$0xf] %vm4267_vm2, %v4103_v55  ;;  %v4231_v20 = vpack.c.bf16 %v3975_v17, %v3975_v17  ;;  %v3848_v47 = vmax.f32 %v3592_v39, 0.0  ;;  %v3720_v63 = vadd.f32 %v6804_v41, %v3460_v19  ;;  %v3269_v37 = vld [vmem:[#allocation2 + $0xf0] sm:$0xff]  ;;  %v7170_v21 = vpop.f32.mrf.mxu3  ;;  %v7172_v24 = vpop.f32.mrf.mxu0  ;;  %v2946_v39 = vadd.f32 %v7071_v53, %v744_v2  ;;  %v681_v27 = vld [vmem:[#allocation2 + $0x500] sm:$0xff] }
 0x1fe   : > { %4424 = vst.msk [vmem:[%s5730_s29 + $0x270] sm:$0xf] %vm4267_vm2, %v4167_v34  ;;  %v4040_v49 = vpack.c.bf16 %v3784_v25, %v3784_v25  ;;  %v3912_v13 = vmax.f32 %v3656_v51, 0.0  ;;  %v3529_v32 = vadd.f32 %v6804_v41, %v3269_v37  ;;  %v3333_v57 = vld [vmem:[#allocation2 + $0x2f0] sm:$0xff]  ;;  %v7176_v6 = vpop.f32.mrf.mxu1  ;;  %v2755_v25 = vadd.f32 %v7073_v45, %v553_v35  ;;  %v745_v51 = vld [vmem:[#allocation2 + $0x700] sm:$0xff]  ;;  %v682_v37 = vld [vmem:[#allocation2 + $0x508] sm:$0xff] }
 0x1ff   : > { %4488 = vst.msk [vmem:[%s5730_s29 + $0x370] sm:$0xf] %vm4267_vm2, %v4231_v20  ;;  %v4104_v0 = vpack.c.bf16 %v3848_v47, %v3848_v47  ;;  %v3976_v48 = vmax.f32 %v3720_v63, 0.0  ;;  %v3593_v59 = vadd.f32 %v6804_v41, %v3333_v57  ;;  %v3397_v9 = vld [vmem:[#allocation2 + $0x4f0] sm:$0xff]  ;;  %v554_v20 = vld [vmem:[#allocation2 + $0x108] sm:$0xff]  ;;  %v2883_v47 = vadd.f32 %v7101_v50, %v681_v27 }
 0x200   : > { %4297 = vst.msk [vmem:[%s5730_s29 + $0x74] sm:$0xf] %vm4267_vm2, %v4040_v49  ;;  %v4168_v38 = vpack.c.bf16 %v3912_v13, %v3912_v13  ;;  %v3785_v56 = vmax.f32 %v3529_v32, 0.0  ;;  %v3657_v60 = vadd.f32 %v6804_v41, %v3397_v9  ;;  %v3461_v42 = vld [vmem:[#allocation2 + $0x6f0] sm:$0xff]  ;;  %v618_v63 = vld [vmem:[#allocation2 + $0x308] sm:$0xff]  ;;  %v2947_v53 = vadd.f32 %v7105_v58, %v745_v51 }
 0x201   : > { %4361 = vst.msk [vmem:[%s5730_s29 + $0x174] sm:$0xf] %vm4267_vm2, %v4104_v0  ;;  %v4232_v11 = vpack.c.bf16 %v3976_v48, %v3976_v48  ;;  %v3849_v5 = vmax.f32 %v3593_v59, 0.0  ;;  %v3721_v26 = vadd.f32 %v6804_v41, %v3461_v42  ;;  %v3270_v52 = vld [vmem:[#allocation2 + $0xf8] sm:$0xff]  ;;  %v2820_v13 = vadd.f32 %v7111_v40, %v618_v63  ;;  %v5322_v58 = vld [vmem:[%s5540_s24 + $0xd0] sm:$0xff] }
 0x202   : > { %4425 = vst.msk [vmem:[%s5730_s29 + $0x274] sm:$0xf] %vm4267_vm2, %v4168_v38  ;;  %v4041_v4 = vpack.c.bf16 %v3785_v56, %v3785_v56  ;;  %v3913_v15 = vmax.f32 %v3657_v60, 0.0  ;;  %v3530_v3 = vadd.f32 %v6804_v41, %v3270_v52  ;;  %v3334_v10 = vld [vmem:[#allocation2 + $0x2f8] sm:$0xff]  ;;  %v7194_v45 = vpop.f32.mrf.mxu2  ;;  %v5354_v57 = vld [vmem:[%s5540_s24 + $0x1d0] sm:$0xff]  ;;  %v2884_v33 = vadd.f32 %v7126_v43, %v682_v37 }
 0x203   : > { %4489 = vst.msk [vmem:[%s5730_s29 + $0x374] sm:$0xf] %vm4267_vm2, %v4232_v11  ;;  %v4105_v16 = vpack.c.bf16 %v3849_v5, %v3849_v5  ;;  %v3977_v61 = vmax.f32 %v3721_v26, 0.0  ;;  %v3594_v54 = vadd.f32 %v6804_v41, %v3334_v10  ;;  %v3398_v23 = vld [vmem:[#allocation2 + $0x4f8] sm:$0xff]  ;;  %v5418_v0 = vld [vmem:[%s5540_s24 + $0x3d0] sm:$0xff]  ;;  %v2948_v48 = vadd.f32 %v7130_v29, %v746_v8 }
 0x204   : > { %4298 = vst.msk [vmem:[%s5730_s29 + $0x78] sm:$0xf] %vm4267_vm2, %v4041_v4  ;;  %v4169_v1 = vpack.c.bf16 %v3913_v15, %v3913_v15  ;;  %v3786_v7 = vmax.f32 %v3530_v3, 0.0  ;;  %v3658_v44 = vadd.f32 %v6804_v41, %v3398_v23  ;;  %v617_v41 = vld [vmem:[#allocation2 + $0x300] sm:$0xff]  ;;  %v683_v59 = vld [vmem:[#allocation2 + $0x510] sm:$0xff]  ;;  %v2757_v40 = vadd.f32 %v7132_v18, %v555_v31  ;;  %v556_v38 = vld [vmem:[#allocation2 + $0x118] sm:$0xff] }
 0x205   : > { %4362 = vst.msk [vmem:[%s5730_s29 + $0x178] sm:$0xf] %vm4267_vm2, %v4105_v16  ;;  %v4233_v46 = vpack.c.bf16 %v3977_v61, %v3977_v61  ;;  %v3850_v22 = vmax.f32 %v3594_v54, 0.0  ;;  %v2819_v19 = vadd.f32 %v7078_v30, %v617_v41  ;;  %v2756_v30 = vadd.f32 %v7107_v36, %v554_v20  ;;  %v7198_v49 = vpop.f32.mrf.mxu3  ;;  %v7200_v50 = vpop.f32.mrf.mxu0  ;;  %v619_v36 = vld [vmem:[#allocation2 + $0x310] sm:$0xff]  ;;  %v7227_v60 = vld [vmem:[%s8054_s2] ss:$0 sm:$0xff] }
 0x206   : > { %4426 = vst.msk [vmem:[%s5730_s29 + $0x278] sm:$0xf] %vm4267_vm2, %v4169_v1  ;;  %v4042_v14 = vpack.c.bf16 %v3786_v7, %v3786_v7  ;;  %v3914_v55 = vmax.f32 %v3658_v44, 0.0  ;;  %v7204_v32 = vpop.f32.mrf.mxu1  ;;  %v747_v9 = vld [vmem:[#allocation2 + $0x710] sm:$0xff]  ;;  %v2821_v43 = vadd.f32 %v7137_v28, %v619_v36  ;;  %v2885_v56 = vadd.f32 %v7165_v62, %v683_v59  ;;  %v5323_v36 = vld [vmem:[%s5540_s24 + $0xd8] sm:$0xff] }
 0x207   : > { %4490 = vst.msk [vmem:[%s5730_s29 + $0x378] sm:$0xf] %vm4267_vm2, %v4233_v46  ;;  %v4106_v17 = vpack.c.bf16 %v3850_v22, %v3850_v22  ;;  %v2949_v28 = vadd.f32 %v7170_v21, %v747_v9  ;;  %v2758_v52 = vadd.f32 %v7172_v24, %v556_v38  ;;  %v5419_v38 = vld [vmem:[%s5540_s24 + $0x3d8] sm:$0xff] }
 0x208   : > { %4299 = vst.msk [vmem:[%s5730_s29 + $0x7c] sm:$0xf] %vm4267_vm2, %v4042_v14  ;;  %v4170_v34 = vpack.c.bf16 %v3914_v55, %v3914_v55  ;;  %5192 = vmatmul.msk.bf16.gmra.mxu0 %vm1689_vm0, %v5322_v58  ;;  %5256 = vmatmul.msk.bf16.gmra.mxu2 %vm1689_vm0, %v5386_v12 }
 0x209   : > { %4363 = vst.msk [vmem:[%s5730_s29 + $0x17c] sm:$0xf] %vm4267_vm2, %v4106_v17  ;;  %5224 = vmatmul.msk.bf16.gmra.mxu1 %vm1689_vm0, %v5354_v57 }
 0x20a   : > { %4427 = vst.msk [vmem:[%s5730_s29 + $0x27c] sm:$0xf] %vm4267_vm2, %v4170_v34  ;;  %5288 = vmatmul.msk.bf16.gmra.mxu3 %vm1689_vm0, %v5418_v0  ;;  %v7232_v11 = vpop.f32.mrf.mxu2  ;;  %v5355_v0 = vld [vmem:[%s5540_s24 + $0x1d8] sm:$0xff] }
 0x20b   : > { %3203 = vst.msk [vmem:[#allocation2 + $0x6f8] sm:$0xff] %vm264_vm1, %v2946_v39 }
 0x20c   : > { %3012 = vst.msk [vmem:[#allocation2 + $0x100] sm:$0xff] %vm264_vm1, %v2755_v25 }
 0x20d   : > { %3076 = vst.msk [vmem:[#allocation2 + $0x300] sm:$0xff] %vm264_vm1, %v2819_v19  ;;  %v7237_v4 = vpop.f32.mrf.mxu3  ;;  %v7239_v15 = vpop.f32.mrf.mxu0 }
 0x20e   : > { %3140 = vst.msk [vmem:[#allocation2 + $0x500] sm:$0xff] %vm264_vm1, %v2883_v47  ;;  %v7243_v61 = vpop.f32.mrf.mxu1 }
 0x20f   : > { %3204 = vst.msk [vmem:[#allocation2 + $0x700] sm:$0xff] %vm264_vm1, %v2947_v53 }
 0x210   : > { %3013 = vst.msk [vmem:[#allocation2 + $0x108] sm:$0xff] %vm264_vm1, %v2756_v30 }
 0x211   : > { %3077 = vst.msk [vmem:[#allocation2 + $0x308] sm:$0xff] %vm264_vm1, %v2820_v13 }
 0x212   : > { %v3462_v29 = vld [vmem:[#allocation2 + $0x6f8] sm:$0xff]  ;;  %3141 = vst.msk [vmem:[#allocation2 + $0x508] sm:$0xff] %vm264_vm1, %v2884_v33  ;;  %v7260_v47 = vpop.f32.mrf.mxu2 }
 0x213   : > { %v3722_v18 = vadd.f32 %v7227_v60, %v3462_v29  ;;  %v3271_v42 = vld [vmem:[#allocation2 + $0x100] sm:$0xff]  ;;  %3205 = vst.msk [vmem:[#allocation2 + $0x708] sm:$0xff] %vm264_vm1, %v2948_v48 }
 0x214   : > { %v3531_v5 = vadd.f32 %v7227_v60, %v3271_v42  ;;  %v3335_v26 = vld [vmem:[#allocation2 + $0x300] sm:$0xff]  ;;  %3014 = vst.msk [vmem:[#allocation2 + $0x110] sm:$0xff] %vm264_vm1, %v2757_v40 }
 0x215   : > { %v3978_v3 = vmax.f32 %v3722_v18, 0.0  ;;  %v3595_v10 = vadd.f32 %v7227_v60, %v3335_v26  ;;  %v3399_v16 = vld [vmem:[#allocation2 + $0x500] sm:$0xff]  ;;  %3078 = vst.msk [vmem:[#allocation2 + $0x310] sm:$0xff] %vm264_vm1, %v2821_v43  ;;  %v7265_v8 = vpop.f32.mrf.mxu3  ;;  %v7267_v31 = vpop.f32.mrf.mxu0  ;;  %v5387_v43 = vld [vmem:[%s5540_s24 + $0x2d8] sm:$0xff] }
 0x216   : > { %v3787_v54 = vmax.f32 %v3531_v5, 0.0  ;;  %v3659_v23 = vadd.f32 %v7227_v60, %v3399_v16  ;;  %v3463_v62 = vld [vmem:[#allocation2 + $0x700] sm:$0xff]  ;;  %3142 = vst.msk [vmem:[#allocation2 + $0x510] sm:$0xff] %vm264_vm1, %v2885_v56  ;;  %v7272_v33 = vpop.f32.mrf.mxu1  ;;  %v684_v16 = vld [vmem:[#allocation2 + $0x518] sm:$0xff] }
 0x217   : > { %v4234_v1 = vpack.c.bf16 %v3978_v3, %v3978_v3  ;;  %v3851_v7 = vmax.f32 %v3595_v10, 0.0  ;;  %v3723_v44 = vadd.f32 %v7227_v60, %v3463_v62  ;;  %v3272_v2 = vld [vmem:[#allocation2 + $0x108] sm:$0xff]  ;;  %3206 = vst.msk [vmem:[#allocation2 + $0x710] sm:$0xff] %vm264_vm1, %v2949_v28  ;;  %v748_v62 = vld [vmem:[#allocation2 + $0x718] sm:$0xff] }
 0x218   : > { %v4043_v21 = vpack.c.bf16 %v3787_v54, %v3787_v54  ;;  %v3915_v24 = vmax.f32 %v3659_v23, 0.0  ;;  %v3532_v46 = vadd.f32 %v7227_v60, %v3272_v2  ;;  %v3336_v22 = vld [vmem:[#allocation2 + $0x308] sm:$0xff]  ;;  %3015 = vst.msk [vmem:[#allocation2 + $0x118] sm:$0xff] %vm264_vm1, %v2758_v52  ;;  %5193 = vmatmul.msk.bf16.gmra.mxu0 %vm1689_vm0, %v5323_v36  ;;  %v620_v52 = vld [vmem:[#allocation2 + $0x318] sm:$0xff]  ;;  %5257 = vmatmul.msk.bf16.gmra.mxu2 %vm1689_vm0, %v5387_v43 }
 0x219   : > { %4491 = vst.msk [vmem:[%s5730_s29 + $0x37c] sm:$0xf] %vm4267_vm2, %v4234_v1  ;;  %v4107_v35 = vpack.c.bf16 %v3851_v7, %v3851_v7  ;;  %v3979_v14 = vmax.f32 %v3723_v44, 0.0  ;;  %v3596_v55 = vadd.f32 %v7227_v60, %v3336_v22  ;;  %v3400_v41 = vld [vmem:[#allocation2 + $0x508] sm:$0xff]  ;;  %5225 = vmatmul.msk.bf16.gmra.mxu1 %vm1689_vm0, %v5355_v0  ;;  %v2822_v7 = vadd.f32 %v7176_v6, %v620_v52  ;;  %v557_v44 = vld [vmem:[#allocation2 + $0x120] sm:$0xff] }
 0x21a   : > { %4300 = vst.msk [vmem:[%s5730_s29 + $0x80] sm:$0xf] %vm4267_vm2, %v4043_v21  ;;  %v4171_v17 = vpack.c.bf16 %v3915_v24, %v3915_v24  ;;  %v3788_v39 = vmax.f32 %v3532_v46, 0.0  ;;  %v3660_v27 = vadd.f32 %v7227_v60, %v3400_v41  ;;  %v3464_v34 = vld [vmem:[#allocation2 + $0x708] sm:$0xff]  ;;  %5289 = vmatmul.msk.bf16.gmra.mxu3 %vm1689_vm0, %v5419_v38  ;;  %v2498_v2 = vpop.f32.mrf.mxu2  ;;  %v2886_v24 = vadd.f32 %v7194_v45, %v684_v16  ;;  %v621_v46 = vld [vmem:[#allocation2 + $0x320] sm:$0xff] }
 0x21b   : > { %4364 = vst.msk [vmem:[%s5730_s29 + $0x180] sm:$0xf] %vm4267_vm2, %v4107_v35  ;;  %v4235_v25 = vpack.c.bf16 %v3979_v14, %v3979_v14  ;;  %v3852_v51 = vmax.f32 %v3596_v55, 0.0  ;;  %v3724_v19 = vadd.f32 %v7227_v60, %v3464_v34  ;;  %v3273_v20 = vld [vmem:[#allocation2 + $0x110] sm:$0xff]  ;;  %v2950_v14 = vadd.f32 %v7198_v49, %v748_v62  ;;  %v685_v55 = vld [vmem:[#allocation2 + $0x520] sm:$0xff]  ;;  %v622_v34 = vld [vmem:[#allocation2 + $0x328] sm:$0xff] }
 0x21c   : > { %4428 = vst.msk [vmem:[%s5730_s29 + $0x280] sm:$0xf] %vm4267_vm2, %v4171_v17  ;;  %v4044_v63 = vpack.c.bf16 %v3788_v39, %v3788_v39  ;;  %v3916_v53 = vmax.f32 %v3660_v27, 0.0  ;;  %v3533_v37 = vadd.f32 %v7227_v60, %v3273_v20  ;;  %v3337_v30 = vld [vmem:[#allocation2 + $0x310] sm:$0xff]  ;;  %v2759_v6 = vadd.f32 %v7200_v50, %v557_v44  ;;  %v749_v17 = vld [vmem:[#allocation2 + $0x720] sm:$0xff]  ;;  %v558_v39 = vld [vmem:[#allocation2 + $0x128] sm:$0xff] }
 0x21d   : > { %4492 = vst.msk [vmem:[%s5730_s29 + $0x380] sm:$0xf] %vm4267_vm2, %v4235_v25  ;;  %v4108_v13 = vpack.c.bf16 %v3852_v51, %v3852_v51  ;;  %v3980_v58 = vmax.f32 %v3724_v19, 0.0  ;;  %v3597_v57 = vadd.f32 %v7227_v60, %v3337_v30  ;;  %v3401_v12 = vld [vmem:[#allocation2 + $0x510] sm:$0xff]  ;;  %v7301_v22 = vpop.f32.mrf.mxu3  ;;  %v7303_v35 = vpop.f32.mrf.mxu0  ;;  %v2823_v45 = vadd.f32 %v7204_v32, %v621_v46  ;;  %v686_v25 = vld [vmem:[#allocation2 + $0x528] sm:$0xff] }
 0x21e   : > { %4301 = vst.msk [vmem:[%s5730_s29 + $0x84] sm:$0xf] %vm4267_vm2, %v4044_v63  ;;  %v4172_v48 = vpack.c.bf16 %v3916_v53, %v3916_v53  ;;  %v3789_v59 = vmax.f32 %v3533_v37, 0.0  ;;  %v3661_v40 = vadd.f32 %v7227_v60, %v3401_v12  ;;  %v3465_v9 = vld [vmem:[#allocation2 + $0x710] sm:$0xff]  ;;  %v7308_v41 = vpop.f32.mrf.mxu1  ;;  %v2887_v27 = vadd.f32 %v7232_v11, %v685_v55  ;;  %v750_v51 = vld [vmem:[#allocation2 + $0x728] sm:$0xff]  ;;  %v5420_v12 = vld [vmem:[%s5540_s24 + $0x3e0] sm:$0xff] }
 0x21f   : > { %4365 = vst.msk [vmem:[%s5730_s29 + $0x184] sm:$0xf] %vm4267_vm2, %v4108_v13  ;;  %v4236_v29 = vpack.c.bf16 %v3980_v58, %v3980_v58  ;;  %v3853_v56 = vmax.f32 %v3597_v57, 0.0  ;;  %v3725_v18 = vadd.f32 %v7227_v60, %v3465_v9  ;;  %v3274_v42 = vld [vmem:[#allocation2 + $0x118] sm:$0xff]  ;;  %v2951_v49 = vadd.f32 %v7237_v4, %v749_v17  ;;  %v559_v19 = vld [vmem:[#allocation2 + $0x130] sm:$0xff]  ;;  %v5356_v13 = vld [vmem:[%s5540_s24 + $0x1e0] sm:$0xff] }
 0x220   : > { %4429 = vst.msk [vmem:[%s5730_s29 + $0x284] sm:$0xf] %vm4267_vm2, %v4172_v48  ;;  %v4045_v28 = vpack.c.bf16 %v3789_v59, %v3789_v59  ;;  %v3917_v5 = vmax.f32 %v3661_v40, 0.0  ;;  %v3534_v26 = vadd.f32 %v7227_v60, %v3274_v42  ;;  %v2760_v50 = vadd.f32 %v7239_v15, %v558_v39  ;;  %v623_v20 = vld [vmem:[#allocation2 + $0x330] sm:$0xff]  ;;  %v5388_v58 = vld [vmem:[%s5540_s24 + $0x2e0] sm:$0xff] }
 0x221   : > { %4493 = vst.msk [vmem:[%s5730_s29 + $0x384] sm:$0xf] %vm4267_vm2, %v4236_v29  ;;  %v4109_v3 = vpack.c.bf16 %v3853_v56, %v3853_v56  ;;  %v3981_v10 = vmax.f32 %v3725_v18, 0.0  ;;  %v2824_v32 = vadd.f32 %v7243_v61, %v622_v34  ;;  %v2888_v4 = vadd.f32 %v7260_v47, %v686_v25  ;;  %v687_v63 = vld [vmem:[#allocation2 + $0x530] sm:$0xff]  ;;  %v5324_v61 = vld [vmem:[%s5540_s24 + $0xe0] sm:$0xff] }
 0x222   : > { %4302 = vst.msk [vmem:[%s5730_s29 + $0x88] sm:$0xf] %vm4267_vm2, %v4045_v28  ;;  %v4173_v54 = vpack.c.bf16 %v3917_v5, %v3917_v5  ;;  %v3790_v23 = vmax.f32 %v3534_v26, 0.0  ;;  %v7323_v11 = vpop.f32.mrf.mxu2  ;;  %v2952_v37 = vadd.f32 %v7265_v8, %v750_v51  ;;  %v2761_v47 = vadd.f32 %v7267_v31, %v559_v19 }
 0x223   : > { %4366 = vst.msk [vmem:[%s5730_s29 + $0x188] sm:$0xf] %vm4267_vm2, %v4109_v3  ;;  %v4237_v1 = vpack.c.bf16 %v3981_v10, %v3981_v10  ;;  %v2825_v48 = vadd.f32 %v7272_v33, %v623_v20  ;;  %v2889_v40 = vadd.f32 %v2498_v2, %v687_v63 }
 0x224   : > { %4430 = vst.msk [vmem:[%s5730_s29 + $0x288] sm:$0xf] %vm4267_vm2, %v4173_v54  ;;  %v4046_v21 = vpack.c.bf16 %v3790_v23, %v3790_v23 }
 0x225   : > { %4494 = vst.msk [vmem:[%s5730_s29 + $0x388] sm:$0xf] %vm4267_vm2, %v4237_v1  ;;  %v7327_v53 = vpop.f32.mrf.mxu3  ;;  %v7329_v15 = vpop.f32.mrf.mxu0 }
 0x226   : > { %4303 = vst.msk [vmem:[%s5730_s29 + $0x8c] sm:$0xf] %vm4267_vm2, %v4046_v21  ;;  %v7333_v30 = vpop.f32.mrf.mxu1 }
 0x227   : > { %3079 = vst.msk [vmem:[#allocation2 + $0x318] sm:$0xff] %vm264_vm1, %v2822_v7 }
 0x228   : > { %3143 = vst.msk [vmem:[#allocation2 + $0x518] sm:$0xff] %vm264_vm1, %v2886_v24  ;;  %5194 = vmatmul.msk.bf16.gmra.mxu0 %vm1689_vm0, %v5324_v61  ;;  %5258 = vmatmul.msk.bf16.gmra.mxu2 %vm1689_vm0, %v5388_v58 }
 0x229   : > { %3207 = vst.msk [vmem:[#allocation2 + $0x718] sm:$0xff] %vm264_vm1, %v2950_v14  ;;  %5226 = vmatmul.msk.bf16.gmra.mxu1 %vm1689_vm0, %v5356_v13 }
 0x22a   : > { %3016 = vst.msk [vmem:[#allocation2 + $0x120] sm:$0xff] %vm264_vm1, %v2759_v6  ;;  %5290 = vmatmul.msk.bf16.gmra.mxu3 %vm1689_vm0, %v5420_v12  ;;  %v7356_v5 = vpop.f32.mrf.mxu2 }
 0x22b   : > { %3080 = vst.msk [vmem:[#allocation2 + $0x320] sm:$0xff] %vm264_vm1, %v2823_v45 }
 0x22c   : > { %3144 = vst.msk [vmem:[#allocation2 + $0x520] sm:$0xff] %vm264_vm1, %v2887_v27 }
 0x22d   : > { %3208 = vst.msk [vmem:[#allocation2 + $0x720] sm:$0xff] %vm264_vm1, %v2951_v49  ;;  %v7360_v16 = vpop.f32.mrf.mxu3  ;;  %v7362_v54 = vpop.f32.mrf.mxu0 }
 0x22e   : > { %v3338_v57 = vld [vmem:[#allocation2 + $0x318] sm:$0xff]  ;;  %3017 = vst.msk [vmem:[#allocation2 + $0x128] sm:$0xff] %vm264_vm1, %v2760_v50  ;;  %v7367_v44 = vpop.f32.mrf.mxu1 }
 0x22f   : > { %v3598_v36 = vadd.f32 %v7227_v60, %v3338_v57  ;;  %v3402_v0 = vld [vmem:[#allocation2 + $0x518] sm:$0xff]  ;;  %3081 = vst.msk [vmem:[#allocation2 + $0x328] sm:$0xff] %vm264_vm1, %v2824_v32 }
 0x230   : > { %v3662_v8 = vadd.f32 %v7227_v60, %v3402_v0  ;;  %v3466_v59 = vld [vmem:[#allocation2 + $0x718] sm:$0xff]  ;;  %3145 = vst.msk [vmem:[#allocation2 + $0x528] sm:$0xff] %vm264_vm1, %v2888_v4 }
 0x231   : > { %v3854_v31 = vmax.f32 %v3598_v36, 0.0  ;;  %v3726_v9 = vadd.f32 %v7227_v60, %v3466_v59  ;;  %v3275_v43 = vld [vmem:[#allocation2 + $0x120] sm:$0xff]  ;;  %3209 = vst.msk [vmem:[#allocation2 + $0x728] sm:$0xff] %vm264_vm1, %v2952_v37  ;;  %v751_v36 = vld [vmem:[#allocation2 + $0x730] sm:$0xff] }
 0x232   : > { %v3918_v33 = vmax.f32 %v3662_v8, 0.0  ;;  %v3535_v38 = vadd.f32 %v7227_v60, %v3275_v43  ;;  %v3339_v29 = vld [vmem:[#allocation2 + $0x320] sm:$0xff]  ;;  %3018 = vst.msk [vmem:[#allocation2 + $0x130] sm:$0xff] %vm264_vm1, %v2761_v47  ;;  %v7387_v58 = vpop.f32.mrf.mxu2  ;;  %v5357_v43 = vld [vmem:[%s5540_s24 + $0x1e8] sm:$0xff] }
 0x233   : > { %v4110_v56 = vpack.c.bf16 %v3854_v31, %v3854_v31  ;;  %v3982_v18 = vmax.f32 %v3726_v9, 0.0  ;;  %v3599_v42 = vadd.f32 %v7227_v60, %v3339_v29  ;;  %v3403_v28 = vld [vmem:[#allocation2 + $0x520] sm:$0xff]  ;;  %3082 = vst.msk [vmem:[#allocation2 + $0x330] sm:$0xff] %vm264_vm1, %v2825_v48  ;;  %v5325_v9 = vld [vmem:[%s5540_s24 + $0xe8] sm:$0xff]  ;;  %v624_v29 = vld [vmem:[#allocation2 + $0x338] sm:$0xff] }
 0x234   : > { %v4174_v26 = vpack.c.bf16 %v3918_v33, %v3918_v33  ;;  %v3791_v52 = vmax.f32 %v3535_v38, 0.0  ;;  %v3663_v3 = vadd.f32 %v7227_v60, %v3403_v28  ;;  %v3467_v10 = vld [vmem:[#allocation2 + $0x720] sm:$0xff]  ;;  %3146 = vst.msk [vmem:[#allocation2 + $0x530] sm:$0xff] %vm264_vm1, %v2889_v40  ;;  %v560_v40 = vld [vmem:[#allocation2 + $0x138] sm:$0xff]  ;;  %v2953_v28 = vadd.f32 %v7301_v22, %v751_v36  ;;  %v5422_v36 = vld [vmem:[%s5540_s24 + $0x3f0] sm:$0xff] }
 0x235   : > { %4367 = vst.msk [vmem:[%s5730_s29 + $0x18c] sm:$0xf] %vm4267_vm2, %v4110_v56  ;;  %v4238_v23 = vpack.c.bf16 %v3982_v18, %v3982_v18  ;;  %v3855_v62 = vmax.f32 %v3599_v42, 0.0  ;;  %v3727_v1 = vadd.f32 %v7227_v60, %v3467_v10  ;;  %v3276_v7 = vld [vmem:[#allocation2 + $0x128] sm:$0xff]  ;;  %v7392_v0 = vpop.f32.mrf.mxu3  ;;  %v7394_v48 = vpop.f32.mrf.mxu0  ;;  %v752_v10 = vld [vmem:[#allocation2 + $0x738] sm:$0xff] }
 0x236   : > { %4431 = vst.msk [vmem:[%s5730_s29 + $0x28c] sm:$0xf] %vm4267_vm2, %v4174_v26  ;;  %v4047_v2 = vpack.c.bf16 %v3791_v52, %v3791_v52  ;;  %v3919_v21 = vmax.f32 %v3663_v3, 0.0  ;;  %v3536_v24 = vadd.f32 %v7227_v60, %v3276_v7  ;;  %v3340_v46 = vld [vmem:[#allocation2 + $0x328] sm:$0xff]  ;;  %v7398_v31 = vpop.f32.mrf.mxu1  ;;  %v688_v26 = vld [vmem:[#allocation2 + $0x538] sm:$0xff]  ;;  %v2762_v3 = vadd.f32 %v7303_v35, %v560_v40  ;;  %v689_v35 = vld [vmem:[#allocation2 + $0x540] sm:$0xff] }
 0x237   : > { %4495 = vst.msk [vmem:[%s5730_s29 + $0x38c] sm:$0xf] %vm4267_vm2, %v4238_v23  ;;  %v4111_v14 = vpack.c.bf16 %v3855_v62, %v3855_v62  ;;  %v3983_v55 = vmax.f32 %v3727_v1, 0.0  ;;  %v3600_v6 = vadd.f32 %v7227_v60, %v3340_v46  ;;  %v3404_v17 = vld [vmem:[#allocation2 + $0x528] sm:$0xff]  ;;  %v2826_v23 = vadd.f32 %v7308_v41, %v624_v29  ;;  %v561_v62 = vld [vmem:[#allocation2 + $0x140] sm:$0xff] }
 0x238   : > { %4304 = vst.msk [vmem:[%s5730_s29 + $0x90] sm:$0xf] %vm4267_vm2, %v4047_v2  ;;  %v4175_v45 = vpack.c.bf16 %v3919_v21, %v3919_v21  ;;  %v3792_v39 = vmax.f32 %v3536_v24, 0.0  ;;  %v3664_v27 = vadd.f32 %v7227_v60, %v3404_v17  ;;  %v3468_v34 = vld [vmem:[#allocation2 + $0x728] sm:$0xff]  ;;  %5195 = vmatmul.msk.bf16.gmra.mxu0 %vm1689_vm0, %v5325_v9  ;;  %v2890_v22 = vadd.f32 %v7323_v11, %v688_v26  ;;  %v625_v1 = vld [vmem:[#allocation2 + $0x340] sm:$0xff] }
 0x239   : > { %4368 = vst.msk [vmem:[%s5730_s29 + $0x190] sm:$0xf] %vm4267_vm2, %v4111_v14  ;;  %v4239_v49 = vpack.c.bf16 %v3983_v55, %v3983_v55  ;;  %v3856_v25 = vmax.f32 %v3600_v6, 0.0  ;;  %v3728_v50 = vadd.f32 %v7227_v60, %v3468_v34  ;;  %v3277_v51 = vld [vmem:[#allocation2 + $0x130] sm:$0xff]  ;;  %v5389_v56 = vld [vmem:[%s5540_s24 + $0x2e8] sm:$0xff]  ;;  %5227 = vmatmul.msk.bf16.gmra.mxu1 %vm1689_vm0, %v5357_v43  ;;  %v2954_v7 = vadd.f32 %v7327_v53, %v752_v10  ;;  %v753_v41 = vld [vmem:[#allocation2 + $0x740] sm:$0xff] }
 0x23a   : > { %4432 = vst.msk [vmem:[%s5730_s29 + $0x290] sm:$0xf] %vm4267_vm2, %v4175_v45  ;;  %v4048_v32 = vpack.c.bf16 %v3792_v39, %v3792_v39  ;;  %v3920_v19 = vmax.f32 %v3664_v27, 0.0  ;;  %v3537_v4 = vadd.f32 %v7227_v60, %v3277_v51  ;;  %v3341_v20 = vld [vmem:[#allocation2 + $0x330] sm:$0xff]  ;;  %v5421_v18 = vld [vmem:[%s5540_s24 + $0x3e8] sm:$0xff]  ;;  %5259 = vmatmul.msk.bf16.gmra.mxu2 %vm1689_vm0, %v5389_v56  ;;  %v7424_v2 = vpop.f32.mrf.mxu2  ;;  %v2763_v21 = vadd.f32 %v7329_v15, %v561_v62 }
 0x23b   : > { %4496 = vst.msk [vmem:[%s5730_s29 + $0x390] sm:$0xf] %vm4267_vm2, %v4239_v49  ;;  %v4112_v63 = vpack.c.bf16 %v3856_v25, %v3856_v25  ;;  %v3984_v37 = vmax.f32 %v3728_v50, 0.0  ;;  %v3601_v61 = vadd.f32 %v7227_v60, %v3341_v20  ;;  %v3405_v13 = vld [vmem:[#allocation2 + $0x530] sm:$0xff]  ;;  %5291 = vmatmul.msk.bf16.gmra.mxu3 %vm1689_vm0, %v5421_v18  ;;  %v2827_v11 = vadd.f32 %v7333_v30, %v625_v1  ;;  %v562_v14 = vld [vmem:[#allocation2 + $0x148] sm:$0xff] }
 0x23c   : > { %4305 = vst.msk [vmem:[%s5730_s29 + $0x94] sm:$0xf] %vm4267_vm2, %v4048_v32  ;;  %v4176_v57 = vpack.c.bf16 %v3920_v19, %v3920_v19  ;;  %v3793_v47 = vmax.f32 %v3537_v4, 0.0  ;;  %v3665_v12 = vadd.f32 %v7227_v60, %v3405_v13  ;;  %v2891_v53 = vadd.f32 %v7356_v5, %v689_v35  ;;  %v626_v6 = vld [vmem:[#allocation2 + $0x348] sm:$0xff]  ;;  %v563_v27 = vld [vmem:[#allocation2 + $0x150] sm:$0xff] }
 0x23d   : > { %4369 = vst.msk [vmem:[%s5730_s29 + $0x194] sm:$0xf] %vm4267_vm2, %v4112_v63  ;;  %v4240_v8 = vpack.c.bf16 %v3984_v37, %v3984_v37  ;;  %v3857_v59 = vmax.f32 %v3601_v61, 0.0  ;;  %v7428_v24 = vpop.f32.mrf.mxu3  ;;  %v7430_v46 = vpop.f32.mrf.mxu0  ;;  %v2955_v15 = vadd.f32 %v7360_v16, %v753_v41  ;;  %v690_v17 = vld [vmem:[#allocation2 + $0x548] sm:$0xff]  ;;  %v2764_v45 = vadd.f32 %v7362_v54, %v562_v14  ;;  %v5326_v61 = vld [vmem:[%s5540_s24 + $0xf0] sm:$0xff] }
 0x23e   : > { %4433 = vst.msk [vmem:[%s5730_s29 + $0x294] sm:$0xf] %vm4267_vm2, %v4176_v57  ;;  %v4049_v33 = vpack.c.bf16 %v3793_v47, %v3793_v47  ;;  %v3921_v38 = vmax.f32 %v3665_v12, 0.0  ;;  %v7434_v55 = vpop.f32.mrf.mxu1  ;;  %v754_v39 = vld [vmem:[#allocation2 + $0x748] sm:$0xff]  ;;  %v2828_v30 = vadd.f32 %v7367_v44, %v626_v6  ;;  %v2892_v5 = vadd.f32 %v7387_v58, %v690_v17  ;;  %v5358_v13 = vld [vmem:[%s5540_s24 + $0x1f0] sm:$0xff] }
 0x23f   : > { %4497 = vst.msk [vmem:[%s5730_s29 + $0x394] sm:$0xf] %vm4267_vm2, %v4240_v8  ;;  %v4113_v42 = vpack.c.bf16 %v3857_v59, %v3857_v59  ;;  %v2956_v54 = vadd.f32 %v7392_v0, %v754_v39  ;;  %v2765_v51 = vadd.f32 %v7394_v48, %v563_v27  ;;  %v5390_v12 = vld [vmem:[%s5540_s24 + $0x2f0] sm:$0xff] }
 0x240   : > { %4306 = vst.msk [vmem:[%s5730_s29 + $0x98] sm:$0xf] %vm4267_vm2, %v4049_v33  ;;  %v4177_v52 = vpack.c.bf16 %v3921_v38, %v3921_v38 }
 0x241   : > { %4370 = vst.msk [vmem:[%s5730_s29 + $0x198] sm:$0xf] %vm4267_vm2, %v4113_v42 }
 0x242   : > { %4434 = vst.msk [vmem:[%s5730_s29 + $0x298] sm:$0xf] %vm4267_vm2, %v4177_v52  ;;  %v7449_v25 = vpop.f32.mrf.mxu2 }
 0x243   : > { %3210 = vst.msk [vmem:[#allocation2 + $0x730] sm:$0xff] %vm264_vm1, %v2953_v28 }
 0x244   : > { %3019 = vst.msk [vmem:[#allocation2 + $0x138] sm:$0xff] %vm264_vm1, %v2762_v3 }
 0x245   : > { %3083 = vst.msk [vmem:[#allocation2 + $0x338] sm:$0xff] %vm264_vm1, %v2826_v23  ;;  %v7454_v32 = vpop.f32.mrf.mxu3  ;;  %v7456_v19 = vpop.f32.mrf.mxu0 }
 0x246   : > { %3147 = vst.msk [vmem:[#allocation2 + $0x538] sm:$0xff] %vm264_vm1, %v2890_v22  ;;  %v7460_v37 = vpop.f32.mrf.mxu1 }
 0x247   : > { %3211 = vst.msk [vmem:[#allocation2 + $0x738] sm:$0xff] %vm264_vm1, %v2954_v7 }
 0x248   : > { %3020 = vst.msk [vmem:[#allocation2 + $0x140] sm:$0xff] %vm264_vm1, %v2763_v21  ;;  %5196 = vmatmul.msk.bf16.gmra.mxu0 %vm1689_vm0, %v5326_v61 }
 0x249   : > { %3084 = vst.msk [vmem:[#allocation2 + $0x340] sm:$0xff] %vm264_vm1, %v2827_v11  ;;  %5228 = vmatmul.msk.bf16.gmra.mxu1 %vm1689_vm0, %v5358_v13 }
 0x24a   : > { %v3469_v34 = vld [vmem:[#allocation2 + $0x730] sm:$0xff]  ;;  %3148 = vst.msk [vmem:[#allocation2 + $0x540] sm:$0xff] %vm264_vm1, %v2891_v53  ;;  %5260 = vmatmul.msk.bf16.gmra.mxu2 %vm1689_vm0, %v5390_v12  ;;  %v564_v12 = vld [vmem:[#allocation2 + $0x158] sm:$0xff] }
 0x24b   : > { %v3729_v49 = vadd.f32 %v7227_v60, %v3469_v34  ;;  %v3278_v16 = vld [vmem:[#allocation2 + $0x138] sm:$0xff]  ;;  %3212 = vst.msk [vmem:[#allocation2 + $0x740] sm:$0xff] %vm264_vm1, %v2955_v15  ;;  %5292 = vmatmul.msk.bf16.gmra.mxu3 %vm1689_vm0, %v5422_v36  ;;  %v7485_v22 = vpop.f32.mrf.mxu2 }
 0x24c   : > { %v3538_v50 = vadd.f32 %v7227_v60, %v3278_v16  ;;  %v3342_v44 = vld [vmem:[#allocation2 + $0x338] sm:$0xff]  ;;  %3021 = vst.msk [vmem:[#allocation2 + $0x148] sm:$0xff] %vm264_vm1, %v2764_v45 }
 0x24d   : > { %v3985_v4 = vmax.f32 %v3729_v49, 0.0  ;;  %v3602_v20 = vadd.f32 %v7227_v60, %v3342_v44  ;;  %v3406_v63 = vld [vmem:[#allocation2 + $0x538] sm:$0xff]  ;;  %3085 = vst.msk [vmem:[#allocation2 + $0x348] sm:$0xff] %vm264_vm1, %v2828_v30  ;;  %v7490_v41 = vpop.f32.mrf.mxu3  ;;  %v7492_v11 = vpop.f32.mrf.mxu0 }
 0x24e   : > { %v3794_v58 = vmax.f32 %v3538_v50, 0.0  ;;  %v3666_v57 = vadd.f32 %v7227_v60, %v3406_v63  ;;  %v3470_v47 = vld [vmem:[#allocation2 + $0x738] sm:$0xff]  ;;  %3149 = vst.msk [vmem:[#allocation2 + $0x548] sm:$0xff] %vm264_vm1, %v2892_v5  ;;  %v7497_v17 = vpop.f32.mrf.mxu1  ;;  %v691_v63 = vld [vmem:[#allocation2 + $0x550] sm:$0xff] }
 0x24f   : > { %v4241_v0 = vpack.c.bf16 %v3985_v4, %v3985_v4  ;;  %v3858_v48 = vmax.f32 %v3602_v20, 0.0  ;;  %v3730_v8 = vadd.f32 %v7227_v60, %v3470_v47  ;;  %v3279_v59 = vld [vmem:[#allocation2 + $0x140] sm:$0xff]  ;;  %3213 = vst.msk [vmem:[#allocation2 + $0x748] sm:$0xff] %vm264_vm1, %v2956_v54 }
 0x250   : > { %v4050_v40 = vpack.c.bf16 %v3794_v58, %v3794_v58  ;;  %v3922_v9 = vmax.f32 %v3666_v57, 0.0  ;;  %v3539_v43 = vadd.f32 %v7227_v60, %v3279_v59  ;;  %v3343_v33 = vld [vmem:[#allocation2 + $0x340] sm:$0xff]  ;;  %3022 = vst.msk [vmem:[#allocation2 + $0x150] sm:$0xff] %vm264_vm1, %v2765_v51  ;;  %v627_v51 = vld [vmem:[#allocation2 + $0x350] sm:$0xff]  ;;  %v692_v59 = vld [vmem:[#allocation2 + $0x558] sm:$0xff] }
 0x251   : > { %4498 = vst.msk [vmem:[%s5730_s29 + $0x398] sm:$0xf] %vm4267_vm2, %v4241_v0  ;;  %v4114_v38 = vpack.c.bf16 %v3858_v48, %v3858_v48  ;;  %v3986_v29 = vmax.f32 %v3730_v8, 0.0  ;;  %v3603_v56 = vadd.f32 %v7227_v60, %v3343_v33  ;;  %v3407_v18 = vld [vmem:[#allocation2 + $0x540] sm:$0xff]  ;;  %v755_v58 = vld [vmem:[#allocation2 + $0x750] sm:$0xff]  ;;  %v2829_v47 = vadd.f32 %v7398_v31, %v627_v51  ;;  %v628_v8 = vld [vmem:[#allocation2 + $0x358] sm:$0xff] }
 0x252   : > { %4307 = vst.msk [vmem:[%s5730_s29 + $0x9c] sm:$0xf] %vm4267_vm2, %v4050_v40  ;;  %v4178_v42 = vpack.c.bf16 %v3922_v9, %v3922_v9  ;;  %v3795_v28 = vmax.f32 %v3539_v43, 0.0  ;;  %v3667_v26 = vadd.f32 %v7227_v60, %v3407_v18  ;;  %v3471_v52 = vld [vmem:[#allocation2 + $0x740] sm:$0xff]  ;;  %v2893_v48 = vadd.f32 %v7424_v2, %v691_v63  ;;  %v5327_v33 = vld [vmem:[%s5540_s24 + $0xf8] sm:$0xff] }
 0x253   : > { %4371 = vst.msk [vmem:[%s5730_s29 + $0x19c] sm:$0xf] %vm4267_vm2, %v4114_v38  ;;  %v4242_v3 = vpack.c.bf16 %v3986_v29, %v3986_v29  ;;  %v3859_v10 = vmax.f32 %v3603_v56, 0.0  ;;  %v3731_v23 = vadd.f32 %v7227_v60, %v3471_v52  ;;  %v3280_v62 = vld [vmem:[#allocation2 + $0x148] sm:$0xff]  ;;  %v2515_v36 = vpop.f32.mrf.mxu2  ;;  %v2957_v43 = vadd.f32 %v7428_v24, %v755_v58  ;;  %v5359_v38 = vld [vmem:[%s5540_s24 + $0x1f8] sm:$0xff]  ;;  %v693_v52 = vld [vmem:[#allocation2 + $0x560] sm:$0xff] }
 0x254   : > { %4435 = vst.msk [vmem:[%s5730_s29 + $0x29c] sm:$0xf] %vm4267_vm2, %v4178_v42  ;;  %v4051_v1 = vpack.c.bf16 %v3795_v28, %v3795_v28  ;;  %v3923_v7 = vmax.f32 %v3667_v26, 0.0  ;;  %v3540_v35 = vadd.f32 %v7227_v60, %v3280_v62  ;;  %v3344_v21 = vld [vmem:[#allocation2 + $0x348] sm:$0xff]  ;;  %v5391_v29 = vld [vmem:[%s5540_s24 + $0x2f8] sm:$0xff]  ;;  %v2766_v56 = vadd.f32 %v7430_v46, %v564_v12  ;;  %v565_v28 = vld [vmem:[#allocation2 + $0x160] sm:$0xff] }
 0x255   : > { %4499 = vst.msk [vmem:[%s5730_s29 + $0x39c] sm:$0xf] %vm4267_vm2, %v4242_v3  ;;  %v4115_v14 = vpack.c.bf16 %v3859_v10, %v3859_v10  ;;  %v3987_v53 = vmax.f32 %v3731_v23, 0.0  ;;  %v3604_v6 = vadd.f32 %v7227_v60, %v3344_v21  ;;  %v3408_v15 = vld [vmem:[#allocation2 + $0x548] sm:$0xff]  ;;  %v7518_v40 = vpop.f32.mrf.mxu3  ;;  %v7520_v9 = vpop.f32.mrf.mxu0  ;;  %v756_v2 = vld [vmem:[#allocation2 + $0x758] sm:$0xff]  ;;  %v2830_v42 = vadd.f32 %v7434_v55, %v628_v8  ;;  %v629_v26 = vld [vmem:[#allocation2 + $0x360] sm:$0xff] }
 0x256   : > { %4308 = vst.msk [vmem:[%s5730_s29 + $0xa0] sm:$0xf] %vm4267_vm2, %v4051_v1  ;;  %v4179_v45 = vpack.c.bf16 %v3923_v7, %v3923_v7  ;;  %v3796_v39 = vmax.f32 %v3540_v35, 0.0  ;;  %v3668_v30 = vadd.f32 %v7227_v60, %v3408_v15  ;;  %v3472_v27 = vld [vmem:[#allocation2 + $0x748] sm:$0xff]  ;;  %v7525_v31 = vpop.f32.mrf.mxu1  ;;  %v5423_v18 = vld [vmem:[%s5540_s24 + $0x3f8] sm:$0xff]  ;;  %v2894_v24 = vadd.f32 %v7449_v25, %v692_v59  ;;  %v757_v3 = vld [vmem:[#allocation2 + $0x760] sm:$0xff] }
 0x257   : > { %4372 = vst.msk [vmem:[%s5730_s29 + $0x1a0] sm:$0xf] %vm4267_vm2, %v4115_v14  ;;  %v4243_v34 = vpack.c.bf16 %v3987_v53, %v3987_v53  ;;  %v3860_v5 = vmax.f32 %v3604_v6, 0.0  ;;  %v3732_v49 = vadd.f32 %v7227_v60, %v3472_v27  ;;  %v3281_v16 = vld [vmem:[#allocation2 + $0x150] sm:$0xff]  ;;  %v2958_v46 = vadd.f32 %v7454_v32, %v756_v2  ;;  %v566_v25 = vld [vmem:[#allocation2 + $0x168] sm:$0xff] }
 0x258   : > { %4436 = vst.msk [vmem:[%s5730_s29 + $0x2a0] sm:$0xf] %vm4267_vm2, %v4179_v45  ;;  %v4052_v54 = vpack.c.bf16 %v3796_v39, %v3796_v39  ;;  %v3924_v50 = vmax.f32 %v3668_v30, 0.0  ;;  %v3541_v44 = vadd.f32 %v7227_v60, %v3281_v16  ;;  %5197 = vmatmul.msk.bf16.gmra.mxu0 %vm1689_vm0, %v5327_v33  ;;  %v2767_v55 = vadd.f32 %v7456_v19, %v565_v28  ;;  %v630_v32 = vld [vmem:[#allocation2 + $0x368] sm:$0xff] }
 0x259   : > { %4500 = vst.msk [vmem:[%s5730_s29 + $0x3a0] sm:$0xf] %vm4267_vm2, %v4243_v34  ;;  %v4116_v4 = vpack.c.bf16 %v3860_v5, %v3860_v5  ;;  %v3988_v20 = vmax.f32 %v3732_v49, 0.0  ;;  %5229 = vmatmul.msk.bf16.gmra.mxu1 %vm1689_vm0, %v5359_v38  ;;  %v2831_v10 = vadd.f32 %v7460_v37, %v629_v26  ;;  %v2895_v62 = vadd.f32 %v7485_v22, %v693_v52  ;;  %v694_v35 = vld [vmem:[#allocation2 + $0x568] sm:$0xff] }
 0x25a   : > { %4309 = vst.msk [vmem:[%s5730_s29 + $0xa4] sm:$0xf] %vm4267_vm2, %v4052_v54  ;;  %v4180_v61 = vpack.c.bf16 %v3924_v50, %v3924_v50  ;;  %v3797_v13 = vmax.f32 %v3541_v44, 0.0  ;;  %5261 = vmatmul.msk.bf16.gmra.mxu2 %vm1689_vm0, %v5391_v29  ;;  %v2959_v19 = vadd.f32 %v7490_v41, %v757_v3  ;;  %v2768_v14 = vadd.f32 %v7492_v11, %v566_v25 }
 0x25b   : > { %4373 = vst.msk [vmem:[%s5730_s29 + $0x1a4] sm:$0xf] %vm4267_vm2, %v4116_v4  ;;  %v4244_v57 = vpack.c.bf16 %v3988_v20, %v3988_v20  ;;  %5293 = vmatmul.msk.bf16.gmra.mxu3 %vm1689_vm0, %v5423_v18  ;;  %v7548_v23 = vpop.f32.mrf.mxu2  ;;  %v2832_v6 = vadd.f32 %v7497_v17, %v630_v32  ;;  %v2896_v41 = vadd.f32 %v2515_v36, %v694_v35 }
 0x25c   : > { %4437 = vst.msk [vmem:[%s5730_s29 + $0x2a4] sm:$0xf] %vm4267_vm2, %v4180_v61  ;;  %v4053_v0 = vpack.c.bf16 %v3797_v13, %v3797_v13 }
 0x25d   : > { %4501 = vst.msk [vmem:[%s5730_s29 + $0x3a4] sm:$0xf] %vm4267_vm2, %v4244_v57  ;;  %v7552_v1 = vpop.f32.mrf.mxu3  ;;  %v7554_v7 = vpop.f32.mrf.mxu0 }
 0x25e   : > { %4310 = vst.msk [vmem:[%s5730_s29 + $0xa8] sm:$0xf] %vm4267_vm2, %v4053_v0  ;;  %v7558_v21 = vpop.f32.mrf.mxu1 }
 0x25f   : > { %3086 = vst.msk [vmem:[#allocation2 + $0x350] sm:$0xff] %vm264_vm1, %v2829_v47 }
 0x260   : > { %3150 = vst.msk [vmem:[#allocation2 + $0x550] sm:$0xff] %vm264_vm1, %v2893_v48 }
 0x261   : > { %3214 = vst.msk [vmem:[#allocation2 + $0x750] sm:$0xff] %vm264_vm1, %v2957_v43 }
 0x262   : > { %3023 = vst.msk [vmem:[#allocation2 + $0x158] sm:$0xff] %vm264_vm1, %v2766_v56 }
 0x263   : > { %3087 = vst.msk [vmem:[#allocation2 + $0x358] sm:$0xff] %vm264_vm1, %v2830_v42  ;;  %v7573_v50 = vpop.f32.mrf.mxu2 }
 0x264   : > { %3151 = vst.msk [vmem:[#allocation2 + $0x558] sm:$0xff] %vm264_vm1, %v2894_v24 }
 0x265   : > { %3215 = vst.msk [vmem:[#allocation2 + $0x758] sm:$0xff] %vm264_vm1, %v2958_v46  ;;  %v7577_v63 = vpop.f32.mrf.mxu3  ;;  %v7579_v61 = vpop.f32.mrf.mxu0 }
 0x266   : > { %v3345_v37 = vld [vmem:[#allocation2 + $0x350] sm:$0xff]  ;;  %3024 = vst.msk [vmem:[#allocation2 + $0x160] sm:$0xff] %vm264_vm1, %v2767_v55  ;;  %v7584_v12 = vpop.f32.mrf.mxu1 }
 0x267   : > { %v3605_v53 = vadd.f32 %v7227_v60, %v3345_v37  ;;  %v3409_v22 = vld [vmem:[#allocation2 + $0x550] sm:$0xff]  ;;  %3088 = vst.msk [vmem:[#allocation2 + $0x360] sm:$0xff] %vm264_vm1, %v2831_v10 }
 0x268   : > { %v3669_v15 = vadd.f32 %v7227_v60, %v3409_v22  ;;  %v3473_v45 = vld [vmem:[#allocation2 + $0x750] sm:$0xff]  ;;  %3152 = vst.msk [vmem:[#allocation2 + $0x560] sm:$0xff] %vm264_vm1, %v2895_v62 }
 0x269   : > { %v3861_v39 = vmax.f32 %v3605_v53, 0.0  ;;  %v3733_v30 = vadd.f32 %v7227_v60, %v3473_v45  ;;  %v3282_v27 = vld [vmem:[#allocation2 + $0x158] sm:$0xff]  ;;  %3216 = vst.msk [vmem:[#allocation2 + $0x760] sm:$0xff] %vm264_vm1, %v2959_v19  ;;  %v758_v53 = vld [vmem:[#allocation2 + $0x768] sm:$0xff] }
 0x26a   : > { %v3925_v11 = vmax.f32 %v3669_v15, 0.0  ;;  %v3542_v34 = vadd.f32 %v7227_v60, %v3282_v27  ;;  %v3346_v5 = vld [vmem:[#allocation2 + $0x358] sm:$0xff]  ;;  %3025 = vst.msk [vmem:[#allocation2 + $0x168] sm:$0xff] %vm264_vm1, %v2768_v14 }
 0x26b   : > { %v4117_v17 = vpack.c.bf16 %v3861_v39, %v3861_v39  ;;  %v3989_v49 = vmax.f32 %v3733_v30, 0.0  ;;  %v3606_v16 = vadd.f32 %v7227_v60, %v3346_v5  ;;  %v3410_v54 = vld [vmem:[#allocation2 + $0x558] sm:$0xff]  ;;  %3089 = vst.msk [vmem:[#allocation2 + $0x368] sm:$0xff] %vm264_vm1, %v2832_v6  ;;  %v2523_v19 = vpop.f32.mrf.mxu2  ;;  %v695_v5 = vld [vmem:[#allocation2 + $0x570] sm:$0xff] }
 0x26c   : > { %v4181_v44 = vpack.c.bf16 %v3925_v11, %v3925_v11  ;;  %v3798_v51 = vmax.f32 %v3542_v34, 0.0  ;;  %v3670_v4 = vadd.f32 %v7227_v60, %v3410_v54  ;;  %v3474_v20 = vld [vmem:[#allocation2 + $0x758] sm:$0xff]  ;;  %3153 = vst.msk [vmem:[#allocation2 + $0x568] sm:$0xff] %vm264_vm1, %v2896_v41  ;;  %v567_v41 = vld [vmem:[#allocation2 + $0x170] sm:$0xff]  ;;  %v2960_v34 = vadd.f32 %v7518_v40, %v758_v53 }
 0x26d   : > { %4374 = vst.msk [vmem:[%s5730_s29 + $0x1a8] sm:$0xf] %vm4267_vm2, %v4117_v17  ;;  %v4245_v13 = vpack.c.bf16 %v3989_v49, %v3989_v49  ;;  %v3862_v58 = vmax.f32 %v3606_v16, 0.0  ;;  %v3734_v57 = vadd.f32 %v7227_v60, %v3474_v20  ;;  %v3283_v47 = vld [vmem:[#allocation2 + $0x160] sm:$0xff]  ;;  %v2683_v22 = vpop.f32.mrf.mxu3  ;;  %v2205_v6 = vpop.f32.mrf.mxu0  ;;  %v631_v11 = vld [vmem:[#allocation2 + $0x370] sm:$0xff]  ;;  %v2769_v49 = vadd.f32 %v7520_v9, %v567_v41  ;;  %v696_v20 = vld [vmem:[#allocation2 + $0x578] sm:$0xff] }
 0x26e   : > { %4438 = vst.msk [vmem:[%s5730_s29 + $0x2a8] sm:$0xf] %vm4267_vm2, %v4181_v44  ;;  %v4054_v36 = vpack.c.bf16 %v3798_v51, %v3798_v51  ;;  %v3926_v0 = vmax.f32 %v3670_v4, 0.0  ;;  %v3543_v48 = vadd.f32 %v7227_v60, %v3283_v47  ;;  %v3347_v8 = vld [vmem:[#allocation2 + $0x360] sm:$0xff]  ;;  %v7609_v39 = vpop.f32.mrf.mxu1  ;;  %v759_v16 = vld [vmem:[#allocation2 + $0x770] sm:$0xff]  ;;  %v2833_v54 = vadd.f32 %v7525_v31, %v631_v11  ;;  %v568_v44 = vld [vmem:[#allocation2 + $0x178] sm:$0xff] }
 0x26f   : > { %4502 = vst.msk [vmem:[%s5730_s29 + $0x3a8] sm:$0xf] %vm4267_vm2, %v4245_v13  ;;  %v4118_v59 = vpack.c.bf16 %v3862_v58, %v3862_v58  ;;  %v3990_v43 = vmax.f32 %v3734_v57, 0.0  ;;  %v3607_v33 = vadd.f32 %v7227_v60, %v3347_v8  ;;  %v3411_v38 = vld [vmem:[#allocation2 + $0x560] sm:$0xff]  ;;  %v2897_v51 = vadd.f32 %v7548_v23, %v695_v5  ;;  %v632_v4 = vld [vmem:[#allocation2 + $0x378] sm:$0xff] }
 0x270   : > { %4311 = vst.msk [vmem:[%s5730_s29 + $0xac] sm:$0xf] %vm4267_vm2, %v4054_v36  ;;  %v4182_v29 = vpack.c.bf16 %v3926_v0, %v3926_v0  ;;  %v3799_v56 = vmax.f32 %v3543_v48, 0.0  ;;  %v3671_v2 = vadd.f32 %v7227_v60, %v3411_v38  ;;  %v3475_v18 = vld [vmem:[#allocation2 + $0x760] sm:$0xff]  ;;  %v2961_v40 = vadd.f32 %v7552_v1, %v759_v16  ;;  %v760_v58 = vld [vmem:[#allocation2 + $0x778] sm:$0xff] }
 0x271   : > { %4375 = vst.msk [vmem:[%s5730_s29 + $0x1ac] sm:$0xf] %vm4267_vm2, %v4118_v59  ;;  %v4246_v42 = vpack.c.bf16 %v3990_v43, %v3990_v43  ;;  %v3863_v28 = vmax.f32 %v3607_v33, 0.0  ;;  %v3735_v24 = vadd.f32 %v7227_v60, %v3475_v18  ;;  %v3284_v26 = vld [vmem:[#allocation2 + $0x168] sm:$0xff]  ;;  %v2770_v9 = vadd.f32 %v7554_v7, %v568_v44  ;;  %v569_v47 = vld [vmem:[#allocation2 + $0x180] sm:$0xff] }
 0x272   : > { %4439 = vst.msk [vmem:[%s5730_s29 + $0x2ac] sm:$0xf] %vm4267_vm2, %v4182_v29  ;;  %v4055_v46 = vpack.c.bf16 %v3799_v56, %v3799_v56  ;;  %v3927_v52 = vmax.f32 %v3671_v2, 0.0  ;;  %v3544_v55 = vadd.f32 %v7227_v60, %v3284_v26  ;;  %v3348_v3 = vld [vmem:[#allocation2 + $0x368] sm:$0xff]  ;;  %v2834_v23 = vadd.f32 %v7558_v21, %v632_v4  ;;  %v633_v0 = vld [vmem:[#allocation2 + $0x380] sm:$0xff] }
 0x273   : > { %4503 = vst.msk [vmem:[%s5730_s29 + $0x3ac] sm:$0xf] %vm4267_vm2, %v4246_v42  ;;  %v4119_v10 = vpack.c.bf16 %v3863_v28, %v3863_v28  ;;  %v3991_v25 = vmax.f32 %v3735_v24, 0.0  ;;  %v3608_v62 = vadd.f32 %v7227_v60, %v3348_v3  ;;  %v3412_v32 = vld [vmem:[#allocation2 + $0x568] sm:$0xff]  ;;  %v7627_v13 = vpop.f32.mrf.mxu2  ;;  %v2898_v1 = vadd.f32 %v7573_v50, %v696_v20  ;;  %v697_v48 = vld [vmem:[#allocation2 + $0x580] sm:$0xff] }
 0x274   : > { %4312 = vst.msk [vmem:[%s5730_s29 + $0xb0] sm:$0xf] %vm4267_vm2, %v4055_v46  ;;  %v4183_v35 = vpack.c.bf16 %v3927_v52, %v3927_v52  ;;  %v3800_v37 = vmax.f32 %v3544_v55, 0.0  ;;  %v3672_v14 = vadd.f32 %v7227_v60, %v3412_v32  ;;  %v2962_v7 = vadd.f32 %v7577_v63, %v760_v58  ;;  %v761_v59 = vld [vmem:[#allocation2 + $0x780] sm:$0xff]  ;;  %v570_v43 = vld [vmem:[#allocation2 + $0x188] sm:$0xff] }
 0x275   : > { %4376 = vst.msk [vmem:[%s5730_s29 + $0x1b0] sm:$0xf] %vm4267_vm2, %v4119_v10  ;;  %v4247_v15 = vpack.c.bf16 %v3991_v25, %v3991_v25  ;;  %v3864_v45 = vmax.f32 %v3608_v62, 0.0  ;;  %v7631_v57 = vpop.f32.mrf.mxu3  ;;  %v7633_v31 = vpop.f32.mrf.mxu0  ;;  %v2771_v8 = vadd.f32 %v7579_v61, %v569_v47  ;;  %v2835_v21 = vadd.f32 %v7584_v12, %v633_v0  ;;  %v7651_v38 = vld [vmem:[%s8054_s2] ss:$0 sm:$0xff] }
 0x276   : > { %4440 = vst.msk [vmem:[%s5730_s29 + $0x2b0] sm:$0xf] %vm4267_vm2, %v4183_v35  ;;  %v4056_v30 = vpack.c.bf16 %v3800_v37, %v3800_v37  ;;  %v3928_v27 = vmax.f32 %v3672_v14, 0.0  ;;  %v7637_v36 = vpop.f32.mrf.mxu1  ;;  %v2899_v50 = vadd.f32 %v2523_v19, %v697_v48  ;;  %v2963_v61 = vadd.f32 %v2683_v22, %v761_v59 }
 0x277   : > { %4504 = vst.msk [vmem:[%s5730_s29 + $0x3b0] sm:$0xf] %vm4267_vm2, %v4247_v15  ;;  %v4120_v60 = vpack.c.bf16 %v3864_v45, %v3864_v45  ;;  %v2772_v18 = vadd.f32 %v2205_v6, %v570_v43 }
 0x278   : > { %4313 = vst.msk [vmem:[%s5730_s29 + $0xb4] sm:$0xf] %vm4267_vm2, %v4056_v30  ;;  %v4184_v17 = vpack.c.bf16 %v3928_v27, %v3928_v27 }
 0x279   : > { %4377 = vst.msk [vmem:[%s5730_s29 + $0x1b4] sm:$0xf] %vm4267_vm2, %v4120_v60 }
 0x27a   : > { %4441 = vst.msk [vmem:[%s5730_s29 + $0x2b4] sm:$0xf] %vm4267_vm2, %v4184_v17 }
 0x27b   : > { %3217 = vst.msk [vmem:[#allocation2 + $0x768] sm:$0xff] %vm264_vm1, %v2960_v34  ;;  %v7655_v56 = vpop.f32.mrf.mxu2 }
 0x27c   : > { %3026 = vst.msk [vmem:[#allocation2 + $0x170] sm:$0xff] %vm264_vm1, %v2769_v49 }
 0x27d   : > { %3090 = vst.msk [vmem:[#allocation2 + $0x370] sm:$0xff] %vm264_vm1, %v2833_v54  ;;  %v7659_v42 = vpop.f32.mrf.mxu3  ;;  %v7661_v28 = vpop.f32.mrf.mxu0 }
 0x27e   : > { %3154 = vst.msk [vmem:[#allocation2 + $0x570] sm:$0xff] %vm264_vm1, %v2897_v51  ;;  %v7665_v52 = vpop.f32.mrf.mxu1 }
 0x27f   : > { %3218 = vst.msk [vmem:[#allocation2 + $0x770] sm:$0xff] %vm264_vm1, %v2961_v40 }
 0x280   : > { %3027 = vst.msk [vmem:[#allocation2 + $0x178] sm:$0xff] %vm264_vm1, %v2770_v9 }
 0x281   : > { %3091 = vst.msk [vmem:[#allocation2 + $0x378] sm:$0xff] %vm264_vm1, %v2834_v23 }
 0x282   : > { %v3476_v33 = vld [vmem:[#allocation2 + $0x768] sm:$0xff]  ;;  %3155 = vst.msk [vmem:[#allocation2 + $0x578] sm:$0xff] %vm264_vm1, %v2898_v1 }
 0x283   : > { %v3736_v63 = vadd.f32 %v7651_v38, %v3476_v33  ;;  %v3285_v29 = vld [vmem:[#allocation2 + $0x170] sm:$0xff]  ;;  %3219 = vst.msk [vmem:[#allocation2 + $0x778] sm:$0xff] %vm264_vm1, %v2962_v7  ;;  %v7682_v49 = vpop.f32.mrf.mxu2 }
 0x284   : > { %v3545_v12 = vadd.f32 %v7651_v38, %v3285_v29  ;;  %v3349_v2 = vld [vmem:[#allocation2 + $0x370] sm:$0xff]  ;;  %3028 = vst.msk [vmem:[#allocation2 + $0x180] sm:$0xff] %vm264_vm1, %v2771_v8  ;;  %v634_v29 = vld [vmem:[#allocation2 + $0x388] sm:$0xff] }
 0x285   : > { %v3992_v24 = vmax.f32 %v3736_v63, 0.0  ;;  %v3609_v26 = vadd.f32 %v7651_v38, %v3349_v2  ;;  %v3413_v46 = vld [vmem:[#allocation2 + $0x570] sm:$0xff]  ;;  %3092 = vst.msk [vmem:[#allocation2 + $0x380] sm:$0xff] %vm264_vm1, %v2835_v21  ;;  %v7687_v4 = vpop.f32.mrf.mxu3  ;;  %v7689_v40 = vpop.f32.mrf.mxu0  ;;  %v698_v2 = vld [vmem:[#allocation2 + $0x588] sm:$0xff] }
 0x286   : > { %v3801_v55 = vmax.f32 %v3545_v12, 0.0  ;;  %v3673_v3 = vadd.f32 %v7651_v38, %v3413_v46  ;;  %v3477_v10 = vld [vmem:[#allocation2 + $0x770] sm:$0xff]  ;;  %3156 = vst.msk [vmem:[#allocation2 + $0x580] sm:$0xff] %vm264_vm1, %v2899_v50  ;;  %v7694_v47 = vpop.f32.mrf.mxu1 }
 0x287   : > { %v4248_v25 = vpack.c.bf16 %v3992_v24, %v3992_v24  ;;  %v3865_v62 = vmax.f32 %v3609_v26, 0.0  ;;  %v3737_v32 = vadd.f32 %v7651_v38, %v3477_v10  ;;  %v3286_v19 = vld [vmem:[#allocation2 + $0x178] sm:$0xff]  ;;  %3220 = vst.msk [vmem:[#allocation2 + $0x780] sm:$0xff] %vm264_vm1, %v2963_v61  ;;  %v762_v26 = vld [vmem:[#allocation2 + $0x788] sm:$0xff] }
 0x288   : > { %v4057_v35 = vpack.c.bf16 %v3801_v55, %v3801_v55  ;;  %v3929_v37 = vmax.f32 %v3673_v3, 0.0  ;;  %v3546_v14 = vadd.f32 %v7651_v38, %v3286_v19  ;;  %v3350_v53 = vld [vmem:[#allocation2 + $0x378] sm:$0xff]  ;;  %3029 = vst.msk [vmem:[#allocation2 + $0x188] sm:$0xff] %vm264_vm1, %v2772_v18  ;;  %v2836_v55 = vadd.f32 %v7609_v39, %v634_v29  ;;  %v571_v3 = vld [vmem:[#allocation2 + $0x190] sm:$0xff] }
 0x289   : > { %4505 = vst.msk [vmem:[%s5730_s29 + $0x3b4] sm:$0xf] %vm4267_vm2, %v4248_v25  ;;  %v4121_v22 = vpack.c.bf16 %v3865_v62, %v3865_v62  ;;  %v3993_v6 = vmax.f32 %v3737_v32, 0.0  ;;  %v3610_v15 = vadd.f32 %v7651_v38, %v3350_v53  ;;  %v3414_v45 = vld [vmem:[#allocation2 + $0x578] sm:$0xff]  ;;  %v2900_v62 = vadd.f32 %v7627_v13, %v698_v2  ;;  %v635_v32 = vld [vmem:[#allocation2 + $0x390] sm:$0xff] }
 0x28a   : > { %4314 = vst.msk [vmem:[%s5730_s29 + $0xb8] sm:$0xf] %vm4267_vm2, %v4057_v35  ;;  %v4185_v41 = vpack.c.bf16 %v3929_v37, %v3929_v37  ;;  %v3802_v30 = vmax.f32 %v3546_v14, 0.0  ;;  %v3674_v27 = vadd.f32 %v7651_v38, %v3414_v45  ;;  %v3478_v11 = vld [vmem:[#allocation2 + $0x778] sm:$0xff]  ;;  %v2964_v37 = vadd.f32 %v7631_v57, %v762_v26  ;;  %v699_v14 = vld [vmem:[#allocation2 + $0x590] sm:$0xff] }
 0x28b   : > { %4378 = vst.msk [vmem:[%s5730_s29 + $0x1b8] sm:$0xf] %vm4267_vm2, %v4121_v22  ;;  %v4249_v60 = vpack.c.bf16 %v3993_v6, %v3993_v6  ;;  %v3866_v34 = vmax.f32 %v3610_v15, 0.0  ;;  %v3738_v5 = vadd.f32 %v7651_v38, %v3478_v11  ;;  %v3287_v17 = vld [vmem:[#allocation2 + $0x180] sm:$0xff]  ;;  %v2533_v10 = vpop.f32.mrf.mxu2  ;;  %v2773_v39 = vadd.f32 %v7633_v31, %v571_v3  ;;  %v763_v53 = vld [vmem:[#allocation2 + $0x790] sm:$0xff]  ;;  %v572_v6 = vld [vmem:[#allocation2 + $0x198] sm:$0xff] }
 0x28c   : > { %4442 = vst.msk [vmem:[%s5730_s29 + $0x2b8] sm:$0xf] %vm4267_vm2, %v4185_v41  ;;  %v4058_v16 = vpack.c.bf16 %v3802_v30, %v3802_v30  ;;  %v3930_v54 = vmax.f32 %v3674_v27, 0.0  ;;  %v3547_v44 = vadd.f32 %v7651_v38, %v3287_v17  ;;  %v3351_v51 = vld [vmem:[#allocation2 + $0x380] sm:$0xff]  ;;  %v2837_v13 = vadd.f32 %v7637_v36, %v635_v32  ;;  %v636_v45 = vld [vmem:[#allocation2 + $0x398] sm:$0xff] }
 0x28d   : > { %4506 = vst.msk [vmem:[%s5730_s29 + $0x3b8] sm:$0xf] %vm4267_vm2, %v4249_v60  ;;  %v4122_v20 = vpack.c.bf16 %v3866_v34, %v3866_v34  ;;  %v3994_v9 = vmax.f32 %v3738_v5, 0.0  ;;  %v3611_v58 = vadd.f32 %v7651_v38, %v3351_v51  ;;  %v3415_v23 = vld [vmem:[#allocation2 + $0x580] sm:$0xff]  ;;  %v7715_v19 = vpop.f32.mrf.mxu3  ;;  %v7717_v35 = vpop.f32.mrf.mxu0  ;;  %v2901_v15 = vadd.f32 %v7655_v56, %v699_v14  ;;  %v700_v41 = vld [vmem:[#allocation2 + $0x598] sm:$0xff] }
 0x28e   : > { %4315 = vst.msk [vmem:[%s5730_s29 + $0xbc] sm:$0xf] %vm4267_vm2, %v4058_v16  ;;  %v4186_v1 = vpack.c.bf16 %v3930_v54, %v3930_v54  ;;  %v3803_v0 = vmax.f32 %v3547_v44, 0.0  ;;  %v3675_v7 = vadd.f32 %v7651_v38, %v3415_v23  ;;  %v3479_v48 = vld [vmem:[#allocation2 + $0x780] sm:$0xff]  ;;  %v7725_v22 = vpop.f32.mrf.mxu1  ;;  %v2965_v57 = vadd.f32 %v7659_v42, %v763_v53  ;;  %v764_v30 = vld [vmem:[#allocation2 + $0x798] sm:$0xff] }
 0x28f   : > { %4379 = vst.msk [vmem:[%s5730_s29 + $0x1bc] sm:$0xf] %vm4267_vm2, %v4122_v20  ;;  %v4250_v8 = vpack.c.bf16 %v3994_v9, %v3994_v9  ;;  %v3867_v59 = vmax.f32 %v3611_v58, 0.0  ;;  %v3739_v21 = vadd.f32 %v7651_v38, %v3479_v48  ;;  %v3288_v43 = vld [vmem:[#allocation2 + $0x188] sm:$0xff]  ;;  %v2774_v31 = vadd.f32 %v7661_v28, %v572_v6  ;;  %v573_v27 = vld [vmem:[#allocation2 + $0x1a0] sm:$0xff] }
 0x290   : > { %4443 = vst.msk [vmem:[%s5730_s29 + $0x2bc] sm:$0xf] %vm4267_vm2, %v4186_v1  ;;  %v4059_v33 = vpack.c.bf16 %v3803_v0, %v3803_v0  ;;  %v3931_v50 = vmax.f32 %v3675_v7, 0.0  ;;  %v3548_v63 = vadd.f32 %v7651_v38, %v3288_v43  ;;  %v2838_v36 = vadd.f32 %v7665_v52, %v636_v45  ;;  %v637_v60 = vld [vmem:[#allocation2 + $0x3a0] sm:$0xff] }
 0x291   : > { %4507 = vst.msk [vmem:[%s5730_s29 + $0x3bc] sm:$0xf] %vm4267_vm2, %v4250_v8  ;;  %v4123_v61 = vpack.c.bf16 %v3867_v59, %v3867_v59  ;;  %v3995_v12 = vmax.f32 %v3739_v21, 0.0  ;;  %v2902_v56 = vadd.f32 %v7682_v49, %v700_v41  ;;  %v2966_v28 = vadd.f32 %v7687_v4, %v764_v30  ;;  %v701_v5 = vld [vmem:[#allocation2 + $0x5a0] sm:$0xff] }
 0x292   : > { %4316 = vst.msk [vmem:[%s5730_s29 + $0xc0] sm:$0xf] %vm4267_vm2, %v4059_v33  ;;  %v4187_v18 = vpack.c.bf16 %v3931_v50, %v3931_v50  ;;  %v3804_v24 = vmax.f32 %v3548_v63, 0.0  ;;  %v2775_v52 = vadd.f32 %v7689_v40, %v573_v27  ;;  %v2839_v49 = vadd.f32 %v7694_v47, %v637_v60 }
 0x293   : > { %4380 = vst.msk [vmem:[%s5730_s29 + $0x1c0] sm:$0xf] %vm4267_vm2, %v4123_v61  ;;  %v4251_v46 = vpack.c.bf16 %v3995_v12, %v3995_v12  ;;  %v7737_v11 = vpop.f32.mrf.mxu2  ;;  %v2903_v20 = vadd.f32 %v2533_v10, %v701_v5 }
 0x294   : > { %4444 = vst.msk [vmem:[%s5730_s29 + $0x2c0] sm:$0xf] %vm4267_vm2, %v4187_v18  ;;  %v4060_v25 = vpack.c.bf16 %v3804_v24, %v3804_v24 }
 0x295   : > { %4508 = vst.msk [vmem:[%s5730_s29 + $0x3c0] sm:$0xf] %vm4267_vm2, %v4251_v46  ;;  %v7741_v34 = vpop.f32.mrf.mxu3  ;;  %v7743_v42 = vpop.f32.mrf.mxu0 }
 0x296   : > { %4317 = vst.msk [vmem:[%s5730_s29 + $0xc4] sm:$0xf] %vm4267_vm2, %v4060_v25  ;;  %v7754_v4 = vpop.f32.mrf.mxu1 }
 0x297   : > { %3093 = vst.msk [vmem:[#allocation2 + $0x388] sm:$0xff] %vm264_vm1, %v2836_v55 }
 0x298   : > { %3157 = vst.msk [vmem:[#allocation2 + $0x588] sm:$0xff] %vm264_vm1, %v2900_v62 }
 0x299   : > { %3221 = vst.msk [vmem:[#allocation2 + $0x788] sm:$0xff] %vm264_vm1, %v2964_v37 }
 0x29a   : > { %3030 = vst.msk [vmem:[#allocation2 + $0x190] sm:$0xff] %vm264_vm1, %v2773_v39 }
 0x29b   : > { %3094 = vst.msk [vmem:[#allocation2 + $0x390] sm:$0xff] %vm264_vm1, %v2837_v13  ;;  %v7762_v59 = vpop.f32.mrf.mxu2 }
 0x29c   : > { %3158 = vst.msk [vmem:[#allocation2 + $0x590] sm:$0xff] %vm264_vm1, %v2901_v15 }
 0x29d   : > { %3222 = vst.msk [vmem:[#allocation2 + $0x790] sm:$0xff] %vm264_vm1, %v2965_v57  ;;  %v7766_v63 = vpop.f32.mrf.mxu3  ;;  %v7768_v29 = vpop.f32.mrf.mxu0 }
 0x29e   : > { %v3352_v17 = vld [vmem:[#allocation2 + $0x388] sm:$0xff]  ;;  %3031 = vst.msk [vmem:[#allocation2 + $0x198] sm:$0xff] %vm264_vm1, %v2774_v31  ;;  %v2380_v30 = vpop.f32.mrf.mxu1 }
 0x29f   : > { %v3612_v16 = vadd.f32 %v7651_v38, %v3352_v17  ;;  %v3416_v54 = vld [vmem:[#allocation2 + $0x588] sm:$0xff]  ;;  %3095 = vst.msk [vmem:[#allocation2 + $0x398] sm:$0xff] %vm264_vm1, %v2838_v36 }
 0x2a0   : > { %v3676_v44 = vadd.f32 %v7651_v38, %v3416_v54  ;;  %v3480_v51 = vld [vmem:[#allocation2 + $0x788] sm:$0xff]  ;;  %3159 = vst.msk [vmem:[#allocation2 + $0x598] sm:$0xff] %vm264_vm1, %v2902_v56 }
 0x2a1   : > { %v3868_v9 = vmax.f32 %v3612_v16, 0.0  ;;  %v3740_v58 = vadd.f32 %v7651_v38, %v3480_v51  ;;  %v3289_v23 = vld [vmem:[#allocation2 + $0x190] sm:$0xff]  ;;  %3223 = vst.msk [vmem:[#allocation2 + $0x798] sm:$0xff] %vm264_vm1, %v2966_v28  ;;  %v765_v16 = vld [vmem:[#allocation2 + $0x7a0] sm:$0xff] }
 0x2a2   : > { %v3932_v40 = vmax.f32 %v3676_v44, 0.0  ;;  %v3549_v1 = vadd.f32 %v7651_v38, %v3289_v23  ;;  %v3353_v0 = vld [vmem:[#allocation2 + $0x390] sm:$0xff]  ;;  %3032 = vst.msk [vmem:[#allocation2 + $0x1a0] sm:$0xff] %vm264_vm1, %v2775_v52  ;;  %v638_v23 = vld [vmem:[#allocation2 + $0x3a8] sm:$0xff] }
 0x2a3   : > { %v4124_v47 = vpack.c.bf16 %v3868_v9, %v3868_v9  ;;  %v3996_v7 = vmax.f32 %v3740_v58, 0.0  ;;  %v3613_v48 = vadd.f32 %v7651_v38, %v3353_v0  ;;  %v3417_v8 = vld [vmem:[#allocation2 + $0x590] sm:$0xff]  ;;  %3096 = vst.msk [vmem:[#allocation2 + $0x3a0] sm:$0xff] %vm264_vm1, %v2839_v49  ;;  %v2540_v28 = vpop.f32.mrf.mxu2  ;;  %v702_v0 = vld [vmem:[#allocation2 + $0x5a8] sm:$0xff] }
 0x2a4   : > { %v4188_v21 = vpack.c.bf16 %v3932_v40, %v3932_v40  ;;  %v3805_v43 = vmax.f32 %v3549_v1, 0.0  ;;  %v3677_v33 = vadd.f32 %v7651_v38, %v3417_v8  ;;  %v3481_v50 = vld [vmem:[#allocation2 + $0x790] sm:$0xff]  ;;  %3160 = vst.msk [vmem:[#allocation2 + $0x5a0] sm:$0xff] %vm264_vm1, %v2903_v20  ;;  %v574_v20 = vld [vmem:[#allocation2 + $0x1a8] sm:$0xff]  ;;  %v2967_v1 = vadd.f32 %v7715_v19, %v765_v16 }
 0x2a5   : > { %4381 = vst.msk [vmem:[%s5730_s29 + $0x1c4] sm:$0xf] %vm4267_vm2, %v4124_v47  ;;  %v4252_v61 = vpack.c.bf16 %v3996_v7, %v3996_v7  ;;  %v3869_v12 = vmax.f32 %v3613_v48, 0.0  ;;  %v3741_v2 = vadd.f32 %v7651_v38, %v3481_v50  ;;  %v3290_v18 = vld [vmem:[#allocation2 + $0x198] sm:$0xff]  ;;  %v2700_v54 = vpop.f32.mrf.mxu3  ;;  %v2223_v49 = vpop.f32.mrf.mxu0  ;;  %v2776_v7 = vadd.f32 %v7717_v35, %v574_v20  ;;  %v766_v48 = vld [vmem:[#allocation2 + $0x7a8] sm:$0xff]  ;;  %v703_v50 = vld [vmem:[#allocation2 + $0x5b0] sm:$0xff] }
 0x2a6   : > { %4445 = vst.msk [vmem:[%s5730_s29 + $0x2c4] sm:$0xf] %vm4267_vm2, %v4188_v21  ;;  %v4061_v24 = vpack.c.bf16 %v3805_v43, %v3805_v43  ;;  %v3933_v26 = vmax.f32 %v3677_v33, 0.0  ;;  %v3550_v46 = vadd.f32 %v7651_v38, %v3290_v18  ;;  %v3354_v55 = vld [vmem:[#allocation2 + $0x398] sm:$0xff]  ;;  %v2840_v8 = vadd.f32 %v7725_v22, %v638_v23  ;;  %v575_v21 = vld [vmem:[#allocation2 + $0x1b0] sm:$0xff] }
 0x2a7   : > { %4509 = vst.msk [vmem:[%s5730_s29 + $0x3c4] sm:$0xf] %vm4267_vm2, %v4252_v61  ;;  %v4125_v3 = vpack.c.bf16 %v3869_v12, %v3869_v12  ;;  %v3997_v10 = vmax.f32 %v3741_v2, 0.0  ;;  %v3614_v25 = vadd.f32 %v7651_v38, %v3354_v55  ;;  %v3418_v62 = vld [vmem:[#allocation2 + $0x598] sm:$0xff]  ;;  %v2904_v43 = vadd.f32 %v7737_v11, %v702_v0  ;;  %v639_v33 = vld [vmem:[#allocation2 + $0x3b0] sm:$0xff]  ;;  %v7816_v2 = vpop.f32.mrf.mxu1 }
 0x2a8   : > { %4318 = vst.msk [vmem:[%s5730_s29 + $0xc8] sm:$0xf] %vm4267_vm2, %v4061_v24  ;;  %v4189_v32 = vpack.c.bf16 %v3933_v26, %v3933_v26  ;;  %v3806_v37 = vmax.f32 %v3550_v46, 0.0  ;;  %v3678_v14 = vadd.f32 %v7651_v38, %v3418_v62  ;;  %v3482_v39 = vld [vmem:[#allocation2 + $0x798] sm:$0xff]  ;;  %v2968_v19 = vadd.f32 %v7741_v34, %v766_v48  ;;  %v767_v12 = vld [vmem:[#allocation2 + $0x7b0] sm:$0xff] }
 0x2a9   : > { %4382 = vst.msk [vmem:[%s5730_s29 + $0x1c8] sm:$0xf] %vm4267_vm2, %v4125_v3  ;;  %v4253_v53 = vpack.c.bf16 %v3997_v10, %v3997_v10  ;;  %v3870_v13 = vmax.f32 %v3614_v25, 0.0  ;;  %v3742_v6 = vadd.f32 %v7651_v38, %v3482_v39  ;;  %v3291_v15 = vld [vmem:[#allocation2 + $0x1a0] sm:$0xff]  ;;  %v2777_v35 = vadd.f32 %v7743_v42, %v575_v21  ;;  %v576_v18 = vld [vmem:[#allocation2 + $0x1b8] sm:$0xff] }
 0x2aa   : > { %4446 = vst.msk [vmem:[%s5730_s29 + $0x2c8] sm:$0xf] %vm4267_vm2, %v4189_v32  ;;  %v4062_v45 = vpack.c.bf16 %v3806_v37, %v3806_v37  ;;  %v3934_v57 = vmax.f32 %v3678_v14, 0.0  ;;  %v3551_v41 = vadd.f32 %v7651_v38, %v3291_v15  ;;  %v3355_v31 = vld [vmem:[#allocation2 + $0x3a0] sm:$0xff]  ;;  %v2841_v11 = vadd.f32 %v7754_v4, %v639_v33  ;;  %v640_v26 = vld [vmem:[#allocation2 + $0x3b8] sm:$0xff] }
 0x2ab   : > { %4510 = vst.msk [vmem:[%s5730_s29 + $0x3c8] sm:$0xf] %vm4267_vm2, %v4253_v53  ;;  %v4126_v36 = vpack.c.bf16 %v3870_v13, %v3870_v13  ;;  %v3998_v27 = vmax.f32 %v3742_v6, 0.0  ;;  %v3615_v56 = vadd.f32 %v7651_v38, %v3355_v31  ;;  %v3419_v60 = vld [vmem:[#allocation2 + $0x5a0] sm:$0xff]  ;;  %v7812_v61 = vpop.f32.mrf.mxu2  ;;  %v2905_v34 = vadd.f32 %v7762_v59, %v703_v50  ;;  %v704_v46 = vld [vmem:[#allocation2 + $0x5b8] sm:$0xff] }
 0x2ac   : > { %4319 = vst.msk [vmem:[%s5730_s29 + $0xcc] sm:$0xf] %vm4267_vm2, %v4062_v45  ;;  %v4190_v5 = vpack.c.bf16 %v3934_v57, %v3934_v57  ;;  %v3807_v17 = vmax.f32 %v3551_v41, 0.0  ;;  %v3679_v52 = vadd.f32 %v7651_v38, %v3419_v60  ;;  %v2969_v42 = vadd.f32 %v7766_v63, %v767_v12  ;;  %v768_v3 = vld [vmem:[#allocation2 + $0x7b8] sm:$0xff]  ;;  %v577_v10 = vld [vmem:[#allocation2 + $0x1c0] sm:$0xff] }
 0x2ad   : > { %4383 = vst.msk [vmem:[%s5730_s29 + $0x1cc] sm:$0xf] %vm4267_vm2, %v4126_v36  ;;  %v4254_v44 = vpack.c.bf16 %v3998_v27, %v3998_v27  ;;  %v3871_v51 = vmax.f32 %v3615_v56, 0.0  ;;  %v7818_v22 = vpop.f32.mrf.mxu3  ;;  %v7822_v24 = vpop.f32.mrf.mxu0  ;;  %v2778_v55 = vadd.f32 %v7768_v29, %v576_v18  ;;  %v2842_v4 = vadd.f32 %v2380_v30, %v640_v26 }
 0x2ae   : > { %4447 = vst.msk [vmem:[%s5730_s29 + $0x2cc] sm:$0xf] %vm4267_vm2, %v4190_v5  ;;  %v4063_v9 = vpack.c.bf16 %v3807_v17, %v3807_v17  ;;  %v3935_v58 = vmax.f32 %v3679_v52, 0.0  ;;  %v2906_v62 = vadd.f32 %v2540_v28, %v704_v46  ;;  %v2970_v63 = vadd.f32 %v2700_v54, %v768_v3 }
 0x2af   : > { %4511 = vst.msk [vmem:[%s5730_s29 + $0x3cc] sm:$0xf] %vm4267_vm2, %v4254_v44  ;;  %v4127_v40 = vpack.c.bf16 %v3871_v51, %v3871_v51  ;;  %v2779_v29 = vadd.f32 %v2223_v49, %v577_v10  ;;  %v7842_v41 = vpop.f32.mrf.mxu1  ;;  %v641_v10 = vld [vmem:[#allocation2 + $0x3c0] sm:$0xff] }
 0x2b0   : > { %4320 = vst.msk [vmem:[%s5730_s29 + $0xd0] sm:$0xf] %vm4267_vm2, %v4063_v9  ;;  %v4191_v47 = vpack.c.bf16 %v3935_v58, %v3935_v58 }
 0x2b1   : > { %4384 = vst.msk [vmem:[%s5730_s29 + $0x1d0] sm:$0xf] %vm4267_vm2, %v4127_v40 }
 0x2b2   : > { %4448 = vst.msk [vmem:[%s5730_s29 + $0x2d0] sm:$0xf] %vm4267_vm2, %v4191_v47 }
 0x2b3   : > { %3224 = vst.msk [vmem:[#allocation2 + $0x7a0] sm:$0xff] %vm264_vm1, %v2967_v1  ;;  %v7838_v6 = vpop.f32.mrf.mxu2 }
 0x2b4   : > { %3033 = vst.msk [vmem:[#allocation2 + $0x1a8] sm:$0xff] %vm264_vm1, %v2776_v7 }
 0x2b5   : > { %3097 = vst.msk [vmem:[#allocation2 + $0x3a8] sm:$0xff] %vm264_vm1, %v2840_v8  ;;  %v7844_v31 = vpop.f32.mrf.mxu3  ;;  %v7848_v60 = vpop.f32.mrf.mxu0 }
 0x2b6   : > { %3161 = vst.msk [vmem:[#allocation2 + $0x5a8] sm:$0xff] %vm264_vm1, %v2904_v43 }
 0x2b7   : > { %3225 = vst.msk [vmem:[#allocation2 + $0x7a8] sm:$0xff] %vm264_vm1, %v2968_v19 }
 0x2b8   : > { %3034 = vst.msk [vmem:[#allocation2 + $0x1b0] sm:$0xff] %vm264_vm1, %v2777_v35 }
 0x2b9   : > { %3098 = vst.msk [vmem:[#allocation2 + $0x3b0] sm:$0xff] %vm264_vm1, %v2841_v11 }
 0x2ba   : > { %v3483_v25 = vld [vmem:[#allocation2 + $0x7a0] sm:$0xff]  ;;  %3162 = vst.msk [vmem:[#allocation2 + $0x5b0] sm:$0xff] %vm264_vm1, %v2905_v34 }
 0x2bb   : > { %v3743_v59 = vadd.f32 %v7651_v38, %v3483_v25  ;;  %v3292_v32 = vld [vmem:[#allocation2 + $0x1a8] sm:$0xff]  ;;  %3226 = vst.msk [vmem:[#allocation2 + $0x7b0] sm:$0xff] %vm264_vm1, %v2969_v42  ;;  %v2388_v25 = vpop.f32.mrf.mxu1 }
 0x2bc   : > { %v3552_v37 = vadd.f32 %v7651_v38, %v3292_v32  ;;  %v3356_v14 = vld [vmem:[#allocation2 + $0x3a8] sm:$0xff]  ;;  %3035 = vst.msk [vmem:[#allocation2 + $0x1b8] sm:$0xff] %vm264_vm1, %v2778_v55 }
 0x2bd   : > { %v3999_v39 = vmax.f32 %v3743_v59, 0.0  ;;  %v3616_v53 = vadd.f32 %v7651_v38, %v3356_v14  ;;  %v3420_v13 = vld [vmem:[#allocation2 + $0x5a8] sm:$0xff]  ;;  %3099 = vst.msk [vmem:[#allocation2 + $0x3b8] sm:$0xff] %vm264_vm1, %v2842_v4  ;;  %v2548_v46 = vpop.f32.mrf.mxu2 }
 0x2be   : > { %v3808_v15 = vmax.f32 %v3552_v37, 0.0  ;;  %v3680_v45 = vadd.f32 %v7651_v38, %v3420_v13  ;;  %v3484_v57 = vld [vmem:[#allocation2 + $0x7a8] sm:$0xff]  ;;  %3163 = vst.msk [vmem:[#allocation2 + $0x5b8] sm:$0xff] %vm264_vm1, %v2906_v62  ;;  %v2708_v62 = vpop.f32.mrf.mxu3  ;;  %v2230_v37 = vpop.f32.mrf.mxu0  ;;  %v2843_v13 = vadd.f32 %v7816_v2, %v641_v10 }
 0x2bf   : > { %v4255_v30 = vpack.c.bf16 %v3999_v39, %v3999_v39  ;;  %v3872_v36 = vmax.f32 %v3616_v53, 0.0  ;;  %v3744_v27 = vadd.f32 %v7651_v38, %v3484_v57  ;;  %v3293_v56 = vld [vmem:[#allocation2 + $0x1b0] sm:$0xff]  ;;  %3227 = vst.msk [vmem:[#allocation2 + $0x7b8] sm:$0xff] %vm264_vm1, %v2970_v63  ;;  %v705_v63 = vld [vmem:[#allocation2 + $0x5c0] sm:$0xff] }
 0x2c0   : > { %v4064_v28 = vpack.c.bf16 %v3808_v15, %v3808_v15  ;;  %v3936_v5 = vmax.f32 %v3680_v45, 0.0  ;;  %v3553_v17 = vadd.f32 %v7651_v38, %v3293_v56  ;;  %v3357_v52 = vld [vmem:[#allocation2 + $0x3b0] sm:$0xff]  ;;  %3036 = vst.msk [vmem:[#allocation2 + $0x1c0] sm:$0xff] %vm264_vm1, %v2779_v29  ;;  %v769_v39 = vld [vmem:[#allocation2 + $0x7c0] sm:$0xff]  ;;  %v578_v15 = vld [vmem:[#allocation2 + $0x1c8] sm:$0xff]  ;;  %v2907_v57 = vadd.f32 %v7812_v61, %v705_v63 }
 0x2c1   : > { %4512 = vst.msk [vmem:[%s5730_s29 + $0x3d0] sm:$0xf] %vm4267_vm2, %v4255_v30  ;;  %v4128_v16 = vpack.c.bf16 %v3872_v36, %v3872_v36  ;;  %v4000_v54 = vmax.f32 %v3744_v27, 0.0  ;;  %v3617_v49 = vadd.f32 %v7651_v38, %v3357_v52  ;;  %v3421_v44 = vld [vmem:[#allocation2 + $0x5b0] sm:$0xff]  ;;  %v642_v30 = vld [vmem:[#allocation2 + $0x3c8] sm:$0xff]  ;;  %v2971_v36 = vadd.f32 %v7818_v22, %v769_v39 }
 0x2c2   : > { %4321 = vst.msk [vmem:[%s5730_s29 + $0xd4] sm:$0xf] %vm4267_vm2, %v4064_v28  ;;  %v4192_v51 = vpack.c.bf16 %v3936_v5, %v3936_v5  ;;  %v3809_v20 = vmax.f32 %v3553_v17, 0.0  ;;  %v3681_v9 = vadd.f32 %v7651_v38, %v3421_v44  ;;  %v3485_v58 = vld [vmem:[#allocation2 + $0x7b0] sm:$0xff]  ;;  %v706_v27 = vld [vmem:[#allocation2 + $0x5c8] sm:$0xff]  ;;  %v2780_v56 = vadd.f32 %v7822_v24, %v578_v15 }
 0x2c3   : > { %4385 = vst.msk [vmem:[%s5730_s29 + $0x1d4] sm:$0xf] %vm4267_vm2, %v4128_v16  ;;  %v4256_v23 = vpack.c.bf16 %v4000_v54, %v4000_v54  ;;  %v3873_v40 = vmax.f32 %v3617_v49, 0.0  ;;  %v3745_v1 = vadd.f32 %v7651_v38, %v3485_v58  ;;  %v3294_v0 = vld [vmem:[#allocation2 + $0x1b8] sm:$0xff]  ;;  %v770_v28 = vld [vmem:[#allocation2 + $0x7c8] sm:$0xff]  ;;  %v2844_v2 = vadd.f32 %v7842_v41, %v642_v30  ;;  %v579_v5 = vld [vmem:[#allocation2 + $0x1d0] sm:$0xff]  ;;  %v2390_v49 = vpop.f32.mrf.mxu1 }
 0x2c4   : > { %4449 = vst.msk [vmem:[%s5730_s29 + $0x2d4] sm:$0xf] %vm4267_vm2, %v4192_v51  ;;  %v4065_v47 = vpack.c.bf16 %v3809_v20, %v3809_v20  ;;  %v3937_v7 = vmax.f32 %v3681_v9, 0.0  ;;  %v3554_v48 = vadd.f32 %v7651_v38, %v3294_v0  ;;  %v3358_v8 = vld [vmem:[#allocation2 + $0x3b8] sm:$0xff]  ;;  %v2908_v61 = vadd.f32 %v7838_v6, %v706_v27  ;;  %v643_v17 = vld [vmem:[#allocation2 + $0x3d0] sm:$0xff] }
 0x2c5   : > { %4513 = vst.msk [vmem:[%s5730_s29 + $0x3d4] sm:$0xf] %vm4267_vm2, %v4256_v23  ;;  %v4129_v21 = vpack.c.bf16 %v3873_v40, %v3873_v40  ;;  %v4001_v43 = vmax.f32 %v3745_v1, 0.0  ;;  %v3618_v33 = vadd.f32 %v7651_v38, %v3358_v8  ;;  %v3422_v19 = vld [vmem:[#allocation2 + $0x5b8] sm:$0xff]  ;;  %v2972_v22 = vadd.f32 %v7844_v31, %v770_v28  ;;  %v707_v52 = vld [vmem:[#allocation2 + $0x5d0] sm:$0xff]  ;;  %v2550_v16 = vpop.f32.mrf.mxu2 }
 0x2c6   : > { %4322 = vst.msk [vmem:[%s5730_s29 + $0xd8] sm:$0xf] %vm4267_vm2, %v4065_v47  ;;  %v4193_v50 = vpack.c.bf16 %v3937_v7, %v3937_v7  ;;  %v3810_v35 = vmax.f32 %v3554_v48, 0.0  ;;  %v3682_v12 = vadd.f32 %v7651_v38, %v3422_v19  ;;  %v3486_v11 = vld [vmem:[#allocation2 + $0x7b8] sm:$0xff]  ;;  %v2781_v24 = vadd.f32 %v7848_v60, %v579_v5  ;;  %v771_v54 = vld [vmem:[#allocation2 + $0x7d0] sm:$0xff]  ;;  %v7900_v44 = vpop.f32.mrf.mxu3  ;;  %v7903_v6 = vpop.f32.mrf.mxu0 }
 0x2c7   : > { %4386 = vst.msk [vmem:[%s5730_s29 + $0x1d8] sm:$0xf] %vm4267_vm2, %v4129_v21  ;;  %v4257_v18 = vpack.c.bf16 %v4001_v43, %v4001_v43  ;;  %v3874_v34 = vmax.f32 %v3618_v33, 0.0  ;;  %v3746_v26 = vadd.f32 %v7651_v38, %v3486_v11  ;;  %v3295_v42 = vld [vmem:[#allocation2 + $0x1c0] sm:$0xff]  ;;  %v2845_v41 = vadd.f32 %v2388_v25, %v643_v17  ;;  %v580_v51 = vld [vmem:[#allocation2 + $0x1d8] sm:$0xff] }
 0x2c8   : > { %4450 = vst.msk [vmem:[%s5730_s29 + $0x2d8] sm:$0xf] %vm4267_vm2, %v4193_v50  ;;  %v4066_v55 = vpack.c.bf16 %v3810_v35, %v3810_v35  ;;  %v3938_v3 = vmax.f32 %v3682_v12, 0.0  ;;  %v3555_v4 = vadd.f32 %v7651_v38, %v3295_v42  ;;  %v2909_v20 = vadd.f32 %v2548_v46, %v707_v52  ;;  %v644_v31 = vld [vmem:[#allocation2 + $0x3d8] sm:$0xff] }
 0x2c9   : > { %4514 = vst.msk [vmem:[%s5730_s29 + $0x3d8] sm:$0xf] %vm4267_vm2, %v4257_v18  ;;  %v4130_v59 = vpack.c.bf16 %v3874_v34, %v3874_v34  ;;  %v4002_v32 = vmax.f32 %v3746_v26, 0.0  ;;  %v2973_v9 = vadd.f32 %v2708_v62, %v771_v54  ;;  %v708_v58 = vld [vmem:[#allocation2 + $0x5d8] sm:$0xff]  ;;  %v2782_v60 = vadd.f32 %v2230_v37, %v580_v51 }
 0x2ca   : > { %4323 = vst.msk [vmem:[%s5730_s29 + $0xdc] sm:$0xf] %vm4267_vm2, %v4066_v55  ;;  %v4194_v14 = vpack.c.bf16 %v3938_v3, %v3938_v3  ;;  %v3811_v29 = vmax.f32 %v3555_v4, 0.0  ;;  %v2846_v0 = vadd.f32 %v2390_v49, %v644_v31  ;;  %v2910_v48 = vadd.f32 %v2550_v16, %v708_v58  ;;  %v581_v58 = vld [vmem:[#allocation2 + $0x1e0] sm:$0xff] }
 0x2cb   : > { %4387 = vst.msk [vmem:[%s5730_s29 + $0x1dc] sm:$0xf] %vm4267_vm2, %v4130_v59  ;;  %v4258_v53 = vpack.c.bf16 %v4002_v32, %v4002_v32  ;;  %v7922_v3 = vpop.f32.mrf.mxu1 }
 0x2cc   : > { %4451 = vst.msk [vmem:[%s5730_s29 + $0x2dc] sm:$0xf] %vm4267_vm2, %v4194_v14  ;;  %v4067_v45 = vpack.c.bf16 %v3811_v29, %v3811_v29 }
 0x2cd   : > { %4515 = vst.msk [vmem:[%s5730_s29 + $0x3dc] sm:$0xf] %vm4267_vm2, %v4258_v53  ;;  %v7918_v34 = vpop.f32.mrf.mxu2 }
 0x2ce   : > { %4324 = vst.msk [vmem:[%s5730_s29 + $0xe0] sm:$0xf] %vm4267_vm2, %v4067_v45  ;;  %v7924_v4 = vpop.f32.mrf.mxu3  ;;  %v7929_v32 = vpop.f32.mrf.mxu0 }
 0x2cf   : > { %3100 = vst.msk [vmem:[#allocation2 + $0x3c0] sm:$0xff] %vm264_vm1, %v2843_v13 }
 0x2d0   : > { %3164 = vst.msk [vmem:[#allocation2 + $0x5c0] sm:$0xff] %vm264_vm1, %v2907_v57 }
 0x2d1   : > { %3228 = vst.msk [vmem:[#allocation2 + $0x7c0] sm:$0xff] %vm264_vm1, %v2971_v36 }
 0x2d2   : > { %3037 = vst.msk [vmem:[#allocation2 + $0x1c8] sm:$0xff] %vm264_vm1, %v2780_v56 }
 0x2d3   : > { %3101 = vst.msk [vmem:[#allocation2 + $0x3c8] sm:$0xff] %vm264_vm1, %v2844_v2 }
 0x2d4   : > { %3165 = vst.msk [vmem:[#allocation2 + $0x5c8] sm:$0xff] %vm264_vm1, %v2908_v61 }
 0x2d5   : > { %3229 = vst.msk [vmem:[#allocation2 + $0x7c8] sm:$0xff] %vm264_vm1, %v2972_v22 }
 0x2d6   : > { %v3359_v23 = vld [vmem:[#allocation2 + $0x3c0] sm:$0xff]  ;;  %3038 = vst.msk [vmem:[#allocation2 + $0x1d0] sm:$0xff] %vm264_vm1, %v2781_v24 }
 0x2d7   : > { %v3619_v40 = vadd.f32 %v7651_v38, %v3359_v23  ;;  %v3423_v1 = vld [vmem:[#allocation2 + $0x5c0] sm:$0xff]  ;;  %3102 = vst.msk [vmem:[#allocation2 + $0x3d0] sm:$0xff] %vm264_vm1, %v2845_v41  ;;  %v2555_v23 = vpop.f32.mrf.mxu2 }
 0x2d8   : > { %v3683_v47 = vadd.f32 %v7651_v38, %v3423_v1  ;;  %v3487_v7 = vld [vmem:[#allocation2 + $0x7c0] sm:$0xff]  ;;  %3166 = vst.msk [vmem:[#allocation2 + $0x5d0] sm:$0xff] %vm264_vm1, %v2909_v20  ;;  %v772_v20 = vld [vmem:[#allocation2 + $0x7d8] sm:$0xff] }
 0x2d9   : > { %v3875_v8 = vmax.f32 %v3619_v40, 0.0  ;;  %v3747_v21 = vadd.f32 %v7651_v38, %v3487_v7  ;;  %v3296_v43 = vld [vmem:[#allocation2 + $0x1c8] sm:$0xff]  ;;  %3230 = vst.msk [vmem:[#allocation2 + $0x7d0] sm:$0xff] %vm264_vm1, %v2973_v9  ;;  %v645_v1 = vld [vmem:[#allocation2 + $0x3e0] sm:$0xff] }
 0x2da   : > { %v3939_v33 = vmax.f32 %v3683_v47, 0.0  ;;  %v3556_v19 = vadd.f32 %v7651_v38, %v3296_v43  ;;  %v3360_v50 = vld [vmem:[#allocation2 + $0x3c8] sm:$0xff]  ;;  %3039 = vst.msk [vmem:[#allocation2 + $0x1d8] sm:$0xff] %vm264_vm1, %v2782_v60  ;;  %v2715_v47 = vpop.f32.mrf.mxu3 }
 0x2db   : > { %v4131_v35 = vpack.c.bf16 %v3875_v8, %v3875_v8  ;;  %v4003_v12 = vmax.f32 %v3747_v21, 0.0  ;;  %v3620_v11 = vadd.f32 %v7651_v38, %v3360_v50  ;;  %v3424_v18 = vld [vmem:[#allocation2 + $0x5c8] sm:$0xff]  ;;  %3103 = vst.msk [vmem:[#allocation2 + $0x3d8] sm:$0xff] %vm264_vm1, %v2846_v0  ;;  %v2395_v0 = vpop.f32.mrf.mxu1  ;;  %v709_v8 = vld [vmem:[#allocation2 + $0x5e0] sm:$0xff]  ;;  %v2238_v21 = vpop.f32.mrf.mxu0  ;;  %v2847_v50 = vadd.f32 %v7922_v3, %v645_v1  ;;  %v647_v3 = vld [vmem:[#allocation2 + $0x3f0] sm:$0xff] }
 0x2dc   : > { %v4195_v26 = vpack.c.bf16 %v3939_v33, %v3939_v33  ;;  %v3812_v42 = vmax.f32 %v3556_v19, 0.0  ;;  %v3684_v46 = vadd.f32 %v7651_v38, %v3424_v18  ;;  %v3488_v55 = vld [vmem:[#allocation2 + $0x7c8] sm:$0xff]  ;;  %3167 = vst.msk [vmem:[#allocation2 + $0x5d8] sm:$0xff] %vm264_vm1, %v2910_v48  ;;  %v2974_v48 = vadd.f32 %v7900_v44, %v772_v20  ;;  %v773_v19 = vld [vmem:[#allocation2 + $0x7e0] sm:$0xff] }
 0x2dd   : > { %4388 = vst.msk [vmem:[%s5730_s29 + $0x1e0] sm:$0xf] %vm4267_vm2, %v4131_v35  ;;  %v4259_v10 = vpack.c.bf16 %v4003_v12, %v4003_v12  ;;  %v3876_v25 = vmax.f32 %v3620_v11, 0.0  ;;  %v3748_v62 = vadd.f32 %v7651_v38, %v3488_v55  ;;  %v3297_v59 = vld [vmem:[#allocation2 + $0x1d0] sm:$0xff]  ;;  %v2783_v33 = vadd.f32 %v7903_v6, %v581_v58  ;;  %v582_v35 = vld [vmem:[#allocation2 + $0x1e8] sm:$0xff] }
 0x2de   : > { %4452 = vst.msk [vmem:[%s5730_s29 + $0x2e0] sm:$0xf] %vm4267_vm2, %v4195_v26  ;;  %v4068_v63 = vpack.c.bf16 %v3812_v42, %v3812_v42  ;;  %v3940_v37 = vmax.f32 %v3684_v46, 0.0  ;;  %v3557_v14 = vadd.f32 %v7651_v38, %v3297_v59  ;;  %v3361_v29 = vld [vmem:[#allocation2 + $0x3d0] sm:$0xff]  ;;  %v2911_v12 = vadd.f32 %v7918_v34, %v709_v8  ;;  %v646_v11 = vld [vmem:[#allocation2 + $0x3e8] sm:$0xff] }
 0x2df   : > { %4516 = vst.msk [vmem:[%s5730_s29 + $0x3e0] sm:$0xf] %vm4267_vm2, %v4259_v10  ;;  %v4132_v39 = vpack.c.bf16 %v3876_v25, %v3876_v25  ;;  %v4004_v53 = vmax.f32 %v3748_v62, 0.0  ;;  %v3621_v13 = vadd.f32 %v7651_v38, %v3361_v29  ;;  %v3425_v15 = vld [vmem:[#allocation2 + $0x5d0] sm:$0xff]  ;;  %v2975_v44 = vadd.f32 %v7924_v4, %v773_v19  ;;  %v710_v18 = vld [vmem:[#allocation2 + $0x5e8] sm:$0xff]  ;;  %v2558_v25 = vpop.f32.mrf.mxu2 }
 0x2e0   : > { %4325 = vst.msk [vmem:[%s5730_s29 + $0xe4] sm:$0xf] %vm4267_vm2, %v4068_v63  ;;  %v4196_v45 = vpack.c.bf16 %v3940_v37, %v3940_v37  ;;  %v3813_v57 = vmax.f32 %v3557_v14, 0.0  ;;  %v3685_v30 = vadd.f32 %v7651_v38, %v3425_v15  ;;  %v3489_v36 = vld [vmem:[#allocation2 + $0x7d0] sm:$0xff]  ;;  %v2784_v6 = vadd.f32 %v7929_v32, %v582_v35  ;;  %v774_v26 = vld [vmem:[#allocation2 + $0x7e8] sm:$0xff]  ;;  %v584_v37 = vld [vmem:[#allocation2 + $0x1f8] sm:$0xff] }
 0x2e1   : > { %4389 = vst.msk [vmem:[%s5730_s29 + $0x1e4] sm:$0xf] %vm4267_vm2, %v4132_v39  ;;  %v4260_v27 = vpack.c.bf16 %v4004_v53, %v4004_v53  ;;  %v3877_v56 = vmax.f32 %v3621_v13, 0.0  ;;  %v3749_v28 = vadd.f32 %v7651_v38, %v3489_v36  ;;  %v3298_v2 = vld [vmem:[#allocation2 + $0x1d8] sm:$0xff]  ;;  %v2848_v42 = vadd.f32 %v2395_v0, %v646_v11  ;;  %v583_v46 = vld [vmem:[#allocation2 + $0x1f0] sm:$0xff] }
 0x2e2   : > { %4453 = vst.msk [vmem:[%s5730_s29 + $0x2e4] sm:$0xf] %vm4267_vm2, %v4196_v45  ;;  %v4069_v5 = vpack.c.bf16 %v3813_v57, %v3813_v57  ;;  %v3941_v61 = vmax.f32 %v3685_v30, 0.0  ;;  %v3558_v17 = vadd.f32 %v7651_v38, %v3298_v2  ;;  %v3362_v22 = vld [vmem:[#allocation2 + $0x3d8] sm:$0xff]  ;;  %v2912_v55 = vadd.f32 %v2555_v23, %v710_v18  ;;  %v711_v10 = vld [vmem:[#allocation2 + $0x5f0] sm:$0xff]  ;;  %v2718_v32 = vpop.f32.mrf.mxu3 }
 0x2e3   : > { %4517 = vst.msk [vmem:[%s5730_s29 + $0x3e4] sm:$0xf] %vm4267_vm2, %v4260_v27  ;;  %v4133_v52 = vpack.c.bf16 %v3877_v56, %v3877_v56  ;;  %v4005_v16 = vmax.f32 %v3749_v28, 0.0  ;;  %v3622_v24 = vadd.f32 %v7651_v38, %v3362_v22  ;;  %v3426_v54 = vld [vmem:[#allocation2 + $0x5d8] sm:$0xff]  ;;  %v2976_v34 = vadd.f32 %v2715_v47, %v774_v26  ;;  %v2398_v62 = vpop.f32.mrf.mxu1  ;;  %v775_v59 = vld [vmem:[#allocation2 + $0x7f0] sm:$0xff]  ;;  %v2240_v14 = vpop.f32.mrf.mxu0 }
 0x2e4   : > { %4326 = vst.msk [vmem:[%s5730_s29 + $0xe8] sm:$0xf] %vm4267_vm2, %v4069_v5  ;;  %v4197_v49 = vpack.c.bf16 %v3941_v61, %v3941_v61  ;;  %v3814_v41 = vmax.f32 %v3558_v17, 0.0  ;;  %v3686_v51 = vadd.f32 %v7651_v38, %v3426_v54  ;;  %v2785_v4 = vadd.f32 %v2238_v21, %v583_v46  ;;  %v7987_v2 = vld [vmem:[%s8054_s2] ss:$0 sm:$0xff] }
 0x2e5   : > { %4390 = vst.msk [vmem:[%s5730_s29 + $0x1e8] sm:$0xf] %vm4267_vm2, %v4133_v52  ;;  %v4261_v31 = vpack.c.bf16 %v4005_v16, %v4005_v16  ;;  %v3878_v9 = vmax.f32 %v3622_v24, 0.0  ;;  %v2849_v63 = vadd.f32 %v2398_v62, %v647_v3  ;;  %v2913_v39 = vadd.f32 %v2558_v25, %v711_v10  ;;  %v712_v62 = vld [vmem:[#allocation2 + $0x5f8] sm:$0xff] }
 0x2e6   : > { %4454 = vst.msk [vmem:[%s5730_s29 + $0x2e8] sm:$0xf] %vm4267_vm2, %v4197_v49  ;;  %v4070_v60 = vpack.c.bf16 %v3814_v41, %v3814_v41  ;;  %v3942_v40 = vmax.f32 %v3686_v51, 0.0  ;;  %v2977_v15 = vadd.f32 %v2718_v32, %v775_v59  ;;  %v2786_v30 = vadd.f32 %v2240_v14, %v584_v37  ;;  %v776_v37 = vld [vmem:[#allocation2 + $0x7f8] sm:$0xff] }
 0x2e7   : > { %4518 = vst.msk [vmem:[%s5730_s29 + $0x3e8] sm:$0xf] %vm4267_vm2, %v4261_v31  ;;  %v4134_v7 = vpack.c.bf16 %v3878_v9, %v3878_v9  ;;  %v2560_v59 = vpop.f32.mrf.mxu2 }
 0x2e8   : > { %4327 = vst.msk [vmem:[%s5730_s29 + $0xec] sm:$0xf] %vm4267_vm2, %v4070_v60  ;;  %v4198_v43 = vpack.c.bf16 %v3942_v40, %v3942_v40 }
 0x2e9   : > { %4391 = vst.msk [vmem:[%s5730_s29 + $0x1ec] sm:$0xf] %vm4267_vm2, %v4134_v7 }
 0x2ea   : > { %4455 = vst.msk [vmem:[%s5730_s29 + $0x2ec] sm:$0xf] %vm4267_vm2, %v4198_v43  ;;  %v2720_v14 = vpop.f32.mrf.mxu3 }
 0x2eb   : > { %3231 = vst.msk [vmem:[#allocation2 + $0x7d8] sm:$0xff] %vm264_vm1, %v2974_v48  ;;  %v2400_v10 = vpop.f32.mrf.mxu1 }
 0x2ec   : > { %3040 = vst.msk [vmem:[#allocation2 + $0x1e0] sm:$0xff] %vm264_vm1, %v2783_v33 }
 0x2ed   : > { %3104 = vst.msk [vmem:[#allocation2 + $0x3e0] sm:$0xff] %vm264_vm1, %v2847_v50 }
 0x2ee   : > { %3168 = vst.msk [vmem:[#allocation2 + $0x5e0] sm:$0xff] %vm264_vm1, %v2911_v12 }
 0x2ef   : > { %3232 = vst.msk [vmem:[#allocation2 + $0x7e0] sm:$0xff] %vm264_vm1, %v2975_v44 }
 0x2f0   : > { %3041 = vst.msk [vmem:[#allocation2 + $0x1e8] sm:$0xff] %vm264_vm1, %v2784_v6 }
 0x2f1   : > { %3105 = vst.msk [vmem:[#allocation2 + $0x3e8] sm:$0xff] %vm264_vm1, %v2848_v42 }
 0x2f2   : > { %v3490_v29 = vld [vmem:[#allocation2 + $0x7d8] sm:$0xff]  ;;  %3169 = vst.msk [vmem:[#allocation2 + $0x5e8] sm:$0xff] %vm264_vm1, %v2912_v55 }
 0x2f3   : > { %v3750_v53 = vadd.f32 %v7651_v38, %v3490_v29  ;;  %v3299_v13 = vld [vmem:[#allocation2 + $0x1e0] sm:$0xff]  ;;  %3233 = vst.msk [vmem:[#allocation2 + $0x7e8] sm:$0xff] %vm264_vm1, %v2976_v34  ;;  %v648_v34 = vld [vmem:[#allocation2 + $0x3f8] sm:$0xff] }
 0x2f4   : > { %v3559_v45 = vadd.f32 %v7651_v38, %v3299_v13  ;;  %v3363_v57 = vld [vmem:[#allocation2 + $0x3e0] sm:$0xff]  ;;  %3042 = vst.msk [vmem:[#allocation2 + $0x1f0] sm:$0xff] %vm264_vm1, %v2785_v4  ;;  %v2914_v13 = vadd.f32 %v2560_v59, %v712_v62 }
 0x2f5   : > { %v4006_v36 = vmax.f32 %v3750_v53, 0.0  ;;  %v3623_v27 = vadd.f32 %v7651_v38, %v3363_v57  ;;  %v3427_v56 = vld [vmem:[#allocation2 + $0x5e0] sm:$0xff]  ;;  %3106 = vst.msk [vmem:[#allocation2 + $0x3f0] sm:$0xff] %vm264_vm1, %v2849_v63 }
 0x2f6   : > { %v3815_v28 = vmax.f32 %v3559_v45, 0.0  ;;  %v3687_v5 = vadd.f32 %v7987_v2, %v3427_v56  ;;  %v3491_v61 = vld [vmem:[#allocation2 + $0x7e0] sm:$0xff]  ;;  %3170 = vst.msk [vmem:[#allocation2 + $0x5f0] sm:$0xff] %vm264_vm1, %v2913_v39  ;;  %v2850_v39 = vadd.f32 %v2400_v10, %v648_v34 }
 0x2f7   : > { %v4262_v17 = vpack.c.bf16 %v4006_v36, %v4006_v36  ;;  %v3879_v22 = vmax.f32 %v3623_v27, 0.0  ;;  %v3751_v38 = vadd.f32 %v7987_v2, %v3491_v61  ;;  %v3300_v52 = vld [vmem:[#allocation2 + $0x1e8] sm:$0xff]  ;;  %3234 = vst.msk [vmem:[#allocation2 + $0x7f0] sm:$0xff] %vm264_vm1, %v2977_v15  ;;  %v2978_v15 = vadd.f32 %v2720_v14, %v776_v37 }
 0x2f8   : > { %v4071_v16 = vpack.c.bf16 %v3815_v28, %v3815_v28  ;;  %v3943_v24 = vmax.f32 %v3687_v5, 0.0  ;;  %v3560_v54 = vadd.f32 %v7987_v2, %v3300_v52  ;;  %v3364_v49 = vld [vmem:[#allocation2 + $0x3e8] sm:$0xff]  ;;  %3043 = vst.msk [vmem:[#allocation2 + $0x1f8] sm:$0xff] %vm264_vm1, %v2786_v30 }
 0x2f9   : > { %4519 = vst.msk [vmem:[%s5730_s29 + $0x3ec] sm:$0xf] %vm4267_vm2, %v4262_v17  ;;  %v4135_v41 = vpack.c.bf16 %v3879_v22, %v3879_v22  ;;  %v4007_v51 = vmax.f32 %v3751_v38, 0.0  ;;  %v3624_v20 = vadd.f32 %v7987_v2, %v3364_v49  ;;  %v3428_v31 = vld [vmem:[#allocation2 + $0x5e8] sm:$0xff] }
 0x2fa   : > { %4328 = vst.msk [vmem:[%s5730_s29 + $0xf0] sm:$0xf] %vm4267_vm2, %v4071_v16  ;;  %v4199_v9 = vpack.c.bf16 %v3943_v24, %v3943_v24  ;;  %v3816_v58 = vmax.f32 %v3560_v54, 0.0  ;;  %v3688_v23 = vadd.f32 %v7987_v2, %v3428_v31  ;;  %v3492_v60 = vld [vmem:[#allocation2 + $0x7e8] sm:$0xff] }
 0x2fb   : > { %4392 = vst.msk [vmem:[%s5730_s29 + $0x1f0] sm:$0xf] %vm4267_vm2, %v4135_v41  ;;  %v4263_v40 = vpack.c.bf16 %v4007_v51, %v4007_v51  ;;  %v3880_v1 = vmax.f32 %v3624_v20, 0.0  ;;  %v3752_v0 = vadd.f32 %v7987_v2, %v3492_v60  ;;  %v3301_v47 = vld [vmem:[#allocation2 + $0x1f0] sm:$0xff] }
 0x2fc   : > { %4456 = vst.msk [vmem:[%s5730_s29 + $0x2f0] sm:$0xf] %vm4267_vm2, %v4199_v9  ;;  %v4072_v7 = vpack.c.bf16 %v3816_v58, %v3816_v58  ;;  %v3944_v48 = vmax.f32 %v3688_v23, 0.0  ;;  %v3561_v8 = vadd.f32 %v7987_v2, %v3301_v47  ;;  %v3365_v21 = vld [vmem:[#allocation2 + $0x3f0] sm:$0xff] }
 0x2fd   : > { %4520 = vst.msk [vmem:[%s5730_s29 + $0x3f0] sm:$0xf] %vm4267_vm2, %v4263_v40  ;;  %v4136_v43 = vpack.c.bf16 %v3880_v1, %v3880_v1  ;;  %v4008_v33 = vmax.f32 %v3752_v0, 0.0  ;;  %v3625_v19 = vadd.f32 %v7987_v2, %v3365_v21  ;;  %v3429_v50 = vld [vmem:[#allocation2 + $0x5f0] sm:$0xff] }
 0x2fe   : > { %4329 = vst.msk [vmem:[%s5730_s29 + $0xf4] sm:$0xf] %vm4267_vm2, %v4072_v7  ;;  %v4200_v35 = vpack.c.bf16 %v3944_v48, %v3944_v48  ;;  %v3817_v12 = vmax.f32 %v3561_v8, 0.0  ;;  %v3689_v11 = vadd.f32 %v7987_v2, %v3429_v50  ;;  %v3493_v44 = vld [vmem:[#allocation2 + $0x7f0] sm:$0xff] }
 0x2ff   : > { %4393 = vst.msk [vmem:[%s5730_s29 + $0x1f4] sm:$0xf] %vm4267_vm2, %v4136_v43  ;;  %v4264_v18 = vpack.c.bf16 %v4008_v33, %v4008_v33  ;;  %v3881_v6 = vmax.f32 %v3625_v19, 0.0  ;;  %v3753_v26 = vadd.f32 %v7987_v2, %v3493_v44  ;;  %v3302_v42 = vld [vmem:[#allocation2 + $0x1f8] sm:$0xff] }
 0x300   : > { %4457 = vst.msk [vmem:[%s5730_s29 + $0x2f4] sm:$0xf] %vm4267_vm2, %v4200_v35  ;;  %v4073_v46 = vpack.c.bf16 %v3817_v12, %v3817_v12  ;;  %v3945_v55 = vmax.f32 %v3689_v11, 0.0  ;;  %v3562_v3 = vadd.f32 %v7987_v2, %v3302_v42 }
 0x301   : > { %4521 = vst.msk [vmem:[%s5730_s29 + $0x3f4] sm:$0xf] %vm4267_vm2, %v4264_v18  ;;  %v4137_v25 = vpack.c.bf16 %v3881_v6, %v3881_v6  ;;  %v4009_v4 = vmax.f32 %v3753_v26, 0.0 }
 0x302   : > { %4330 = vst.msk [vmem:[%s5730_s29 + $0xf8] sm:$0xf] %vm4267_vm2, %v4073_v46  ;;  %v4201_v32 = vpack.c.bf16 %v3945_v55, %v3945_v55  ;;  %v3818_v63 = vmax.f32 %v3562_v3, 0.0 }
 0x303   : > { %4394 = vst.msk [vmem:[%s5730_s29 + $0x1f8] sm:$0xf] %vm4267_vm2, %v4137_v25  ;;  %v4265_v29 = vpack.c.bf16 %v4009_v4, %v4009_v4 }
 0x304   : > { %4458 = vst.msk [vmem:[%s5730_s29 + $0x2f8] sm:$0xf] %vm4267_vm2, %v4201_v32  ;;  %v4074_v53 = vpack.c.bf16 %v3818_v63, %v3818_v63 }
 0x305   : > { %4522 = vst.msk [vmem:[%s5730_s29 + $0x3f8] sm:$0xf] %vm4267_vm2, %v4265_v29 }
 0x306   : > { %4331 = vst.msk [vmem:[%s5730_s29 + $0xfc] sm:$0xf] %vm4267_vm2, %v4074_v53 }
 0x307   : > { %3107 = vst.msk [vmem:[#allocation2 + $0x3f8] sm:$0xff] %vm264_vm1, %v2850_v39 }
 0x308   : > { %3171 = vst.msk [vmem:[#allocation2 + $0x5f8] sm:$0xff] %vm264_vm1, %v2914_v13 }
 0x309   : > { %3235 = vst.msk [vmem:[#allocation2 + $0x7f8] sm:$0xff] %vm264_vm1, %v2978_v15 }
 0x30e   : > { %v3366_v45 = vld [vmem:[#allocation2 + $0x3f8] sm:$0xff] }
 0x30f   : > { %v3626_v57 = vadd.f32 %v7987_v2, %v3366_v45  ;;  %v3430_v30 = vld [vmem:[#allocation2 + $0x5f8] sm:$0xff] }
 0x310   : > { %v3690_v36 = vadd.f32 %v7987_v2, %v3430_v30  ;;  %v3494_v27 = vld [vmem:[#allocation2 + $0x7f8] sm:$0xff] }
 0x311   : > { %v3882_v56 = vmax.f32 %v3626_v57, 0.0  ;;  %v3754_v28 = vadd.f32 %v7987_v2, %v3494_v27 }
 0x312   : > { %v3946_v5 = vmax.f32 %v3690_v36, 0.0 }
 0x313   : > { %v4138_v61 = vpack.c.bf16 %v3882_v56, %v3882_v56  ;;  %v4010_v17 = vmax.f32 %v3754_v28, 0.0 }
 0x314   : > { %v4202_v22 = vpack.c.bf16 %v3946_v5, %v3946_v5 }
 0x315   : > { %4395 = vst.msk [vmem:[%s5730_s29 + $0x1fc] sm:$0xf] %vm4267_vm2, %v4138_v61  ;;  %v4266_v38 = vpack.c.bf16 %v4010_v17, %v4010_v17 }
 0x316   : > { %4459 = vst.msk [vmem:[%s5730_s29 + $0x2fc] sm:$0xf] %vm4267_vm2, %v4202_v22 }
 0x317   : > { %4523 = vst.msk [vmem:[%s5730_s29 + $0x3fc] sm:$0xf] %vm4267_vm2, %v4266_v38 }
 0x318 PF: > { %s13_s14 = sadd.s32 1, %s5485_s14   ;;  %s8056_s12 = smov %s5481_s13 }
 0x319   : > { %p10_p5 = scmp.ge.s32.totalorder %s13_s14, 47   ;;  %s8057_s13 = smov %s8059_s15 }
 0x31b   :  { %12 = sbr.rel (!%p10_p5) target bundleno = 2 (0x2), region = 76 }

</bundles_post_ra>
